<compile_context>
chip_gen: v6e
topology: v6e:2x2x1
jax: 0.10.0
libtpu: 0.0.40
codegen_flags: <defaults>
</compile_context>

<pallas_src>
import jax
import jax.numpy as jnp
from jax.experimental import pallas as pl
from jax.experimental.pallas import tpu as pltpu

# ----------------------------- config ---------------------------------------
BATCH = 2
SEQ = 8
HIDDEN = 32
NUM_HEADS = 4
HEAD_DIM = HIDDEN // NUM_HEADS
NUM_LAYERS = 2
INTERMEDIATE = 64
VOCAB = 100
TYPE_VOCAB = 2
MAX_POS = 64
CLS_HIDDEN = 16          # cls_head_params['dim_hidden']
NUM_LABELS = 3           # classifier_params['num_labels']
LN_EPS = 1e-12

_VMEM = pl.BlockSpec(memory_space=pltpu.MemorySpace.VMEM)


# --------------------------- fused Pallas kernel ------------------------------
def _bert_forward_kernel(
    # activations / masks
    emb_sum_ref, emb_mask_ref, att_bias_ref,
    # embedding layernorm
    emb_g_ref, emb_b_ref,
    # stacked encoder-layer params (leading axis = layer index)
    qkv_w_ref, qkv_b_ref, o_w_ref, o_b_ref,
    ln1_g_ref, ln1_b_ref, ff1_w_ref, ff1_b_ref,
    ff2_w_ref, ff2_b_ref, ln2_g_ref, ln2_b_ref,
    # pooler + classification head
    pool_w_ref, pool_b_ref, cls1_w_ref, cls1_b_ref, cls2_w_ref, cls2_b_ref,
    # outputs
    seq_out_ref, cls_out_ref,
):
    scale = 1.0 / float(HEAD_DIM) ** 0.5

    def layernorm(x, g, b):
        mean = jnp.mean(x, axis=-1, keepdims=True)
        var = jnp.mean((x - mean) ** 2, axis=-1, keepdims=True)
        return (x - mean) * jax.lax.rsqrt(var + LN_EPS) * g + b

    def gelu(x):
        # TODO(synk): HF BERT uses exact erf-gelu; tanh approximation used here.
        return 0.5 * x * (1.0 + jnp.tanh(0.7978845608028654 *
                                         (x + 0.044715 * x * x * x)))

    # --- embeddings: LayerNorm(word+pos+type) * embedding_mask ---------------
    x = layernorm(emb_sum_ref[...], emb_g_ref[...], emb_b_ref[...]) * emb_mask_ref[...]

    # --- encoder (layers statically unrolled; all intermediates in vregs) ----
    for l in range(NUM_LAYERS):
        # fused Q/K/V projection: one (B*S, H) @ (H, 3H) matmul
        qkv = jnp.dot(x, qkv_w_ref[l], preferred_element_type=jnp.float32) + qkv_b_ref[l]
        q2 = qkv[:, 0 * HIDDEN:1 * HIDDEN]
        k2 = qkv[:, 1 * HIDDEN:2 * HIDDEN]
        v2 = qkv[:, 2 * HIDDEN:3 * HIDDEN]
        o_w = o_w_ref[l]                                      # (H, H)

        attn_rows = []
        for b in range(BATCH):                                # static unroll
            r0 = b * SEQ
            bias = att_bias_ref[b]                            # (1, S) additive
            acc = jnp.zeros((SEQ, HIDDEN), jnp.float32)
            for h in range(NUM_HEADS):                        # static unroll
                c0 = h * HEAD_DIM
                qh = q2[r0:r0 + SEQ, c0:c0 + HEAD_DIM]
                kh = k2[r0:r0 + SEQ, c0:c0 + HEAD_DIM]
                vh = v2[r0:r0 + SEQ, c0:c0 + HEAD_DIM]
                s = jnp.einsum("qd,kd->qk", qh, kh,
                               preferred_element_type=jnp.float32) * scale + bias
                s = s - jnp.max(s, axis=-1, keepdims=True)
                e = jnp.exp(s)
                p = e * pl.reciprocal(jnp.sum(e, axis=-1, keepdims=True), approx=True)
                ctx_h = jnp.dot(p, vh, preferred_element_type=jnp.float32)   # (S, dH)
                # output projection fused per head: ctx_h @ o_w[head rows, :]
                acc = acc + jnp.dot(ctx_h, o_w[c0:c0 + HEAD_DIM, :],
                                    preferred_element_type=jnp.float32)
            attn_rows.append(acc)
        attn_out = jnp.concatenate(attn_rows, axis=0) + o_b_ref[l]           # (B*S, H)

        # add + LayerNorm (fused)
        h1 = layernorm(attn_out + x, ln1_g_ref[l], ln1_b_ref[l])

        # feed-forward (gelu) + add + LayerNorm (fused)
        ff = gelu(jnp.dot(h1, ff1_w_ref[l], preferred_element_type=jnp.float32)
                  + ff1_b_ref[l])
        ff2 = jnp.dot(ff, ff2_w_ref[l], preferred_element_type=jnp.float32) + ff2_b_ref[l]
        x = layernorm(ff2 + h1, ln2_g_ref[l], ln2_b_ref[l])

    seq_out_ref[...] = x.astype(seq_out_ref.dtype)

    # --- pooler + classification head ----------------------------------------
    # TODO(synk): Dropout is identity here (inference semantics; no RNG state to match).
    cls_tok = jnp.concatenate([x[b * SEQ:b * SEQ + 1, :] for b in range(BATCH)],
                              axis=0)                                         # (B, H)
    pooled = jnp.tanh(jnp.dot(cls_tok, pool_w_ref[...],
                              preferred_element_type=jnp.float32) + pool_b_ref[...])
    hcls = jnp.tanh(jnp.dot(pooled, cls1_w_ref[...],
                            preferred_element_type=jnp.float32) + cls1_b_ref[...])
    logits = jnp.dot(hcls, cls2_w_ref[...],
                     preferred_element_type=jnp.float32) + cls2_b_ref[...]
    logits = logits - jnp.max(logits, axis=-1, keepdims=True)
    e = jnp.exp(logits)
    probs = e / jnp.sum(e, axis=-1, keepdims=True)     # exact divide: rows sum to 1
    cls_out_ref[...] = probs.astype(cls_out_ref.dtype)


_fused_forward = pl.pallas_call(
    _bert_forward_kernel,
    out_shape=(jax.ShapeDtypeStruct((BATCH * SEQ, HIDDEN), jnp.float32),
               jax.ShapeDtypeStruct((BATCH, NUM_LABELS), jnp.float32)),
    in_specs=[_VMEM] * 23,
    out_specs=(_VMEM, _VMEM),
)


# ------------------------------ model glue -----------------------------------
def bert_classifier_forward(packed, bert_inputs, attention_masks=None,
                            embedding_masks=None, positions=None):
    B, S = bert_inputs.shape
    if attention_masks is None:
        attention_masks = jnp.ones((B, S), jnp.float32)
    if positions is None:
        positions = jnp.broadcast_to(jnp.arange(S, dtype=jnp.int32), (B, S))
    token_type_ids = jnp.zeros((B, S), jnp.int32)

    # Embedding table gathers stay in plain JAX (no clean Pallas path at this
    # size); everything downstream runs in ONE fused Pallas kernel.
    emb_sum = (packed["word_emb"][bert_inputs]
               + packed["pos_emb"][positions]
               + packed["type_emb"][token_type_ids]).reshape(B * S, HIDDEN)

    if embedding_masks is None:
        emb_mask = jnp.ones((B * S, 1), jnp.float32)
    else:
        emb_mask = embedding_masks.astype(jnp.float32).reshape(B * S, 1)

    # HF get_extended_attention_mask semantics: additive -10000 on pad keys.
    att_bias = (1.0 - attention_masks.astype(jnp.float32))[:, None, :] * -10000.0

    seq2d, cls_p = _fused_forward(
        emb_sum, emb_mask, att_bias,
        packed["emb_ln_g"], packed["emb_ln_b"],
        packed["qkv_w"], packed["qkv_b"], packed["o_w"], packed["o_b"],
        packed["ln1_g"], packed["ln1_b"], packed["ff1_w"], packed["ff1_b"],
        packed["ff2_w"], packed["ff2_b"], packed["ln2_g"], packed["ln2_b"],
        packed["pool_w"], packed["pool_b"],
        packed["cls1_w"], packed["cls1_b"], packed["cls2_w"], packed["cls2_b"])

    sequence_output = seq2d.reshape(B, S, HIDDEN)
    return cls_p, sequence_output


# --------------------------- deterministic params ----------------------------
def init_params(key):
    keys = iter(jax.random.split(key, 64))

    def nrm(shape, std=0.02):
        return jax.random.normal(next(keys), shape, jnp.float32) * std

    def xavier(shape):  # xavier_normal_ for the cls head linears (in, out)
        std = (2.0 / (shape[0] + shape[1])) ** 0.5
        return jax.random.normal(next(keys), shape, jnp.float32) * std

    params = {
        "word_emb": nrm((VOCAB, HIDDEN)),
        "pos_emb": nrm((MAX_POS, HIDDEN)),
        "type_emb": nrm((TYPE_VOCAB, HIDDEN)),
        "emb_ln_g": jnp.ones((1, HIDDEN), jnp.float32),
        "emb_ln_b": jnp.zeros((1, HIDDEN), jnp.float32),
        "layers": [],
    }
    for _ in range(NUM_LAYERS):
        params["layers"].append({
            "q_w": nrm((HIDDEN, HIDDEN)), "q_b": jnp.zeros((1, HIDDEN), jnp.float32),
            "k_w": nrm((HIDDEN, HIDDEN)), "k_b": jnp.zeros((1, HIDDEN), jnp.float32),
            "v_w": nrm((HIDDEN, HIDDEN)), "v_b": jnp.zeros((1, HIDDEN), jnp.float32),
            "o_w": nrm((HIDDEN, HIDDEN)), "o_b": jnp.zeros((1, HIDDEN), jnp.float32),
            "ln1_g": jnp.ones((1, HIDDEN), jnp.float32),
            "ln1_b": jnp.zeros((1, HIDDEN), jnp.float32),
            "ff1_w": nrm((HIDDEN, INTERMEDIATE)),
            "ff1_b": jnp.zeros((1, INTERMEDIATE), jnp.float32),
            "ff2_w": nrm((INTERMEDIATE, HIDDEN)),
            "ff2_b": jnp.zeros((1, HIDDEN), jnp.float32),
            "ln2_g": jnp.ones((1, HIDDEN), jnp.float32),
            "ln2_b": jnp.zeros((1, HIDDEN), jnp.float32),
        })
    params["pool_w"] = nrm((HIDDEN, HIDDEN))
    params["pool_b"] = jnp.zeros((1, HIDDEN), jnp.float32)
    params["cls1_w"] = xavier((HIDDEN, CLS_HIDDEN))
    params["cls1_b"] = jnp.zeros((1, CLS_HIDDEN), jnp.float32)
    params["cls2_w"] = xavier((CLS_HIDDEN, NUM_LABELS))
    params["cls2_b"] = jnp.zeros((1, NUM_LABELS), jnp.float32)
    return params


def pack_params(params):
    """Stack per-layer params (leading layer axis) and fuse Q/K/V weights."""
    L = params["layers"]
    stack = lambda name: jnp.stack([lp[name] for lp in L])
    return {
        "word_emb": params["word_emb"],
        "pos_emb": params["pos_emb"],
        "type_emb": params["type_emb"],
        "emb_ln_g": params["emb_ln_g"], "emb_ln_b": params["emb_ln_b"],
        "qkv_w": jnp.stack([jnp.concatenate([lp["q_w"], lp["k_w"], lp["v_w"]], axis=1)
                            for lp in L]),                       # (L, H, 3H)
        "qkv_b": jnp.stack([jnp.concatenate([lp["q_b"], lp["k_b"], lp["v_b"]], axis=1)
                            for lp in L]),                       # (L, 1, 3H)
        "o_w": stack("o_w"), "o_b": stack("o_b"),
        "ln1_g": stack("ln1_g"), "ln1_b": stack("ln1_b"),
        "ff1_w": stack("ff1_w"), "ff1_b": stack("ff1_b"),
        "ff2_w": stack("ff2_w"), "ff2_b": stack("ff2_b"),
        "ln2_g": stack("ln2_g"), "ln2_b": stack("ln2_b"),
        "pool_w": params["pool_w"], "pool_b": params["pool_b"],
        "cls1_w": params["cls1_w"], "cls1_b": params["cls1_b"],
        "cls2_w": params["cls2_w"], "cls2_b": params["cls2_b"],
    }


# --------------------------------- main --------------------------------------
if __name__ == "__main__":
    root = jax.random.PRNGKey(0)
    k_par, k_ids, k_mask = jax.random.split(root, 3)

    params = init_params(k_par)
    packed = pack_params(params)

    bert_inputs = jax.random.randint(k_ids, (BATCH, SEQ), 0, VOCAB, dtype=jnp.int32)
    # attention mask: last two tokens of batch element 1 are padding
    attention_masks = jnp.ones((BATCH, SEQ), jnp.float32).at[1, -2:].set(0.0)
    # soft embedding mask in (0, 1]
    embedding_masks = jax.random.uniform(k_mask, (BATCH, SEQ), jnp.float32,
                                         minval=0.5, maxval=1.0)

    fwd = jax.jit(bert_classifier_forward)
    cls_p, exp_output = fwd(packed, bert_inputs, attention_masks, embedding_masks)
    jax.block_until_ready((cls_p, exp_output))

    # mirror the torch `assert torch.all(x == x)` NaN checks
    assert not bool(jnp.any(jnp.isnan(cls_p)))
    assert not bool(jnp.any(jnp.isnan(exp_output)))
    assert cls_p.shape == (BATCH, NUM_LABELS)
    assert exp_output.shape == (BATCH, SEQ, HIDDEN)
    # softmax rows sum to 1
    assert bool(jnp.allclose(jnp.sum(cls_p, axis=-1), 1.0, atol=1e-5))

    print("KERNEL_OK")
</pallas_src>

<mosaic_0001>
module attributes {stable_mosaic.version = 11 : i64} {
  func.func @_bert_forward_kernel(%arg0: memref<16x32xf32, #tpu.memory_space<vmem>>, %arg1: memref<16x1xf32, #tpu.memory_space<vmem>>, %arg2: memref<2x1x8xf32, #tpu.memory_space<vmem>>, %arg3: memref<1x32xf32, #tpu.memory_space<vmem>>, %arg4: memref<1x32xf32, #tpu.memory_space<vmem>>, %arg5: memref<2x32x96xf32, #tpu.memory_space<vmem>>, %arg6: memref<2x1x96xf32, #tpu.memory_space<vmem>>, %arg7: memref<2x32x32xf32, #tpu.memory_space<vmem>>, %arg8: memref<2x1x32xf32, #tpu.memory_space<vmem>>, %arg9: memref<2x1x32xf32, #tpu.memory_space<vmem>>, %arg10: memref<2x1x32xf32, #tpu.memory_space<vmem>>, %arg11: memref<2x32x64xf32, #tpu.memory_space<vmem>>, %arg12: memref<2x1x64xf32, #tpu.memory_space<vmem>>, %arg13: memref<2x64x32xf32, #tpu.memory_space<vmem>>, %arg14: memref<2x1x32xf32, #tpu.memory_space<vmem>>, %arg15: memref<2x1x32xf32, #tpu.memory_space<vmem>>, %arg16: memref<2x1x32xf32, #tpu.memory_space<vmem>>, %arg17: memref<32x32xf32, #tpu.memory_space<vmem>>, %arg18: memref<1x32xf32, #tpu.memory_space<vmem>>, %arg19: memref<32x16xf32, #tpu.memory_space<vmem>>, %arg20: memref<1x16xf32, #tpu.memory_space<vmem>>, %arg21: memref<16x3xf32, #tpu.memory_space<vmem>>, %arg22: memref<1x3xf32, #tpu.memory_space<vmem>>, %arg23: memref<16x32xf32, #tpu.memory_space<vmem>>, %arg24: memref<2x3xf32, #tpu.memory_space<vmem>>) attributes {dimension_semantics = [], scalar_prefetch = 0 : i64, scratch_operands = 0 : i64, tpu.core_type = #tpu.core_type<tc>} {
    %c0 = arith.constant 0 : index
    %c0_0 = arith.constant 0 : index
    %0 = vector.load %arg0[%c0, %c0_0] : memref<16x32xf32, #tpu.memory_space<vmem>>, vector<16x32xf32>
    %c0_1 = arith.constant 0 : index
    %c0_2 = arith.constant 0 : index
    %1 = vector.load %arg3[%c0_1, %c0_2] : memref<1x32xf32, #tpu.memory_space<vmem>>, vector<1x32xf32>
    %c0_3 = arith.constant 0 : index
    %c0_4 = arith.constant 0 : index
    %2 = vector.load %arg4[%c0_3, %c0_4] : memref<1x32xf32, #tpu.memory_space<vmem>>, vector<1x32xf32>
    %cst = arith.constant dense<0.000000e+00> : vector<16xf32>
    %3 = vector.multi_reduction <add>, %0, %cst [1] : vector<16x32xf32> to vector<16xf32>
    %4 = vector.shape_cast %3 : vector<16xf32> to vector<16x1xf32>
    %cst_5 = arith.constant 3.200000e+01 : f32
    %5 = vector.broadcast %cst_5 : f32 to vector<16x1xf32>
    %6 = arith.divf %4, %5 : vector<16x1xf32>
    %7 = vector.broadcast %6 : vector<16x1xf32> to vector<16x32xf32>
    %8 = arith.subf %0, %7 : vector<16x32xf32>
    %9 = arith.mulf %8, %8 : vector<16x32xf32>
    %cst_6 = arith.constant dense<0.000000e+00> : vector<16xf32>
    %10 = vector.multi_reduction <add>, %9, %cst_6 [1] : vector<16x32xf32> to vector<16xf32>
    %11 = vector.shape_cast %10 : vector<16xf32> to vector<16x1xf32>
    %cst_7 = arith.constant 3.200000e+01 : f32
    %12 = vector.broadcast %cst_7 : f32 to vector<16x1xf32>
    %13 = arith.divf %11, %12 : vector<16x1xf32>
    %14 = vector.broadcast %6 : vector<16x1xf32> to vector<16x32xf32>
    %15 = arith.subf %0, %14 : vector<16x32xf32>
    %cst_8 = arith.constant 9.99999996E-13 : f32
    %16 = vector.broadcast %cst_8 : f32 to vector<16x1xf32>
    %17 = arith.addf %13, %16 : vector<16x1xf32>
    %18 = math.rsqrt %17 : vector<16x1xf32>
    %19 = vector.broadcast %18 : vector<16x1xf32> to vector<16x32xf32>
    %20 = arith.mulf %15, %19 : vector<16x32xf32>
    %21 = vector.broadcast %1 : vector<1x32xf32> to vector<16x32xf32>
    %22 = arith.mulf %20, %21 : vector<16x32xf32>
    %23 = vector.broadcast %2 : vector<1x32xf32> to vector<16x32xf32>
    %24 = arith.addf %22, %23 : vector<16x32xf32>
    %c0_9 = arith.constant 0 : index
    %c0_10 = arith.constant 0 : index
    %25 = vector.load %arg1[%c0_9, %c0_10] : memref<16x1xf32, #tpu.memory_space<vmem>>, vector<16x1xf32>
    %26 = vector.broadcast %25 : vector<16x1xf32> to vector<16x32xf32>
    %27 = arith.mulf %24, %26 : vector<16x32xf32>
    %c0_11 = arith.constant 0 : index
    %c0_12 = arith.constant 0 : index
    %c0_13 = arith.constant 0 : index
    %28 = vector.load %arg5[%c0_11, %c0_12, %c0_13] : memref<2x32x96xf32, #tpu.memory_space<vmem>>, vector<1x32x96xf32>
    %29 = vector.shape_cast %28 : vector<1x32x96xf32> to vector<32x96xf32>
    %cst_14 = arith.constant dense<0.000000e+00> : vector<16x96xf32>
    %30 = tpu.matmul %27, %29, %cst_14 {dimension_numbers = #tpu.dot_dimension_numbers<[1], [0], [0], [1], [0, 0, 1, 1], [], []>} : vector<16x32xf32>, vector<32x96xf32>, vector<16x96xf32> -> vector<16x96xf32>
    %c0_15 = arith.constant 0 : index
    %c0_16 = arith.constant 0 : index
    %c0_17 = arith.constant 0 : index
    %31 = vector.load %arg6[%c0_15, %c0_16, %c0_17] : memref<2x1x96xf32, #tpu.memory_space<vmem>>, vector<1x1x96xf32>
    %32 = vector.shape_cast %31 : vector<1x1x96xf32> to vector<1x96xf32>
    %33 = vector.broadcast %32 : vector<1x96xf32> to vector<16x96xf32>
    %34 = arith.addf %30, %33 : vector<16x96xf32>
    %35 = vector.extract_strided_slice %34 {offsets = [0, 0], sizes = [16, 32], strides = [1, 1]} : vector<16x96xf32> to vector<16x32xf32>
    %36 = vector.extract_strided_slice %34 {offsets = [0, 32], sizes = [16, 32], strides = [1, 1]} : vector<16x96xf32> to vector<16x32xf32>
    %37 = vector.extract_strided_slice %34 {offsets = [0, 64], sizes = [16, 32], strides = [1, 1]} : vector<16x96xf32> to vector<16x32xf32>
    %c0_18 = arith.constant 0 : index
    %c0_19 = arith.constant 0 : index
    %c0_20 = arith.constant 0 : index
    %38 = vector.load %arg7[%c0_18, %c0_19, %c0_20] : memref<2x32x32xf32, #tpu.memory_space<vmem>>, vector<1x32x32xf32>
    %39 = vector.shape_cast %38 : vector<1x32x32xf32> to vector<32x32xf32>
    %c0_21 = arith.constant 0 : index
    %c0_22 = arith.constant 0 : index
    %c0_23 = arith.constant 0 : index
    %40 = vector.load %arg2[%c0_21, %c0_22, %c0_23] : memref<2x1x8xf32, #tpu.memory_space<vmem>>, vector<1x1x8xf32>
    %41 = vector.shape_cast %40 : vector<1x1x8xf32> to vector<1x8xf32>
    %cst_24 = arith.constant 0.000000e+00 : f32
    %42 = vector.broadcast %cst_24 : f32 to vector<8x32xf32>
    %43 = vector.extract_strided_slice %35 {offsets = [0, 0], sizes = [8, 8], strides = [1, 1]} : vector<16x32xf32> to vector<8x8xf32>
    %44 = vector.extract_strided_slice %36 {offsets = [0, 0], sizes = [8, 8], strides = [1, 1]} : vector<16x32xf32> to vector<8x8xf32>
    %45 = vector.extract_strided_slice %37 {offsets = [0, 0], sizes = [8, 8], strides = [1, 1]} : vector<16x32xf32> to vector<8x8xf32>
    "tpu.trace_start"() <{level = 10 : i32, message = "qd,kd->qk"}> : () -> ()
    %cst_25 = arith.constant dense<0.000000e+00> : vector<8x8xf32>
    %46 = tpu.matmul %43, %44, %cst_25 {dimension_numbers = #tpu.dot_dimension_numbers<[1], [1], [0], [0], [0, 0, 1, 0], [], []>} : vector<8x8xf32>, vector<8x8xf32>, vector<8x8xf32> -> vector<8x8xf32>
    "tpu.trace_stop"() : () -> ()
    %cst_26 = arith.constant 0.353553385 : f32
    %47 = vector.broadcast %cst_26 : f32 to vector<8x8xf32>
    %48 = arith.mulf %46, %47 : vector<8x8xf32>
    %49 = vector.broadcast %41 : vector<1x8xf32> to vector<8x8xf32>
    %50 = arith.addf %48, %49 : vector<8x8xf32>
    %cst_27 = arith.constant dense<0xFF800000> : vector<8xf32>
    %51 = vector.multi_reduction <maximumf>, %50, %cst_27 [1] : vector<8x8xf32> to vector<8xf32>
    %52 = vector.shape_cast %51 : vector<8xf32> to vector<8x1xf32>
    %53 = vector.broadcast %52 : vector<8x1xf32> to vector<8x8xf32>
    %54 = arith.subf %50, %53 : vector<8x8xf32>
    %55 = math.exp %54 : vector<8x8xf32>
    %cst_28 = arith.constant dense<0.000000e+00> : vector<8xf32>
    %56 = vector.multi_reduction <add>, %55, %cst_28 [1] : vector<8x8xf32> to vector<8xf32>
    %57 = vector.shape_cast %56 : vector<8xf32> to vector<8x1xf32>
    %58 = tpu.reciprocal %57 {approx = true} : vector<8x1xf32> -> vector<8x1xf32>
    %59 = vector.broadcast %58 : vector<8x1xf32> to vector<8x8xf32>
    %60 = arith.mulf %55, %59 : vector<8x8xf32>
    %cst_29 = arith.constant dense<0.000000e+00> : vector<8x8xf32>
    %61 = tpu.matmul %60, %45, %cst_29 {dimension_numbers = #tpu.dot_dimension_numbers<[1], [0], [0], [1], [0, 0, 1, 1], [], []>} : vector<8x8xf32>, vector<8x8xf32>, vector<8x8xf32> -> vector<8x8xf32>
    %62 = vector.extract_strided_slice %39 {offsets = [0, 0], sizes = [8, 32], strides = [1, 1]} : vector<32x32xf32> to vector<8x32xf32>
    %cst_30 = arith.constant dense<0.000000e+00> : vector<8x32xf32>
    %63 = tpu.matmul %61, %62, %cst_30 {dimension_numbers = #tpu.dot_dimension_numbers<[1], [0], [0], [1], [0, 0, 1, 1], [], []>} : vector<8x8xf32>, vector<8x32xf32>, vector<8x32xf32> -> vector<8x32xf32>
    %64 = arith.addf %42, %63 : vector<8x32xf32>
    %65 = vector.extract_strided_slice %35 {offsets = [0, 8], sizes = [8, 8], strides = [1, 1]} : vector<16x32xf32> to vector<8x8xf32>
    %66 = vector.extract_strided_slice %36 {offsets = [0, 8], sizes = [8, 8], strides = [1, 1]} : vector<16x32xf32> to vector<8x8xf32>
    %67 = vector.extract_strided_slice %37 {offsets = [0, 8], sizes = [8, 8], strides = [1, 1]} : vector<16x32xf32> to vector<8x8xf32>
    "tpu.trace_start"() <{level = 10 : i32, message = "qd,kd->qk"}> : () -> ()
    %cst_31 = arith.constant dense<0.000000e+00> : vector<8x8xf32>
    %68 = tpu.matmul %65, %66, %cst_31 {dimension_numbers = #tpu.dot_dimension_numbers<[1], [1], [0], [0], [0, 0, 1, 0], [], []>} : vector<8x8xf32>, vector<8x8xf32>, vector<8x8xf32> -> vector<8x8xf32>
    "tpu.trace_stop"() : () -> ()
    %cst_32 = arith.constant 0.353553385 : f32
    %69 = vector.broadcast %cst_32 : f32 to vector<8x8xf32>
    %70 = arith.mulf %68, %69 : vector<8x8xf32>
    %71 = vector.broadcast %41 : vector<1x8xf32> to vector<8x8xf32>
    %72 = arith.addf %70, %71 : vector<8x8xf32>
    %cst_33 = arith.constant dense<0xFF800000> : vector<8xf32>
    %73 = vector.multi_reduction <maximumf>, %72, %cst_33 [1] : vector<8x8xf32> to vector<8xf32>
    %74 = vector.shape_cast %73 : vector<8xf32> to vector<8x1xf32>
    %75 = vector.broadcast %74 : vector<8x1xf32> to vector<8x8xf32>
    %76 = arith.subf %72, %75 : vector<8x8xf32>
    %77 = math.exp %76 : vector<8x8xf32>
    %cst_34 = arith.constant dense<0.000000e+00> : vector<8xf32>
    %78 = vector.multi_reduction <add>, %77, %cst_34 [1] : vector<8x8xf32> to vector<8xf32>
    %79 = vector.shape_cast %78 : vector<8xf32> to vector<8x1xf32>
    %80 = tpu.reciprocal %79 {approx = true} : vector<8x1xf32> -> vector<8x1xf32>
    %81 = vector.broadcast %80 : vector<8x1xf32> to vector<8x8xf32>
    %82 = arith.mulf %77, %81 : vector<8x8xf32>
    %cst_35 = arith.constant dense<0.000000e+00> : vector<8x8xf32>
    %83 = tpu.matmul %82, %67, %cst_35 {dimension_numbers = #tpu.dot_dimension_numbers<[1], [0], [0], [1], [0, 0, 1, 1], [], []>} : vector<8x8xf32>, vector<8x8xf32>, vector<8x8xf32> -> vector<8x8xf32>
    %84 = vector.extract_strided_slice %39 {offsets = [8, 0], sizes = [8, 32], strides = [1, 1]} : vector<32x32xf32> to vector<8x32xf32>
    %cst_36 = arith.constant dense<0.000000e+00> : vector<8x32xf32>
    %85 = tpu.matmul %83, %84, %cst_36 {dimension_numbers = #tpu.dot_dimension_numbers<[1], [0], [0], [1], [0, 0, 1, 1], [], []>} : vector<8x8xf32>, vector<8x32xf32>, vector<8x32xf32> -> vector<8x32xf32>
    %86 = arith.addf %64, %85 : vector<8x32xf32>
    %87 = vector.extract_strided_slice %35 {offsets = [0, 16], sizes = [8, 8], strides = [1, 1]} : vector<16x32xf32> to vector<8x8xf32>
    %88 = vector.extract_strided_slice %36 {offsets = [0, 16], sizes = [8, 8], strides = [1, 1]} : vector<16x32xf32> to vector<8x8xf32>
    %89 = vector.extract_strided_slice %37 {offsets = [0, 16], sizes = [8, 8], strides = [1, 1]} : vector<16x32xf32> to vector<8x8xf32>
    "tpu.trace_start"() <{level = 10 : i32, message = "qd,kd->qk"}> : () -> ()
    %cst_37 = arith.constant dense<0.000000e+00> : vector<8x8xf32>
    %90 = tpu.matmul %87, %88, %cst_37 {dimension_numbers = #tpu.dot_dimension_numbers<[1], [1], [0], [0], [0, 0, 1, 0], [], []>} : vector<8x8xf32>, vector<8x8xf32>, vector<8x8xf32> -> vector<8x8xf32>
    "tpu.trace_stop"() : () -> ()
    %cst_38 = arith.constant 0.353553385 : f32
    %91 = vector.broadcast %cst_38 : f32 to vector<8x8xf32>
    %92 = arith.mulf %90, %91 : vector<8x8xf32>
    %93 = vector.broadcast %41 : vector<1x8xf32> to vector<8x8xf32>
    %94 = arith.addf %92, %93 : vector<8x8xf32>
    %cst_39 = arith.constant dense<0xFF800000> : vector<8xf32>
    %95 = vector.multi_reduction <maximumf>, %94, %cst_39 [1] : vector<8x8xf32> to vector<8xf32>
    %96 = vector.shape_cast %95 : vector<8xf32> to vector<8x1xf32>
    %97 = vector.broadcast %96 : vector<8x1xf32> to vector<8x8xf32>
    %98 = arith.subf %94, %97 : vector<8x8xf32>
    %99 = math.exp %98 : vector<8x8xf32>
    %cst_40 = arith.constant dense<0.000000e+00> : vector<8xf32>
    %100 = vector.multi_reduction <add>, %99, %cst_40 [1] : vector<8x8xf32> to vector<8xf32>
    %101 = vector.shape_cast %100 : vector<8xf32> to vector<8x1xf32>
    %102 = tpu.reciprocal %101 {approx = true} : vector<8x1xf32> -> vector<8x1xf32>
    %103 = vector.broadcast %102 : vector<8x1xf32> to vector<8x8xf32>
    %104 = arith.mulf %99, %103 : vector<8x8xf32>
    %cst_41 = arith.constant dense<0.000000e+00> : vector<8x8xf32>
    %105 = tpu.matmul %104, %89, %cst_41 {dimension_numbers = #tpu.dot_dimension_numbers<[1], [0], [0], [1], [0, 0, 1, 1], [], []>} : vector<8x8xf32>, vector<8x8xf32>, vector<8x8xf32> -> vector<8x8xf32>
    %106 = vector.extract_strided_slice %39 {offsets = [16, 0], sizes = [8, 32], strides = [1, 1]} : vector<32x32xf32> to vector<8x32xf32>
    %cst_42 = arith.constant dense<0.000000e+00> : vector<8x32xf32>
    %107 = tpu.matmul %105, %106, %cst_42 {dimension_numbers = #tpu.dot_dimension_numbers<[1], [0], [0], [1], [0, 0, 1, 1], [], []>} : vector<8x8xf32>, vector<8x32xf32>, vector<8x32xf32> -> vector<8x32xf32>
    %108 = arith.addf %86, %107 : vector<8x32xf32>
    %109 = vector.extract_strided_slice %35 {offsets = [0, 24], sizes = [8, 8], strides = [1, 1]} : vector<16x32xf32> to vector<8x8xf32>
    %110 = vector.extract_strided_slice %36 {offsets = [0, 24], sizes = [8, 8], strides = [1, 1]} : vector<16x32xf32> to vector<8x8xf32>
    %111 = vector.extract_strided_slice %37 {offsets = [0, 24], sizes = [8, 8], strides = [1, 1]} : vector<16x32xf32> to vector<8x8xf32>
    "tpu.trace_start"() <{level = 10 : i32, message = "qd,kd->qk"}> : () -> ()
    %cst_43 = arith.constant dense<0.000000e+00> : vector<8x8xf32>
    %112 = tpu.matmul %109, %110, %cst_43 {dimension_numbers = #tpu.dot_dimension_numbers<[1], [1], [0], [0], [0, 0, 1, 0], [], []>} : vector<8x8xf32>, vector<8x8xf32>, vector<8x8xf32> -> vector<8x8xf32>
    "tpu.trace_stop"() : () -> ()
    %cst_44 = arith.constant 0.353553385 : f32
    %113 = vector.broadcast %cst_44 : f32 to vector<8x8xf32>
    %114 = arith.mulf %112, %113 : vector<8x8xf32>
    %115 = vector.broadcast %41 : vector<1x8xf32> to vector<8x8xf32>
    %116 = arith.addf %114, %115 : vector<8x8xf32>
    %cst_45 = arith.constant dense<0xFF800000> : vector<8xf32>
    %117 = vector.multi_reduction <maximumf>, %116, %cst_45 [1] : vector<8x8xf32> to vector<8xf32>
    %118 = vector.shape_cast %117 : vector<8xf32> to vector<8x1xf32>
    %119 = vector.broadcast %118 : vector<8x1xf32> to vector<8x8xf32>
    %120 = arith.subf %116, %119 : vector<8x8xf32>
    %121 = math.exp %120 : vector<8x8xf32>
    %cst_46 = arith.constant dense<0.000000e+00> : vector<8xf32>
    %122 = vector.multi_reduction <add>, %121, %cst_46 [1] : vector<8x8xf32> to vector<8xf32>
    %123 = vector.shape_cast %122 : vector<8xf32> to vector<8x1xf32>
    %124 = tpu.reciprocal %123 {approx = true} : vector<8x1xf32> -> vector<8x1xf32>
    %125 = vector.broadcast %124 : vector<8x1xf32> to vector<8x8xf32>
    %126 = arith.mulf %121, %125 : vector<8x8xf32>
    %cst_47 = arith.constant dense<0.000000e+00> : vector<8x8xf32>
    %127 = tpu.matmul %126, %111, %cst_47 {dimension_numbers = #tpu.dot_dimension_numbers<[1], [0], [0], [1], [0, 0, 1, 1], [], []>} : vector<8x8xf32>, vector<8x8xf32>, vector<8x8xf32> -> vector<8x8xf32>
    %128 = vector.extract_strided_slice %39 {offsets = [24, 0], sizes = [8, 32], strides = [1, 1]} : vector<32x32xf32> to vector<8x32xf32>
    %cst_48 = arith.constant dense<0.000000e+00> : vector<8x32xf32>
    %129 = tpu.matmul %127, %128, %cst_48 {dimension_numbers = #tpu.dot_dimension_numbers<[1], [0], [0], [1], [0, 0, 1, 1], [], []>} : vector<8x8xf32>, vector<8x32xf32>, vector<8x32xf32> -> vector<8x32xf32>
    %130 = arith.addf %108, %129 : vector<8x32xf32>
    %c1 = arith.constant 1 : index
    %c0_49 = arith.constant 0 : index
    %c0_50 = arith.constant 0 : index
    %131 = vector.load %arg2[%c1, %c0_49, %c0_50] : memref<2x1x8xf32, #tpu.memory_space<vmem>>, vector<1x1x8xf32>
    %132 = vector.shape_cast %131 : vector<1x1x8xf32> to vector<1x8xf32>
    %cst_51 = arith.constant 0.000000e+00 : f32
    %133 = vector.broadcast %cst_51 : f32 to vector<8x32xf32>
    %134 = vector.extract_strided_slice %35 {offsets = [8, 0], sizes = [8, 8], strides = [1, 1]} : vector<16x32xf32> to vector<8x8xf32>
    %135 = vector.extract_strided_slice %36 {offsets = [8, 0], sizes = [8, 8], strides = [1, 1]} : vector<16x32xf32> to vector<8x8xf32>
    %136 = vector.extract_strided_slice %37 {offsets = [8, 0], sizes = [8, 8], strides = [1, 1]} : vector<16x32xf32> to vector<8x8xf32>
    "tpu.trace_start"() <{level = 10 : i32, message = "qd,kd->qk"}> : () -> ()
    %cst_52 = arith.constant dense<0.000000e+00> : vector<8x8xf32>
    %137 = tpu.matmul %134, %135, %cst_52 {dimension_numbers = #tpu.dot_dimension_numbers<[1], [1], [0], [0], [0, 0, 1, 0], [], []>} : vector<8x8xf32>, vector<8x8xf32>, vector<8x8xf32> -> vector<8x8xf32>
    "tpu.trace_stop"() : () -> ()
    %cst_53 = arith.constant 0.353553385 : f32
    %138 = vector.broadcast %cst_53 : f32 to vector<8x8xf32>
    %139 = arith.mulf %137, %138 : vector<8x8xf32>
    %140 = vector.broadcast %132 : vector<1x8xf32> to vector<8x8xf32>
    %141 = arith.addf %139, %140 : vector<8x8xf32>
    %cst_54 = arith.constant dense<0xFF800000> : vector<8xf32>
    %142 = vector.multi_reduction <maximumf>, %141, %cst_54 [1] : vector<8x8xf32> to vector<8xf32>
    %143 = vector.shape_cast %142 : vector<8xf32> to vector<8x1xf32>
    %144 = vector.broadcast %143 : vector<8x1xf32> to vector<8x8xf32>
    %145 = arith.subf %141, %144 : vector<8x8xf32>
    %146 = math.exp %145 : vector<8x8xf32>
    %cst_55 = arith.constant dense<0.000000e+00> : vector<8xf32>
    %147 = vector.multi_reduction <add>, %146, %cst_55 [1] : vector<8x8xf32> to vector<8xf32>
    %148 = vector.shape_cast %147 : vector<8xf32> to vector<8x1xf32>
    %149 = tpu.reciprocal %148 {approx = true} : vector<8x1xf32> -> vector<8x1xf32>
    %150 = vector.broadcast %149 : vector<8x1xf32> to vector<8x8xf32>
    %151 = arith.mulf %146, %150 : vector<8x8xf32>
    %cst_56 = arith.constant dense<0.000000e+00> : vector<8x8xf32>
    %152 = tpu.matmul %151, %136, %cst_56 {dimension_numbers = #tpu.dot_dimension_numbers<[1], [0], [0], [1], [0, 0, 1, 1], [], []>} : vector<8x8xf32>, vector<8x8xf32>, vector<8x8xf32> -> vector<8x8xf32>
    %153 = vector.extract_strided_slice %39 {offsets = [0, 0], sizes = [8, 32], strides = [1, 1]} : vector<32x32xf32> to vector<8x32xf32>
    %cst_57 = arith.constant dense<0.000000e+00> : vector<8x32xf32>
    %154 = tpu.matmul %152, %153, %cst_57 {dimension_numbers = #tpu.dot_dimension_numbers<[1], [0], [0], [1], [0, 0, 1, 1], [], []>} : vector<8x8xf32>, vector<8x32xf32>, vector<8x32xf32> -> vector<8x32xf32>
    %155 = arith.addf %133, %154 : vector<8x32xf32>
    %156 = vector.extract_strided_slice %35 {offsets = [8, 8], sizes = [8, 8], strides = [1, 1]} : vector<16x32xf32> to vector<8x8xf32>
    %157 = vector.extract_strided_slice %36 {offsets = [8, 8], sizes = [8, 8], strides = [1, 1]} : vector<16x32xf32> to vector<8x8xf32>
    %158 = vector.extract_strided_slice %37 {offsets = [8, 8], sizes = [8, 8], strides = [1, 1]} : vector<16x32xf32> to vector<8x8xf32>
    "tpu.trace_start"() <{level = 10 : i32, message = "qd,kd->qk"}> : () -> ()
    %cst_58 = arith.constant dense<0.000000e+00> : vector<8x8xf32>
    %159 = tpu.matmul %156, %157, %cst_58 {dimension_numbers = #tpu.dot_dimension_numbers<[1], [1], [0], [0], [0, 0, 1, 0], [], []>} : vector<8x8xf32>, vector<8x8xf32>, vector<8x8xf32> -> vector<8x8xf32>
    "tpu.trace_stop"() : () -> ()
    %cst_59 = arith.constant 0.353553385 : f32
    %160 = vector.broadcast %cst_59 : f32 to vector<8x8xf32>
    %161 = arith.mulf %159, %160 : vector<8x8xf32>
    %162 = vector.broadcast %132 : vector<1x8xf32> to vector<8x8xf32>
    %163 = arith.addf %161, %162 : vector<8x8xf32>
    %cst_60 = arith.constant dense<0xFF800000> : vector<8xf32>
    %164 = vector.multi_reduction <maximumf>, %163, %cst_60 [1] : vector<8x8xf32> to vector<8xf32>
    %165 = vector.shape_cast %164 : vector<8xf32> to vector<8x1xf32>
    %166 = vector.broadcast %165 : vector<8x1xf32> to vector<8x8xf32>
    %167 = arith.subf %163, %166 : vector<8x8xf32>
    %168 = math.exp %167 : vector<8x8xf32>
    %cst_61 = arith.constant dense<0.000000e+00> : vector<8xf32>
    %169 = vector.multi_reduction <add>, %168, %cst_61 [1] : vector<8x8xf32> to vector<8xf32>
    %170 = vector.shape_cast %169 : vector<8xf32> to vector<8x1xf32>
    %171 = tpu.reciprocal %170 {approx = true} : vector<8x1xf32> -> vector<8x1xf32>
    %172 = vector.broadcast %171 : vector<8x1xf32> to vector<8x8xf32>
    %173 = arith.mulf %168, %172 : vector<8x8xf32>
    %cst_62 = arith.constant dense<0.000000e+00> : vector<8x8xf32>
    %174 = tpu.matmul %173, %158, %cst_62 {dimension_numbers = #tpu.dot_dimension_numbers<[1], [0], [0], [1], [0, 0, 1, 1], [], []>} : vector<8x8xf32>, vector<8x8xf32>, vector<8x8xf32> -> vector<8x8xf32>
    %175 = vector.extract_strided_slice %39 {offsets = [8, 0], sizes = [8, 32], strides = [1, 1]} : vector<32x32xf32> to vector<8x32xf32>
    %cst_63 = arith.constant dense<0.000000e+00> : vector<8x32xf32>
    %176 = tpu.matmul %174, %175, %cst_63 {dimension_numbers = #tpu.dot_dimension_numbers<[1], [0], [0], [1], [0, 0, 1, 1], [], []>} : vector<8x8xf32>, vector<8x32xf32>, vector<8x32xf32> -> vector<8x32xf32>
    %177 = arith.addf %155, %176 : vector<8x32xf32>
    %178 = vector.extract_strided_slice %35 {offsets = [8, 16], sizes = [8, 8], strides = [1, 1]} : vector<16x32xf32> to vector<8x8xf32>
    %179 = vector.extract_strided_slice %36 {offsets = [8, 16], sizes = [8, 8], strides = [1, 1]} : vector<16x32xf32> to vector<8x8xf32>
    %180 = vector.extract_strided_slice %37 {offsets = [8, 16], sizes = [8, 8], strides = [1, 1]} : vector<16x32xf32> to vector<8x8xf32>
    "tpu.trace_start"() <{level = 10 : i32, message = "qd,kd->qk"}> : () -> ()
    %cst_64 = arith.constant dense<0.000000e+00> : vector<8x8xf32>
    %181 = tpu.matmul %178, %179, %cst_64 {dimension_numbers = #tpu.dot_dimension_numbers<[1], [1], [0], [0], [0, 0, 1, 0], [], []>} : vector<8x8xf32>, vector<8x8xf32>, vector<8x8xf32> -> vector<8x8xf32>
    "tpu.trace_stop"() : () -> ()
    %cst_65 = arith.constant 0.353553385 : f32
    %182 = vector.broadcast %cst_65 : f32 to vector<8x8xf32>
    %183 = arith.mulf %181, %182 : vector<8x8xf32>
    %184 = vector.broadcast %132 : vector<1x8xf32> to vector<8x8xf32>
    %185 = arith.addf %183, %184 : vector<8x8xf32>
    %cst_66 = arith.constant dense<0xFF800000> : vector<8xf32>
    %186 = vector.multi_reduction <maximumf>, %185, %cst_66 [1] : vector<8x8xf32> to vector<8xf32>
    %187 = vector.shape_cast %186 : vector<8xf32> to vector<8x1xf32>
    %188 = vector.broadcast %187 : vector<8x1xf32> to vector<8x8xf32>
    %189 = arith.subf %185, %188 : vector<8x8xf32>
    %190 = math.exp %189 : vector<8x8xf32>
    %cst_67 = arith.constant dense<0.000000e+00> : vector<8xf32>
    %191 = vector.multi_reduction <add>, %190, %cst_67 [1] : vector<8x8xf32> to vector<8xf32>
    %192 = vector.shape_cast %191 : vector<8xf32> to vector<8x1xf32>
    %193 = tpu.reciprocal %192 {approx = true} : vector<8x1xf32> -> vector<8x1xf32>
    %194 = vector.broadcast %193 : vector<8x1xf32> to vector<8x8xf32>
    %195 = arith.mulf %190, %194 : vector<8x8xf32>
    %cst_68 = arith.constant dense<0.000000e+00> : vector<8x8xf32>
    %196 = tpu.matmul %195, %180, %cst_68 {dimension_numbers = #tpu.dot_dimension_numbers<[1], [0], [0], [1], [0, 0, 1, 1], [], []>} : vector<8x8xf32>, vector<8x8xf32>, vector<8x8xf32> -> vector<8x8xf32>
    %197 = vector.extract_strided_slice %39 {offsets = [16, 0], sizes = [8, 32], strides = [1, 1]} : vector<32x32xf32> to vector<8x32xf32>
    %cst_69 = arith.constant dense<0.000000e+00> : vector<8x32xf32>
    %198 = tpu.matmul %196, %197, %cst_69 {dimension_numbers = #tpu.dot_dimension_numbers<[1], [0], [0], [1], [0, 0, 1, 1], [], []>} : vector<8x8xf32>, vector<8x32xf32>, vector<8x32xf32> -> vector<8x32xf32>
    %199 = arith.addf %177, %198 : vector<8x32xf32>
    %200 = vector.extract_strided_slice %35 {offsets = [8, 24], sizes = [8, 8], strides = [1, 1]} : vector<16x32xf32> to vector<8x8xf32>
    %201 = vector.extract_strided_slice %36 {offsets = [8, 24], sizes = [8, 8], strides = [1, 1]} : vector<16x32xf32> to vector<8x8xf32>
    %202 = vector.extract_strided_slice %37 {offsets = [8, 24], sizes = [8, 8], strides = [1, 1]} : vector<16x32xf32> to vector<8x8xf32>
    "tpu.trace_start"() <{level = 10 : i32, message = "qd,kd->qk"}> : () -> ()
    %cst_70 = arith.constant dense<0.000000e+00> : vector<8x8xf32>
    %203 = tpu.matmul %200, %201, %cst_70 {dimension_numbers = #tpu.dot_dimension_numbers<[1], [1], [0], [0], [0, 0, 1, 0], [], []>} : vector<8x8xf32>, vector<8x8xf32>, vector<8x8xf32> -> vector<8x8xf32>
    "tpu.trace_stop"() : () -> ()
    %cst_71 = arith.constant 0.353553385 : f32
    %204 = vector.broadcast %cst_71 : f32 to vector<8x8xf32>
    %205 = arith.mulf %203, %204 : vector<8x8xf32>
    %206 = vector.broadcast %132 : vector<1x8xf32> to vector<8x8xf32>
    %207 = arith.addf %205, %206 : vector<8x8xf32>
    %cst_72 = arith.constant dense<0xFF800000> : vector<8xf32>
    %208 = vector.multi_reduction <maximumf>, %207, %cst_72 [1] : vector<8x8xf32> to vector<8xf32>
    %209 = vector.shape_cast %208 : vector<8xf32> to vector<8x1xf32>
    %210 = vector.broadcast %209 : vector<8x1xf32> to vector<8x8xf32>
    %211 = arith.subf %207, %210 : vector<8x8xf32>
    %212 = math.exp %211 : vector<8x8xf32>
    %cst_73 = arith.constant dense<0.000000e+00> : vector<8xf32>
    %213 = vector.multi_reduction <add>, %212, %cst_73 [1] : vector<8x8xf32> to vector<8xf32>
    %214 = vector.shape_cast %213 : vector<8xf32> to vector<8x1xf32>
    %215 = tpu.reciprocal %214 {approx = true} : vector<8x1xf32> -> vector<8x1xf32>
    %216 = vector.broadcast %215 : vector<8x1xf32> to vector<8x8xf32>
    %217 = arith.mulf %212, %216 : vector<8x8xf32>
    %cst_74 = arith.constant dense<0.000000e+00> : vector<8x8xf32>
    %218 = tpu.matmul %217, %202, %cst_74 {dimension_numbers = #tpu.dot_dimension_numbers<[1], [0], [0], [1], [0, 0, 1, 1], [], []>} : vector<8x8xf32>, vector<8x8xf32>, vector<8x8xf32> -> vector<8x8xf32>
    %219 = vector.extract_strided_slice %39 {offsets = [24, 0], sizes = [8, 32], strides = [1, 1]} : vector<32x32xf32> to vector<8x32xf32>
    %cst_75 = arith.constant dense<0.000000e+00> : vector<8x32xf32>
    %220 = tpu.matmul %218, %219, %cst_75 {dimension_numbers = #tpu.dot_dimension_numbers<[1], [0], [0], [1], [0, 0, 1, 1], [], []>} : vector<8x8xf32>, vector<8x32xf32>, vector<8x32xf32> -> vector<8x32xf32>
    %221 = arith.addf %199, %220 : vector<8x32xf32>
    %222 = tpu.concatenate %130, %221 in 0 : vector<8x32xf32>, vector<8x32xf32> -> vector<16x32xf32>
    %c0_76 = arith.constant 0 : index
    %c0_77 = arith.constant 0 : index
    %c0_78 = arith.constant 0 : index
    %223 = vector.load %arg8[%c0_76, %c0_77, %c0_78] : memref<2x1x32xf32, #tpu.memory_space<vmem>>, vector<1x1x32xf32>
    %224 = vector.shape_cast %223 : vector<1x1x32xf32> to vector<1x32xf32>
    %225 = vector.broadcast %224 : vector<1x32xf32> to vector<16x32xf32>
    %226 = arith.addf %222, %225 : vector<16x32xf32>
    %227 = arith.addf %226, %27 : vector<16x32xf32>
    %c0_79 = arith.constant 0 : index
    %c0_80 = arith.constant 0 : index
    %c0_81 = arith.constant 0 : index
    %228 = vector.load %arg9[%c0_79, %c0_80, %c0_81] : memref<2x1x32xf32, #tpu.memory_space<vmem>>, vector<1x1x32xf32>
    %229 = vector.shape_cast %228 : vector<1x1x32xf32> to vector<1x32xf32>
    %c0_82 = arith.constant 0 : index
    %c0_83 = arith.constant 0 : index
    %c0_84 = arith.constant 0 : index
    %230 = vector.load %arg10[%c0_82, %c0_83, %c0_84] : memref<2x1x32xf32, #tpu.memory_space<vmem>>, vector<1x1x32xf32>
    %231 = vector.shape_cast %230 : vector<1x1x32xf32> to vector<1x32xf32>
    %cst_85 = arith.constant dense<0.000000e+00> : vector<16xf32>
    %232 = vector.multi_reduction <add>, %227, %cst_85 [1] : vector<16x32xf32> to vector<16xf32>
    %233 = vector.shape_cast %232 : vector<16xf32> to vector<16x1xf32>
    %cst_86 = arith.constant 3.200000e+01 : f32
    %234 = vector.broadcast %cst_86 : f32 to vector<16x1xf32>
    %235 = arith.divf %233, %234 : vector<16x1xf32>
    %236 = vector.broadcast %235 : vector<16x1xf32> to vector<16x32xf32>
    %237 = arith.subf %227, %236 : vector<16x32xf32>
    %238 = arith.mulf %237, %237 : vector<16x32xf32>
    %cst_87 = arith.constant dense<0.000000e+00> : vector<16xf32>
    %239 = vector.multi_reduction <add>, %238, %cst_87 [1] : vector<16x32xf32> to vector<16xf32>
    %240 = vector.shape_cast %239 : vector<16xf32> to vector<16x1xf32>
    %cst_88 = arith.constant 3.200000e+01 : f32
    %241 = vector.broadcast %cst_88 : f32 to vector<16x1xf32>
    %242 = arith.divf %240, %241 : vector<16x1xf32>
    %243 = vector.broadcast %235 : vector<16x1xf32> to vector<16x32xf32>
    %244 = arith.subf %227, %243 : vector<16x32xf32>
    %cst_89 = arith.constant 9.99999996E-13 : f32
    %245 = vector.broadcast %cst_89 : f32 to vector<16x1xf32>
    %246 = arith.addf %242, %245 : vector<16x1xf32>
    %247 = math.rsqrt %246 : vector<16x1xf32>
    %248 = vector.broadcast %247 : vector<16x1xf32> to vector<16x32xf32>
    %249 = arith.mulf %244, %248 : vector<16x32xf32>
    %250 = vector.broadcast %229 : vector<1x32xf32> to vector<16x32xf32>
    %251 = arith.mulf %249, %250 : vector<16x32xf32>
    %252 = vector.broadcast %231 : vector<1x32xf32> to vector<16x32xf32>
    %253 = arith.addf %251, %252 : vector<16x32xf32>
    %c0_90 = arith.constant 0 : index
    %c0_91 = arith.constant 0 : index
    %c0_92 = arith.constant 0 : index
    %254 = vector.load %arg11[%c0_90, %c0_91, %c0_92] : memref<2x32x64xf32, #tpu.memory_space<vmem>>, vector<1x32x64xf32>
    %255 = vector.shape_cast %254 : vector<1x32x64xf32> to vector<32x64xf32>
    %cst_93 = arith.constant dense<0.000000e+00> : vector<16x64xf32>
    %256 = tpu.matmul %253, %255, %cst_93 {dimension_numbers = #tpu.dot_dimension_numbers<[1], [0], [0], [1], [0, 0, 1, 1], [], []>} : vector<16x32xf32>, vector<32x64xf32>, vector<16x64xf32> -> vector<16x64xf32>
    %c0_94 = arith.constant 0 : index
    %c0_95 = arith.constant 0 : index
    %c0_96 = arith.constant 0 : index
    %257 = vector.load %arg12[%c0_94, %c0_95, %c0_96] : memref<2x1x64xf32, #tpu.memory_space<vmem>>, vector<1x1x64xf32>
    %258 = vector.shape_cast %257 : vector<1x1x64xf32> to vector<1x64xf32>
    %259 = vector.broadcast %258 : vector<1x64xf32> to vector<16x64xf32>
    %260 = arith.addf %256, %259 : vector<16x64xf32>
    %cst_97 = arith.constant 5.000000e-01 : f32
    %261 = vector.broadcast %cst_97 : f32 to vector<16x64xf32>
    %262 = arith.mulf %261, %260 : vector<16x64xf32>
    %cst_98 = arith.constant 4.471500e-02 : f32
    %263 = vector.broadcast %cst_98 : f32 to vector<16x64xf32>
    %264 = arith.mulf %263, %260 : vector<16x64xf32>
    %265 = arith.mulf %264, %260 : vector<16x64xf32>
    %266 = arith.mulf %265, %260 : vector<16x64xf32>
    %267 = arith.addf %260, %266 : vector<16x64xf32>
    %cst_99 = arith.constant 0.797884583 : f32
    %268 = vector.broadcast %cst_99 : f32 to vector<16x64xf32>
    %269 = arith.mulf %268, %267 : vector<16x64xf32>
    %270 = math.tanh %269 : vector<16x64xf32>
    %cst_100 = arith.constant 1.000000e+00 : f32
    %271 = vector.broadcast %cst_100 : f32 to vector<16x64xf32>
    %272 = arith.addf %271, %270 : vector<16x64xf32>
    %273 = arith.mulf %262, %272 : vector<16x64xf32>
    %c0_101 = arith.constant 0 : index
    %c0_102 = arith.constant 0 : index
    %c0_103 = arith.constant 0 : index
    %274 = vector.load %arg13[%c0_101, %c0_102, %c0_103] : memref<2x64x32xf32, #tpu.memory_space<vmem>>, vector<1x64x32xf32>
    %275 = vector.shape_cast %274 : vector<1x64x32xf32> to vector<64x32xf32>
    %cst_104 = arith.constant dense<0.000000e+00> : vector<16x32xf32>
    %276 = tpu.matmul %273, %275, %cst_104 {dimension_numbers = #tpu.dot_dimension_numbers<[1], [0], [0], [1], [0, 0, 1, 1], [], []>} : vector<16x64xf32>, vector<64x32xf32>, vector<16x32xf32> -> vector<16x32xf32>
    %c0_105 = arith.constant 0 : index
    %c0_106 = arith.constant 0 : index
    %c0_107 = arith.constant 0 : index
    %277 = vector.load %arg14[%c0_105, %c0_106, %c0_107] : memref<2x1x32xf32, #tpu.memory_space<vmem>>, vector<1x1x32xf32>
    %278 = vector.shape_cast %277 : vector<1x1x32xf32> to vector<1x32xf32>
    %279 = vector.broadcast %278 : vector<1x32xf32> to vector<16x32xf32>
    %280 = arith.addf %276, %279 : vector<16x32xf32>
    %281 = arith.addf %280, %253 : vector<16x32xf32>
    %c0_108 = arith.constant 0 : index
    %c0_109 = arith.constant 0 : index
    %c0_110 = arith.constant 0 : index
    %282 = vector.load %arg15[%c0_108, %c0_109, %c0_110] : memref<2x1x32xf32, #tpu.memory_space<vmem>>, vector<1x1x32xf32>
    %283 = vector.shape_cast %282 : vector<1x1x32xf32> to vector<1x32xf32>
    %c0_111 = arith.constant 0 : index
    %c0_112 = arith.constant 0 : index
    %c0_113 = arith.constant 0 : index
    %284 = vector.load %arg16[%c0_111, %c0_112, %c0_113] : memref<2x1x32xf32, #tpu.memory_space<vmem>>, vector<1x1x32xf32>
    %285 = vector.shape_cast %284 : vector<1x1x32xf32> to vector<1x32xf32>
    %cst_114 = arith.constant dense<0.000000e+00> : vector<16xf32>
    %286 = vector.multi_reduction <add>, %281, %cst_114 [1] : vector<16x32xf32> to vector<16xf32>
    %287 = vector.shape_cast %286 : vector<16xf32> to vector<16x1xf32>
    %cst_115 = arith.constant 3.200000e+01 : f32
    %288 = vector.broadcast %cst_115 : f32 to vector<16x1xf32>
    %289 = arith.divf %287, %288 : vector<16x1xf32>
    %290 = vector.broadcast %289 : vector<16x1xf32> to vector<16x32xf32>
    %291 = arith.subf %281, %290 : vector<16x32xf32>
    %292 = arith.mulf %291, %291 : vector<16x32xf32>
    %cst_116 = arith.constant dense<0.000000e+00> : vector<16xf32>
    %293 = vector.multi_reduction <add>, %292, %cst_116 [1] : vector<16x32xf32> to vector<16xf32>
    %294 = vector.shape_cast %293 : vector<16xf32> to vector<16x1xf32>
    %cst_117 = arith.constant 3.200000e+01 : f32
    %295 = vector.broadcast %cst_117 : f32 to vector<16x1xf32>
    %296 = arith.divf %294, %295 : vector<16x1xf32>
    %297 = vector.broadcast %289 : vector<16x1xf32> to vector<16x32xf32>
    %298 = arith.subf %281, %297 : vector<16x32xf32>
    %cst_118 = arith.constant 9.99999996E-13 : f32
    %299 = vector.broadcast %cst_118 : f32 to vector<16x1xf32>
    %300 = arith.addf %296, %299 : vector<16x1xf32>
    %301 = math.rsqrt %300 : vector<16x1xf32>
    %302 = vector.broadcast %301 : vector<16x1xf32> to vector<16x32xf32>
    %303 = arith.mulf %298, %302 : vector<16x32xf32>
    %304 = vector.broadcast %283 : vector<1x32xf32> to vector<16x32xf32>
    %305 = arith.mulf %303, %304 : vector<16x32xf32>
    %306 = vector.broadcast %285 : vector<1x32xf32> to vector<16x32xf32>
    %307 = arith.addf %305, %306 : vector<16x32xf32>
    %c1_119 = arith.constant 1 : index
    %c0_120 = arith.constant 0 : index
    %c0_121 = arith.constant 0 : index
    %308 = vector.load %arg5[%c1_119, %c0_120, %c0_121] : memref<2x32x96xf32, #tpu.memory_space<vmem>>, vector<1x32x96xf32>
    %309 = vector.shape_cast %308 : vector<1x32x96xf32> to vector<32x96xf32>
    %cst_122 = arith.constant dense<0.000000e+00> : vector<16x96xf32>
    %310 = tpu.matmul %307, %309, %cst_122 {dimension_numbers = #tpu.dot_dimension_numbers<[1], [0], [0], [1], [0, 0, 1, 1], [], []>} : vector<16x32xf32>, vector<32x96xf32>, vector<16x96xf32> -> vector<16x96xf32>
    %c1_123 = arith.constant 1 : index
    %c0_124 = arith.constant 0 : index
    %c0_125 = arith.constant 0 : index
    %311 = vector.load %arg6[%c1_123, %c0_124, %c0_125] : memref<2x1x96xf32, #tpu.memory_space<vmem>>, vector<1x1x96xf32>
    %312 = vector.shape_cast %311 : vector<1x1x96xf32> to vector<1x96xf32>
    %313 = vector.broadcast %312 : vector<1x96xf32> to vector<16x96xf32>
    %314 = arith.addf %310, %313 : vector<16x96xf32>
    %315 = vector.extract_strided_slice %314 {offsets = [0, 0], sizes = [16, 32], strides = [1, 1]} : vector<16x96xf32> to vector<16x32xf32>
    %316 = vector.extract_strided_slice %314 {offsets = [0, 32], sizes = [16, 32], strides = [1, 1]} : vector<16x96xf32> to vector<16x32xf32>
    %317 = vector.extract_strided_slice %314 {offsets = [0, 64], sizes = [16, 32], strides = [1, 1]} : vector<16x96xf32> to vector<16x32xf32>
    %c1_126 = arith.constant 1 : index
    %c0_127 = arith.constant 0 : index
    %c0_128 = arith.constant 0 : index
    %318 = vector.load %arg7[%c1_126, %c0_127, %c0_128] : memref<2x32x32xf32, #tpu.memory_space<vmem>>, vector<1x32x32xf32>
    %319 = vector.shape_cast %318 : vector<1x32x32xf32> to vector<32x32xf32>
    %c0_129 = arith.constant 0 : index
    %c0_130 = arith.constant 0 : index
    %c0_131 = arith.constant 0 : index
    %320 = vector.load %arg2[%c0_129, %c0_130, %c0_131] : memref<2x1x8xf32, #tpu.memory_space<vmem>>, vector<1x1x8xf32>
    %321 = vector.shape_cast %320 : vector<1x1x8xf32> to vector<1x8xf32>
    %cst_132 = arith.constant 0.000000e+00 : f32
    %322 = vector.broadcast %cst_132 : f32 to vector<8x32xf32>
    %323 = vector.extract_strided_slice %315 {offsets = [0, 0], sizes = [8, 8], strides = [1, 1]} : vector<16x32xf32> to vector<8x8xf32>
    %324 = vector.extract_strided_slice %316 {offsets = [0, 0], sizes = [8, 8], strides = [1, 1]} : vector<16x32xf32> to vector<8x8xf32>
    %325 = vector.extract_strided_slice %317 {offsets = [0, 0], sizes = [8, 8], strides = [1, 1]} : vector<16x32xf32> to vector<8x8xf32>
    "tpu.trace_start"() <{level = 10 : i32, message = "qd,kd->qk"}> : () -> ()
    %cst_133 = arith.constant dense<0.000000e+00> : vector<8x8xf32>
    %326 = tpu.matmul %323, %324, %cst_133 {dimension_numbers = #tpu.dot_dimension_numbers<[1], [1], [0], [0], [0, 0, 1, 0], [], []>} : vector<8x8xf32>, vector<8x8xf32>, vector<8x8xf32> -> vector<8x8xf32>
    "tpu.trace_stop"() : () -> ()
    %cst_134 = arith.constant 0.353553385 : f32
    %327 = vector.broadcast %cst_134 : f32 to vector<8x8xf32>
    %328 = arith.mulf %326, %327 : vector<8x8xf32>
    %329 = vector.broadcast %321 : vector<1x8xf32> to vector<8x8xf32>
    %330 = arith.addf %328, %329 : vector<8x8xf32>
    %cst_135 = arith.constant dense<0xFF800000> : vector<8xf32>
    %331 = vector.multi_reduction <maximumf>, %330, %cst_135 [1] : vector<8x8xf32> to vector<8xf32>
    %332 = vector.shape_cast %331 : vector<8xf32> to vector<8x1xf32>
    %333 = vector.broadcast %332 : vector<8x1xf32> to vector<8x8xf32>
    %334 = arith.subf %330, %333 : vector<8x8xf32>
    %335 = math.exp %334 : vector<8x8xf32>
    %cst_136 = arith.constant dense<0.000000e+00> : vector<8xf32>
    %336 = vector.multi_reduction <add>, %335, %cst_136 [1] : vector<8x8xf32> to vector<8xf32>
    %337 = vector.shape_cast %336 : vector<8xf32> to vector<8x1xf32>
    %338 = tpu.reciprocal %337 {approx = true} : vector<8x1xf32> -> vector<8x1xf32>
    %339 = vector.broadcast %338 : vector<8x1xf32> to vector<8x8xf32>
    %340 = arith.mulf %335, %339 : vector<8x8xf32>
    %cst_137 = arith.constant dense<0.000000e+00> : vector<8x8xf32>
    %341 = tpu.matmul %340, %325, %cst_137 {dimension_numbers = #tpu.dot_dimension_numbers<[1], [0], [0], [1], [0, 0, 1, 1], [], []>} : vector<8x8xf32>, vector<8x8xf32>, vector<8x8xf32> -> vector<8x8xf32>
    %342 = vector.extract_strided_slice %319 {offsets = [0, 0], sizes = [8, 32], strides = [1, 1]} : vector<32x32xf32> to vector<8x32xf32>
    %cst_138 = arith.constant dense<0.000000e+00> : vector<8x32xf32>
    %343 = tpu.matmul %341, %342, %cst_138 {dimension_numbers = #tpu.dot_dimension_numbers<[1], [0], [0], [1], [0, 0, 1, 1], [], []>} : vector<8x8xf32>, vector<8x32xf32>, vector<8x32xf32> -> vector<8x32xf32>
    %344 = arith.addf %322, %343 : vector<8x32xf32>
    %345 = vector.extract_strided_slice %315 {offsets = [0, 8], sizes = [8, 8], strides = [1, 1]} : vector<16x32xf32> to vector<8x8xf32>
    %346 = vector.extract_strided_slice %316 {offsets = [0, 8], sizes = [8, 8], strides = [1, 1]} : vector<16x32xf32> to vector<8x8xf32>
    %347 = vector.extract_strided_slice %317 {offsets = [0, 8], sizes = [8, 8], strides = [1, 1]} : vector<16x32xf32> to vector<8x8xf32>
    "tpu.trace_start"() <{level = 10 : i32, message = "qd,kd->qk"}> : () -> ()
    %cst_139 = arith.constant dense<0.000000e+00> : vector<8x8xf32>
    %348 = tpu.matmul %345, %346, %cst_139 {dimension_numbers = #tpu.dot_dimension_numbers<[1], [1], [0], [0], [0, 0, 1, 0], [], []>} : vector<8x8xf32>, vector<8x8xf32>, vector<8x8xf32> -> vector<8x8xf32>
    "tpu.trace_stop"() : () -> ()
    %cst_140 = arith.constant 0.353553385 : f32
    %349 = vector.broadcast %cst_140 : f32 to vector<8x8xf32>
    %350 = arith.mulf %348, %349 : vector<8x8xf32>
    %351 = vector.broadcast %321 : vector<1x8xf32> to vector<8x8xf32>
    %352 = arith.addf %350, %351 : vector<8x8xf32>
    %cst_141 = arith.constant dense<0xFF800000> : vector<8xf32>
    %353 = vector.multi_reduction <maximumf>, %352, %cst_141 [1] : vector<8x8xf32> to vector<8xf32>
    %354 = vector.shape_cast %353 : vector<8xf32> to vector<8x1xf32>
    %355 = vector.broadcast %354 : vector<8x1xf32> to vector<8x8xf32>
    %356 = arith.subf %352, %355 : vector<8x8xf32>
    %357 = math.exp %356 : vector<8x8xf32>
    %cst_142 = arith.constant dense<0.000000e+00> : vector<8xf32>
    %358 = vector.multi_reduction <add>, %357, %cst_142 [1] : vector<8x8xf32> to vector<8xf32>
    %359 = vector.shape_cast %358 : vector<8xf32> to vector<8x1xf32>
    %360 = tpu.reciprocal %359 {approx = true} : vector<8x1xf32> -> vector<8x1xf32>
    %361 = vector.broadcast %360 : vector<8x1xf32> to vector<8x8xf32>
    %362 = arith.mulf %357, %361 : vector<8x8xf32>
    %cst_143 = arith.constant dense<0.000000e+00> : vector<8x8xf32>
    %363 = tpu.matmul %362, %347, %cst_143 {dimension_numbers = #tpu.dot_dimension_numbers<[1], [0], [0], [1], [0, 0, 1, 1], [], []>} : vector<8x8xf32>, vector<8x8xf32>, vector<8x8xf32> -> vector<8x8xf32>
    %364 = vector.extract_strided_slice %319 {offsets = [8, 0], sizes = [8, 32], strides = [1, 1]} : vector<32x32xf32> to vector<8x32xf32>
    %cst_144 = arith.constant dense<0.000000e+00> : vector<8x32xf32>
    %365 = tpu.matmul %363, %364, %cst_144 {dimension_numbers = #tpu.dot_dimension_numbers<[1], [0], [0], [1], [0, 0, 1, 1], [], []>} : vector<8x8xf32>, vector<8x32xf32>, vector<8x32xf32> -> vector<8x32xf32>
    %366 = arith.addf %344, %365 : vector<8x32xf32>
    %367 = vector.extract_strided_slice %315 {offsets = [0, 16], sizes = [8, 8], strides = [1, 1]} : vector<16x32xf32> to vector<8x8xf32>
    %368 = vector.extract_strided_slice %316 {offsets = [0, 16], sizes = [8, 8], strides = [1, 1]} : vector<16x32xf32> to vector<8x8xf32>
    %369 = vector.extract_strided_slice %317 {offsets = [0, 16], sizes = [8, 8], strides = [1, 1]} : vector<16x32xf32> to vector<8x8xf32>
    "tpu.trace_start"() <{level = 10 : i32, message = "qd,kd->qk"}> : () -> ()
    %cst_145 = arith.constant dense<0.000000e+00> : vector<8x8xf32>
    %370 = tpu.matmul %367, %368, %cst_145 {dimension_numbers = #tpu.dot_dimension_numbers<[1], [1], [0], [0], [0, 0, 1, 0], [], []>} : vector<8x8xf32>, vector<8x8xf32>, vector<8x8xf32> -> vector<8x8xf32>
    "tpu.trace_stop"() : () -> ()
    %cst_146 = arith.constant 0.353553385 : f32
    %371 = vector.broadcast %cst_146 : f32 to vector<8x8xf32>
    %372 = arith.mulf %370, %371 : vector<8x8xf32>
    %373 = vector.broadcast %321 : vector<1x8xf32> to vector<8x8xf32>
    %374 = arith.addf %372, %373 : vector<8x8xf32>
    %cst_147 = arith.constant dense<0xFF800000> : vector<8xf32>
    %375 = vector.multi_reduction <maximumf>, %374, %cst_147 [1] : vector<8x8xf32> to vector<8xf32>
    %376 = vector.shape_cast %375 : vector<8xf32> to vector<8x1xf32>
    %377 = vector.broadcast %376 : vector<8x1xf32> to vector<8x8xf32>
    %378 = arith.subf %374, %377 : vector<8x8xf32>
    %379 = math.exp %378 : vector<8x8xf32>
    %cst_148 = arith.constant dense<0.000000e+00> : vector<8xf32>
    %380 = vector.multi_reduction <add>, %379, %cst_148 [1] : vector<8x8xf32> to vector<8xf32>
    %381 = vector.shape_cast %380 : vector<8xf32> to vector<8x1xf32>
    %382 = tpu.reciprocal %381 {approx = true} : vector<8x1xf32> -> vector<8x1xf32>
    %383 = vector.broadcast %382 : vector<8x1xf32> to vector<8x8xf32>
    %384 = arith.mulf %379, %383 : vector<8x8xf32>
    %cst_149 = arith.constant dense<0.000000e+00> : vector<8x8xf32>
    %385 = tpu.matmul %384, %369, %cst_149 {dimension_numbers = #tpu.dot_dimension_numbers<[1], [0], [0], [1], [0, 0, 1, 1], [], []>} : vector<8x8xf32>, vector<8x8xf32>, vector<8x8xf32> -> vector<8x8xf32>
    %386 = vector.extract_strided_slice %319 {offsets = [16, 0], sizes = [8, 32], strides = [1, 1]} : vector<32x32xf32> to vector<8x32xf32>
    %cst_150 = arith.constant dense<0.000000e+00> : vector<8x32xf32>
    %387 = tpu.matmul %385, %386, %cst_150 {dimension_numbers = #tpu.dot_dimension_numbers<[1], [0], [0], [1], [0, 0, 1, 1], [], []>} : vector<8x8xf32>, vector<8x32xf32>, vector<8x32xf32> -> vector<8x32xf32>
    %388 = arith.addf %366, %387 : vector<8x32xf32>
    %389 = vector.extract_strided_slice %315 {offsets = [0, 24], sizes = [8, 8], strides = [1, 1]} : vector<16x32xf32> to vector<8x8xf32>
    %390 = vector.extract_strided_slice %316 {offsets = [0, 24], sizes = [8, 8], strides = [1, 1]} : vector<16x32xf32> to vector<8x8xf32>
    %391 = vector.extract_strided_slice %317 {offsets = [0, 24], sizes = [8, 8], strides = [1, 1]} : vector<16x32xf32> to vector<8x8xf32>
    "tpu.trace_start"() <{level = 10 : i32, message = "qd,kd->qk"}> : () -> ()
    %cst_151 = arith.constant dense<0.000000e+00> : vector<8x8xf32>
    %392 = tpu.matmul %389, %390, %cst_151 {dimension_numbers = #tpu.dot_dimension_numbers<[1], [1], [0], [0], [0, 0, 1, 0], [], []>} : vector<8x8xf32>, vector<8x8xf32>, vector<8x8xf32> -> vector<8x8xf32>
    "tpu.trace_stop"() : () -> ()
    %cst_152 = arith.constant 0.353553385 : f32
    %393 = vector.broadcast %cst_152 : f32 to vector<8x8xf32>
    %394 = arith.mulf %392, %393 : vector<8x8xf32>
    %395 = vector.broadcast %321 : vector<1x8xf32> to vector<8x8xf32>
    %396 = arith.addf %394, %395 : vector<8x8xf32>
    %cst_153 = arith.constant dense<0xFF800000> : vector<8xf32>
    %397 = vector.multi_reduction <maximumf>, %396, %cst_153 [1] : vector<8x8xf32> to vector<8xf32>
    %398 = vector.shape_cast %397 : vector<8xf32> to vector<8x1xf32>
    %399 = vector.broadcast %398 : vector<8x1xf32> to vector<8x8xf32>
    %400 = arith.subf %396, %399 : vector<8x8xf32>
    %401 = math.exp %400 : vector<8x8xf32>
    %cst_154 = arith.constant dense<0.000000e+00> : vector<8xf32>
    %402 = vector.multi_reduction <add>, %401, %cst_154 [1] : vector<8x8xf32> to vector<8xf32>
    %403 = vector.shape_cast %402 : vector<8xf32> to vector<8x1xf32>
    %404 = tpu.reciprocal %403 {approx = true} : vector<8x1xf32> -> vector<8x1xf32>
    %405 = vector.broadcast %404 : vector<8x1xf32> to vector<8x8xf32>
    %406 = arith.mulf %401, %405 : vector<8x8xf32>
    %cst_155 = arith.constant dense<0.000000e+00> : vector<8x8xf32>
    %407 = tpu.matmul %406, %391, %cst_155 {dimension_numbers = #tpu.dot_dimension_numbers<[1], [0], [0], [1], [0, 0, 1, 1], [], []>} : vector<8x8xf32>, vector<8x8xf32>, vector<8x8xf32> -> vector<8x8xf32>
    %408 = vector.extract_strided_slice %319 {offsets = [24, 0], sizes = [8, 32], strides = [1, 1]} : vector<32x32xf32> to vector<8x32xf32>
    %cst_156 = arith.constant dense<0.000000e+00> : vector<8x32xf32>
    %409 = tpu.matmul %407, %408, %cst_156 {dimension_numbers = #tpu.dot_dimension_numbers<[1], [0], [0], [1], [0, 0, 1, 1], [], []>} : vector<8x8xf32>, vector<8x32xf32>, vector<8x32xf32> -> vector<8x32xf32>
    %410 = arith.addf %388, %409 : vector<8x32xf32>
    %c1_157 = arith.constant 1 : index
    %c0_158 = arith.constant 0 : index
    %c0_159 = arith.constant 0 : index
    %411 = vector.load %arg2[%c1_157, %c0_158, %c0_159] : memref<2x1x8xf32, #tpu.memory_space<vmem>>, vector<1x1x8xf32>
    %412 = vector.shape_cast %411 : vector<1x1x8xf32> to vector<1x8xf32>
    %cst_160 = arith.constant 0.000000e+00 : f32
    %413 = vector.broadcast %cst_160 : f32 to vector<8x32xf32>
    %414 = vector.extract_strided_slice %315 {offsets = [8, 0], sizes = [8, 8], strides = [1, 1]} : vector<16x32xf32> to vector<8x8xf32>
    %415 = vector.extract_strided_slice %316 {offsets = [8, 0], sizes = [8, 8], strides = [1, 1]} : vector<16x32xf32> to vector<8x8xf32>
    %416 = vector.extract_strided_slice %317 {offsets = [8, 0], sizes = [8, 8], strides = [1, 1]} : vector<16x32xf32> to vector<8x8xf32>
    "tpu.trace_start"() <{level = 10 : i32, message = "qd,kd->qk"}> : () -> ()
    %cst_161 = arith.constant dense<0.000000e+00> : vector<8x8xf32>
    %417 = tpu.matmul %414, %415, %cst_161 {dimension_numbers = #tpu.dot_dimension_numbers<[1], [1], [0], [0], [0, 0, 1, 0], [], []>} : vector<8x8xf32>, vector<8x8xf32>, vector<8x8xf32> -> vector<8x8xf32>
    "tpu.trace_stop"() : () -> ()
    %cst_162 = arith.constant 0.353553385 : f32
    %418 = vector.broadcast %cst_162 : f32 to vector<8x8xf32>
    %419 = arith.mulf %417, %418 : vector<8x8xf32>
    %420 = vector.broadcast %412 : vector<1x8xf32> to vector<8x8xf32>
    %421 = arith.addf %419, %420 : vector<8x8xf32>
    %cst_163 = arith.constant dense<0xFF800000> : vector<8xf32>
    %422 = vector.multi_reduction <maximumf>, %421, %cst_163 [1] : vector<8x8xf32> to vector<8xf32>
    %423 = vector.shape_cast %422 : vector<8xf32> to vector<8x1xf32>
    %424 = vector.broadcast %423 : vector<8x1xf32> to vector<8x8xf32>
    %425 = arith.subf %421, %424 : vector<8x8xf32>
    %426 = math.exp %425 : vector<8x8xf32>
    %cst_164 = arith.constant dense<0.000000e+00> : vector<8xf32>
    %427 = vector.multi_reduction <add>, %426, %cst_164 [1] : vector<8x8xf32> to vector<8xf32>
    %428 = vector.shape_cast %427 : vector<8xf32> to vector<8x1xf32>
    %429 = tpu.reciprocal %428 {approx = true} : vector<8x1xf32> -> vector<8x1xf32>
    %430 = vector.broadcast %429 : vector<8x1xf32> to vector<8x8xf32>
    %431 = arith.mulf %426, %430 : vector<8x8xf32>
    %cst_165 = arith.constant dense<0.000000e+00> : vector<8x8xf32>
    %432 = tpu.matmul %431, %416, %cst_165 {dimension_numbers = #tpu.dot_dimension_numbers<[1], [0], [0], [1], [0, 0, 1, 1], [], []>} : vector<8x8xf32>, vector<8x8xf32>, vector<8x8xf32> -> vector<8x8xf32>
    %433 = vector.extract_strided_slice %319 {offsets = [0, 0], sizes = [8, 32], strides = [1, 1]} : vector<32x32xf32> to vector<8x32xf32>
    %cst_166 = arith.constant dense<0.000000e+00> : vector<8x32xf32>
    %434 = tpu.matmul %432, %433, %cst_166 {dimension_numbers = #tpu.dot_dimension_numbers<[1], [0], [0], [1], [0, 0, 1, 1], [], []>} : vector<8x8xf32>, vector<8x32xf32>, vector<8x32xf32> -> vector<8x32xf32>
    %435 = arith.addf %413, %434 : vector<8x32xf32>
    %436 = vector.extract_strided_slice %315 {offsets = [8, 8], sizes = [8, 8], strides = [1, 1]} : vector<16x32xf32> to vector<8x8xf32>
    %437 = vector.extract_strided_slice %316 {offsets = [8, 8], sizes = [8, 8], strides = [1, 1]} : vector<16x32xf32> to vector<8x8xf32>
    %438 = vector.extract_strided_slice %317 {offsets = [8, 8], sizes = [8, 8], strides = [1, 1]} : vector<16x32xf32> to vector<8x8xf32>
    "tpu.trace_start"() <{level = 10 : i32, message = "qd,kd->qk"}> : () -> ()
    %cst_167 = arith.constant dense<0.000000e+00> : vector<8x8xf32>
    %439 = tpu.matmul %436, %437, %cst_167 {dimension_numbers = #tpu.dot_dimension_numbers<[1], [1], [0], [0], [0, 0, 1, 0], [], []>} : vector<8x8xf32>, vector<8x8xf32>, vector<8x8xf32> -> vector<8x8xf32>
    "tpu.trace_stop"() : () -> ()
    %cst_168 = arith.constant 0.353553385 : f32
    %440 = vector.broadcast %cst_168 : f32 to vector<8x8xf32>
    %441 = arith.mulf %439, %440 : vector<8x8xf32>
    %442 = vector.broadcast %412 : vector<1x8xf32> to vector<8x8xf32>
    %443 = arith.addf %441, %442 : vector<8x8xf32>
    %cst_169 = arith.constant dense<0xFF800000> : vector<8xf32>
    %444 = vector.multi_reduction <maximumf>, %443, %cst_169 [1] : vector<8x8xf32> to vector<8xf32>
    %445 = vector.shape_cast %444 : vector<8xf32> to vector<8x1xf32>
    %446 = vector.broadcast %445 : vector<8x1xf32> to vector<8x8xf32>
    %447 = arith.subf %443, %446 : vector<8x8xf32>
    %448 = math.exp %447 : vector<8x8xf32>
    %cst_170 = arith.constant dense<0.000000e+00> : vector<8xf32>
    %449 = vector.multi_reduction <add>, %448, %cst_170 [1] : vector<8x8xf32> to vector<8xf32>
    %450 = vector.shape_cast %449 : vector<8xf32> to vector<8x1xf32>
    %451 = tpu.reciprocal %450 {approx = true} : vector<8x1xf32> -> vector<8x1xf32>
    %452 = vector.broadcast %451 : vector<8x1xf32> to vector<8x8xf32>
    %453 = arith.mulf %448, %452 : vector<8x8xf32>
    %cst_171 = arith.constant dense<0.000000e+00> : vector<8x8xf32>
    %454 = tpu.matmul %453, %438, %cst_171 {dimension_numbers = #tpu.dot_dimension_numbers<[1], [0], [0], [1], [0, 0, 1, 1], [], []>} : vector<8x8xf32>, vector<8x8xf32>, vector<8x8xf32> -> vector<8x8xf32>
    %455 = vector.extract_strided_slice %319 {offsets = [8, 0], sizes = [8, 32], strides = [1, 1]} : vector<32x32xf32> to vector<8x32xf32>
    %cst_172 = arith.constant dense<0.000000e+00> : vector<8x32xf32>
    %456 = tpu.matmul %454, %455, %cst_172 {dimension_numbers = #tpu.dot_dimension_numbers<[1], [0], [0], [1], [0, 0, 1, 1], [], []>} : vector<8x8xf32>, vector<8x32xf32>, vector<8x32xf32> -> vector<8x32xf32>
    %457 = arith.addf %435, %456 : vector<8x32xf32>
    %458 = vector.extract_strided_slice %315 {offsets = [8, 16], sizes = [8, 8], strides = [1, 1]} : vector<16x32xf32> to vector<8x8xf32>
    %459 = vector.extract_strided_slice %316 {offsets = [8, 16], sizes = [8, 8], strides = [1, 1]} : vector<16x32xf32> to vector<8x8xf32>
    %460 = vector.extract_strided_slice %317 {offsets = [8, 16], sizes = [8, 8], strides = [1, 1]} : vector<16x32xf32> to vector<8x8xf32>
    "tpu.trace_start"() <{level = 10 : i32, message = "qd,kd->qk"}> : () -> ()
    %cst_173 = arith.constant dense<0.000000e+00> : vector<8x8xf32>
    %461 = tpu.matmul %458, %459, %cst_173 {dimension_numbers = #tpu.dot_dimension_numbers<[1], [1], [0], [0], [0, 0, 1, 0], [], []>} : vector<8x8xf32>, vector<8x8xf32>, vector<8x8xf32> -> vector<8x8xf32>
    "tpu.trace_stop"() : () -> ()
    %cst_174 = arith.constant 0.353553385 : f32
    %462 = vector.broadcast %cst_174 : f32 to vector<8x8xf32>
    %463 = arith.mulf %461, %462 : vector<8x8xf32>
    %464 = vector.broadcast %412 : vector<1x8xf32> to vector<8x8xf32>
    %465 = arith.addf %463, %464 : vector<8x8xf32>
    %cst_175 = arith.constant dense<0xFF800000> : vector<8xf32>
    %466 = vector.multi_reduction <maximumf>, %465, %cst_175 [1] : vector<8x8xf32> to vector<8xf32>
    %467 = vector.shape_cast %466 : vector<8xf32> to vector<8x1xf32>
    %468 = vector.broadcast %467 : vector<8x1xf32> to vector<8x8xf32>
    %469 = arith.subf %465, %468 : vector<8x8xf32>
    %470 = math.exp %469 : vector<8x8xf32>
    %cst_176 = arith.constant dense<0.000000e+00> : vector<8xf32>
    %471 = vector.multi_reduction <add>, %470, %cst_176 [1] : vector<8x8xf32> to vector<8xf32>
    %472 = vector.shape_cast %471 : vector<8xf32> to vector<8x1xf32>
    %473 = tpu.reciprocal %472 {approx = true} : vector<8x1xf32> -> vector<8x1xf32>
    %474 = vector.broadcast %473 : vector<8x1xf32> to vector<8x8xf32>
    %475 = arith.mulf %470, %474 : vector<8x8xf32>
    %cst_177 = arith.constant dense<0.000000e+00> : vector<8x8xf32>
    %476 = tpu.matmul %475, %460, %cst_177 {dimension_numbers = #tpu.dot_dimension_numbers<[1], [0], [0], [1], [0, 0, 1, 1], [], []>} : vector<8x8xf32>, vector<8x8xf32>, vector<8x8xf32> -> vector<8x8xf32>
    %477 = vector.extract_strided_slice %319 {offsets = [16, 0], sizes = [8, 32], strides = [1, 1]} : vector<32x32xf32> to vector<8x32xf32>
    %cst_178 = arith.constant dense<0.000000e+00> : vector<8x32xf32>
    %478 = tpu.matmul %476, %477, %cst_178 {dimension_numbers = #tpu.dot_dimension_numbers<[1], [0], [0], [1], [0, 0, 1, 1], [], []>} : vector<8x8xf32>, vector<8x32xf32>, vector<8x32xf32> -> vector<8x32xf32>
    %479 = arith.addf %457, %478 : vector<8x32xf32>
    %480 = vector.extract_strided_slice %315 {offsets = [8, 24], sizes = [8, 8], strides = [1, 1]} : vector<16x32xf32> to vector<8x8xf32>
    %481 = vector.extract_strided_slice %316 {offsets = [8, 24], sizes = [8, 8], strides = [1, 1]} : vector<16x32xf32> to vector<8x8xf32>
    %482 = vector.extract_strided_slice %317 {offsets = [8, 24], sizes = [8, 8], strides = [1, 1]} : vector<16x32xf32> to vector<8x8xf32>
    "tpu.trace_start"() <{level = 10 : i32, message = "qd,kd->qk"}> : () -> ()
    %cst_179 = arith.constant dense<0.000000e+00> : vector<8x8xf32>
    %483 = tpu.matmul %480, %481, %cst_179 {dimension_numbers = #tpu.dot_dimension_numbers<[1], [1], [0], [0], [0, 0, 1, 0], [], []>} : vector<8x8xf32>, vector<8x8xf32>, vector<8x8xf32> -> vector<8x8xf32>
    "tpu.trace_stop"() : () -> ()
    %cst_180 = arith.constant 0.353553385 : f32
    %484 = vector.broadcast %cst_180 : f32 to vector<8x8xf32>
    %485 = arith.mulf %483, %484 : vector<8x8xf32>
    %486 = vector.broadcast %412 : vector<1x8xf32> to vector<8x8xf32>
    %487 = arith.addf %485, %486 : vector<8x8xf32>
    %cst_181 = arith.constant dense<0xFF800000> : vector<8xf32>
    %488 = vector.multi_reduction <maximumf>, %487, %cst_181 [1] : vector<8x8xf32> to vector<8xf32>
    %489 = vector.shape_cast %488 : vector<8xf32> to vector<8x1xf32>
    %490 = vector.broadcast %489 : vector<8x1xf32> to vector<8x8xf32>
    %491 = arith.subf %487, %490 : vector<8x8xf32>
    %492 = math.exp %491 : vector<8x8xf32>
    %cst_182 = arith.constant dense<0.000000e+00> : vector<8xf32>
    %493 = vector.multi_reduction <add>, %492, %cst_182 [1] : vector<8x8xf32> to vector<8xf32>
    %494 = vector.shape_cast %493 : vector<8xf32> to vector<8x1xf32>
    %495 = tpu.reciprocal %494 {approx = true} : vector<8x1xf32> -> vector<8x1xf32>
    %496 = vector.broadcast %495 : vector<8x1xf32> to vector<8x8xf32>
    %497 = arith.mulf %492, %496 : vector<8x8xf32>
    %cst_183 = arith.constant dense<0.000000e+00> : vector<8x8xf32>
    %498 = tpu.matmul %497, %482, %cst_183 {dimension_numbers = #tpu.dot_dimension_numbers<[1], [0], [0], [1], [0, 0, 1, 1], [], []>} : vector<8x8xf32>, vector<8x8xf32>, vector<8x8xf32> -> vector<8x8xf32>
    %499 = vector.extract_strided_slice %319 {offsets = [24, 0], sizes = [8, 32], strides = [1, 1]} : vector<32x32xf32> to vector<8x32xf32>
    %cst_184 = arith.constant dense<0.000000e+00> : vector<8x32xf32>
    %500 = tpu.matmul %498, %499, %cst_184 {dimension_numbers = #tpu.dot_dimension_numbers<[1], [0], [0], [1], [0, 0, 1, 1], [], []>} : vector<8x8xf32>, vector<8x32xf32>, vector<8x32xf32> -> vector<8x32xf32>
    %501 = arith.addf %479, %500 : vector<8x32xf32>
    %502 = tpu.concatenate %410, %501 in 0 : vector<8x32xf32>, vector<8x32xf32> -> vector<16x32xf32>
    %c1_185 = arith.constant 1 : index
    %c0_186 = arith.constant 0 : index
    %c0_187 = arith.constant 0 : index
    %503 = vector.load %arg8[%c1_185, %c0_186, %c0_187] : memref<2x1x32xf32, #tpu.memory_space<vmem>>, vector<1x1x32xf32>
    %504 = vector.shape_cast %503 : vector<1x1x32xf32> to vector<1x32xf32>
    %505 = vector.broadcast %504 : vector<1x32xf32> to vector<16x32xf32>
    %506 = arith.addf %502, %505 : vector<16x32xf32>
    %507 = arith.addf %506, %307 : vector<16x32xf32>
    %c1_188 = arith.constant 1 : index
    %c0_189 = arith.constant 0 : index
    %c0_190 = arith.constant 0 : index
    %508 = vector.load %arg9[%c1_188, %c0_189, %c0_190] : memref<2x1x32xf32, #tpu.memory_space<vmem>>, vector<1x1x32xf32>
    %509 = vector.shape_cast %508 : vector<1x1x32xf32> to vector<1x32xf32>
    %c1_191 = arith.constant 1 : index
    %c0_192 = arith.constant 0 : index
    %c0_193 = arith.constant 0 : index
    %510 = vector.load %arg10[%c1_191, %c0_192, %c0_193] : memref<2x1x32xf32, #tpu.memory_space<vmem>>, vector<1x1x32xf32>
    %511 = vector.shape_cast %510 : vector<1x1x32xf32> to vector<1x32xf32>
    %cst_194 = arith.constant dense<0.000000e+00> : vector<16xf32>
    %512 = vector.multi_reduction <add>, %507, %cst_194 [1] : vector<16x32xf32> to vector<16xf32>
    %513 = vector.shape_cast %512 : vector<16xf32> to vector<16x1xf32>
    %cst_195 = arith.constant 3.200000e+01 : f32
    %514 = vector.broadcast %cst_195 : f32 to vector<16x1xf32>
    %515 = arith.divf %513, %514 : vector<16x1xf32>
    %516 = vector.broadcast %515 : vector<16x1xf32> to vector<16x32xf32>
    %517 = arith.subf %507, %516 : vector<16x32xf32>
    %518 = arith.mulf %517, %517 : vector<16x32xf32>
    %cst_196 = arith.constant dense<0.000000e+00> : vector<16xf32>
    %519 = vector.multi_reduction <add>, %518, %cst_196 [1] : vector<16x32xf32> to vector<16xf32>
    %520 = vector.shape_cast %519 : vector<16xf32> to vector<16x1xf32>
    %cst_197 = arith.constant 3.200000e+01 : f32
    %521 = vector.broadcast %cst_197 : f32 to vector<16x1xf32>
    %522 = arith.divf %520, %521 : vector<16x1xf32>
    %523 = vector.broadcast %515 : vector<16x1xf32> to vector<16x32xf32>
    %524 = arith.subf %507, %523 : vector<16x32xf32>
    %cst_198 = arith.constant 9.99999996E-13 : f32
    %525 = vector.broadcast %cst_198 : f32 to vector<16x1xf32>
    %526 = arith.addf %522, %525 : vector<16x1xf32>
    %527 = math.rsqrt %526 : vector<16x1xf32>
    %528 = vector.broadcast %527 : vector<16x1xf32> to vector<16x32xf32>
    %529 = arith.mulf %524, %528 : vector<16x32xf32>
    %530 = vector.broadcast %509 : vector<1x32xf32> to vector<16x32xf32>
    %531 = arith.mulf %529, %530 : vector<16x32xf32>
    %532 = vector.broadcast %511 : vector<1x32xf32> to vector<16x32xf32>
    %533 = arith.addf %531, %532 : vector<16x32xf32>
    %c1_199 = arith.constant 1 : index
    %c0_200 = arith.constant 0 : index
    %c0_201 = arith.constant 0 : index
    %534 = vector.load %arg11[%c1_199, %c0_200, %c0_201] : memref<2x32x64xf32, #tpu.memory_space<vmem>>, vector<1x32x64xf32>
    %535 = vector.shape_cast %534 : vector<1x32x64xf32> to vector<32x64xf32>
    %cst_202 = arith.constant dense<0.000000e+00> : vector<16x64xf32>
    %536 = tpu.matmul %533, %535, %cst_202 {dimension_numbers = #tpu.dot_dimension_numbers<[1], [0], [0], [1], [0, 0, 1, 1], [], []>} : vector<16x32xf32>, vector<32x64xf32>, vector<16x64xf32> -> vector<16x64xf32>
    %c1_203 = arith.constant 1 : index
    %c0_204 = arith.constant 0 : index
    %c0_205 = arith.constant 0 : index
    %537 = vector.load %arg12[%c1_203, %c0_204, %c0_205] : memref<2x1x64xf32, #tpu.memory_space<vmem>>, vector<1x1x64xf32>
    %538 = vector.shape_cast %537 : vector<1x1x64xf32> to vector<1x64xf32>
    %539 = vector.broadcast %538 : vector<1x64xf32> to vector<16x64xf32>
    %540 = arith.addf %536, %539 : vector<16x64xf32>
    %cst_206 = arith.constant 5.000000e-01 : f32
    %541 = vector.broadcast %cst_206 : f32 to vector<16x64xf32>
    %542 = arith.mulf %541, %540 : vector<16x64xf32>
    %cst_207 = arith.constant 4.471500e-02 : f32
    %543 = vector.broadcast %cst_207 : f32 to vector<16x64xf32>
    %544 = arith.mulf %543, %540 : vector<16x64xf32>
    %545 = arith.mulf %544, %540 : vector<16x64xf32>
    %546 = arith.mulf %545, %540 : vector<16x64xf32>
    %547 = arith.addf %540, %546 : vector<16x64xf32>
    %cst_208 = arith.constant 0.797884583 : f32
    %548 = vector.broadcast %cst_208 : f32 to vector<16x64xf32>
    %549 = arith.mulf %548, %547 : vector<16x64xf32>
    %550 = math.tanh %549 : vector<16x64xf32>
    %cst_209 = arith.constant 1.000000e+00 : f32
    %551 = vector.broadcast %cst_209 : f32 to vector<16x64xf32>
    %552 = arith.addf %551, %550 : vector<16x64xf32>
    %553 = arith.mulf %542, %552 : vector<16x64xf32>
    %c1_210 = arith.constant 1 : index
    %c0_211 = arith.constant 0 : index
    %c0_212 = arith.constant 0 : index
    %554 = vector.load %arg13[%c1_210, %c0_211, %c0_212] : memref<2x64x32xf32, #tpu.memory_space<vmem>>, vector<1x64x32xf32>
    %555 = vector.shape_cast %554 : vector<1x64x32xf32> to vector<64x32xf32>
    %cst_213 = arith.constant dense<0.000000e+00> : vector<16x32xf32>
    %556 = tpu.matmul %553, %555, %cst_213 {dimension_numbers = #tpu.dot_dimension_numbers<[1], [0], [0], [1], [0, 0, 1, 1], [], []>} : vector<16x64xf32>, vector<64x32xf32>, vector<16x32xf32> -> vector<16x32xf32>
    %c1_214 = arith.constant 1 : index
    %c0_215 = arith.constant 0 : index
    %c0_216 = arith.constant 0 : index
    %557 = vector.load %arg14[%c1_214, %c0_215, %c0_216] : memref<2x1x32xf32, #tpu.memory_space<vmem>>, vector<1x1x32xf32>
    %558 = vector.shape_cast %557 : vector<1x1x32xf32> to vector<1x32xf32>
    %559 = vector.broadcast %558 : vector<1x32xf32> to vector<16x32xf32>
    %560 = arith.addf %556, %559 : vector<16x32xf32>
    %561 = arith.addf %560, %533 : vector<16x32xf32>
    %c1_217 = arith.constant 1 : index
    %c0_218 = arith.constant 0 : index
    %c0_219 = arith.constant 0 : index
    %562 = vector.load %arg15[%c1_217, %c0_218, %c0_219] : memref<2x1x32xf32, #tpu.memory_space<vmem>>, vector<1x1x32xf32>
    %563 = vector.shape_cast %562 : vector<1x1x32xf32> to vector<1x32xf32>
    %c1_220 = arith.constant 1 : index
    %c0_221 = arith.constant 0 : index
    %c0_222 = arith.constant 0 : index
    %564 = vector.load %arg16[%c1_220, %c0_221, %c0_222] : memref<2x1x32xf32, #tpu.memory_space<vmem>>, vector<1x1x32xf32>
    %565 = vector.shape_cast %564 : vector<1x1x32xf32> to vector<1x32xf32>
    %cst_223 = arith.constant dense<0.000000e+00> : vector<16xf32>
    %566 = vector.multi_reduction <add>, %561, %cst_223 [1] : vector<16x32xf32> to vector<16xf32>
    %567 = vector.shape_cast %566 : vector<16xf32> to vector<16x1xf32>
    %cst_224 = arith.constant 3.200000e+01 : f32
    %568 = vector.broadcast %cst_224 : f32 to vector<16x1xf32>
    %569 = arith.divf %567, %568 : vector<16x1xf32>
    %570 = vector.broadcast %569 : vector<16x1xf32> to vector<16x32xf32>
    %571 = arith.subf %561, %570 : vector<16x32xf32>
    %572 = arith.mulf %571, %571 : vector<16x32xf32>
    %cst_225 = arith.constant dense<0.000000e+00> : vector<16xf32>
    %573 = vector.multi_reduction <add>, %572, %cst_225 [1] : vector<16x32xf32> to vector<16xf32>
    %574 = vector.shape_cast %573 : vector<16xf32> to vector<16x1xf32>
    %cst_226 = arith.constant 3.200000e+01 : f32
    %575 = vector.broadcast %cst_226 : f32 to vector<16x1xf32>
    %576 = arith.divf %574, %575 : vector<16x1xf32>
    %577 = vector.broadcast %569 : vector<16x1xf32> to vector<16x32xf32>
    %578 = arith.subf %561, %577 : vector<16x32xf32>
    %cst_227 = arith.constant 9.99999996E-13 : f32
    %579 = vector.broadcast %cst_227 : f32 to vector<16x1xf32>
    %580 = arith.addf %576, %579 : vector<16x1xf32>
    %581 = math.rsqrt %580 : vector<16x1xf32>
    %582 = vector.broadcast %581 : vector<16x1xf32> to vector<16x32xf32>
    %583 = arith.mulf %578, %582 : vector<16x32xf32>
    %584 = vector.broadcast %563 : vector<1x32xf32> to vector<16x32xf32>
    %585 = arith.mulf %583, %584 : vector<16x32xf32>
    %586 = vector.broadcast %565 : vector<1x32xf32> to vector<16x32xf32>
    %587 = arith.addf %585, %586 : vector<16x32xf32>
    %c0_228 = arith.constant 0 : index
    %c0_229 = arith.constant 0 : index
    %588 = vector.load %arg23[%c0_228, %c0_229] : memref<16x32xf32, #tpu.memory_space<vmem>>, vector<16x32xf32>
    tpu.vector_store %arg23[%c0_228, %c0_229], %587 {strides = array<i32>} : memref<16x32xf32, #tpu.memory_space<vmem>>, vector<16x32xf32>,
    %589 = vector.extract_strided_slice %587 {offsets = [0, 0], sizes = [1, 32], strides = [1, 1]} : vector<16x32xf32> to vector<1x32xf32>
    %590 = vector.extract_strided_slice %587 {offsets = [8, 0], sizes = [1, 32], strides = [1, 1]} : vector<16x32xf32> to vector<1x32xf32>
    %591 = tpu.concatenate %589, %590 in 0 : vector<1x32xf32>, vector<1x32xf32> -> vector<2x32xf32>
    %c0_230 = arith.constant 0 : index
    %c0_231 = arith.constant 0 : index
    %592 = vector.load %arg17[%c0_230, %c0_231] : memref<32x32xf32, #tpu.memory_space<vmem>>, vector<32x32xf32>
    %cst_232 = arith.constant dense<0.000000e+00> : vector<2x32xf32>
    %593 = tpu.matmul %591, %592, %cst_232 {dimension_numbers = #tpu.dot_dimension_numbers<[1], [0], [0], [1], [0, 0, 1, 1], [], []>} : vector<2x32xf32>, vector<32x32xf32>, vector<2x32xf32> -> vector<2x32xf32>
    %c0_233 = arith.constant 0 : index
    %c0_234 = arith.constant 0 : index
    %594 = vector.load %arg18[%c0_233, %c0_234] : memref<1x32xf32, #tpu.memory_space<vmem>>, vector<1x32xf32>
    %595 = vector.broadcast %594 : vector<1x32xf32> to vector<2x32xf32>
    %596 = arith.addf %593, %595 : vector<2x32xf32>
    %597 = math.tanh %596 : vector<2x32xf32>
    %c0_235 = arith.constant 0 : index
    %c0_236 = arith.constant 0 : index
    %598 = vector.load %arg19[%c0_235, %c0_236] : memref<32x16xf32, #tpu.memory_space<vmem>>, vector<32x16xf32>
    %cst_237 = arith.constant dense<0.000000e+00> : vector<2x16xf32>
    %599 = tpu.matmul %597, %598, %cst_237 {dimension_numbers = #tpu.dot_dimension_numbers<[1], [0], [0], [1], [0, 0, 1, 1], [], []>} : vector<2x32xf32>, vector<32x16xf32>, vector<2x16xf32> -> vector<2x16xf32>
    %c0_238 = arith.constant 0 : index
    %c0_239 = arith.constant 0 : index
    %600 = vector.load %arg20[%c0_238, %c0_239] : memref<1x16xf32, #tpu.memory_space<vmem>>, vector<1x16xf32>
    %601 = vector.broadcast %600 : vector<1x16xf32> to vector<2x16xf32>
    %602 = arith.addf %599, %601 : vector<2x16xf32>
    %603 = math.tanh %602 : vector<2x16xf32>
    %c0_240 = arith.constant 0 : index
    %c0_241 = arith.constant 0 : index
    %604 = vector.load %arg21[%c0_240, %c0_241] : memref<16x3xf32, #tpu.memory_space<vmem>>, vector<16x3xf32>
    %cst_242 = arith.constant dense<0.000000e+00> : vector<2x3xf32>
    %605 = tpu.matmul %603, %604, %cst_242 {dimension_numbers = #tpu.dot_dimension_numbers<[1], [0], [0], [1], [0, 0, 1, 1], [], []>} : vector<2x16xf32>, vector<16x3xf32>, vector<2x3xf32> -> vector<2x3xf32>
    %c0_243 = arith.constant 0 : index
    %c0_244 = arith.constant 0 : index
    %606 = vector.load %arg22[%c0_243, %c0_244] : memref<1x3xf32, #tpu.memory_space<vmem>>, vector<1x3xf32>
    %607 = vector.broadcast %606 : vector<1x3xf32> to vector<2x3xf32>
    %608 = arith.addf %605, %607 : vector<2x3xf32>
    %cst_245 = arith.constant dense<0xFF800000> : vector<2xf32>
    %609 = vector.multi_reduction <maximumf>, %608, %cst_245 [1] : vector<2x3xf32> to vector<2xf32>
    %610 = vector.shape_cast %609 : vector<2xf32> to vector<2x1xf32>
    %611 = vector.broadcast %610 : vector<2x1xf32> to vector<2x3xf32>
    %612 = arith.subf %608, %611 : vector<2x3xf32>
    %613 = math.exp %612 : vector<2x3xf32>
    %cst_246 = arith.constant dense<0.000000e+00> : vector<2xf32>
    %614 = vector.multi_reduction <add>, %613, %cst_246 [1] : vector<2x3xf32> to vector<2xf32>
    %615 = vector.shape_cast %614 : vector<2xf32> to vector<2x1xf32>
    %616 = vector.broadcast %615 : vector<2x1xf32> to vector<2x3xf32>
    %617 = arith.divf %613, %616 : vector<2x3xf32>
    %c0_247 = arith.constant 0 : index
    %c0_248 = arith.constant 0 : index
    %618 = vector.load %arg24[%c0_247, %c0_248] : memref<2x3xf32, #tpu.memory_space<vmem>>, vector<2x3xf32>
    tpu.vector_store %arg24[%c0_247, %c0_248], %617 {strides = array<i32>} : memref<2x3xf32, #tpu.memory_space<vmem>>, vector<2x3xf32>,
    return
  }
}

</mosaic_0001>

<bundles_post_ra>
// kernel: bert_classifier_forward.1
= control target key start
LH: loop header
LB: loop body
LE: loop exit
PB: predicated region body
PF: predicated region fallthrough
CT: control target
= control target key end

     0   :  { %s6802_s0 = inlined_call_operand.vmem [shape: f32[16,32], index: 0, kind: input, shape index: {}]   ;;  %s6803_s1 = inlined_call_operand.vmem [shape: f32[16,1], index: 1, kind: input, shape index: {}]   ;;  %s6804_s2 = inlined_call_operand.vmem [shape: f32[2,1,8], index: 2, kind: input, shape index: {}]   ;;  %s6805_s3 = inlined_call_operand.vmem [shape: f32[1,32], index: 3, kind: input, shape index: {}]   ;;  %s6806_s4 = inlined_call_operand.vmem [shape: f32[1,32], index: 4, kind: input, shape index: {}]   ;;  %s6807_s5 = inlined_call_operand.vmem [shape: f32[2,32,96], index: 5, kind: input, shape index: {}]   ;;  %s6808_s6 = inlined_call_operand.vmem [shape: f32[2,1,96], index: 6, kind: input, shape index: {}]   ;;  %s6809_s7 = inlined_call_operand.vmem [shape: f32[2,32,32], index: 7, kind: input, shape index: {}]   ;;  %s6810_s8 = inlined_call_operand.vmem [shape: f32[2,1,32], index: 8, kind: input, shape index: {}]   ;;  %s6811_s9 = inlined_call_operand.vmem [shape: f32[2,1,32], index: 9, kind: input, shape index: {}]   ;;  %s6812_s10 = inlined_call_operand.vmem [shape: f32[2,1,32], index: 10, kind: input, shape index: {}]   ;;  %s6813_s11 = inlined_call_operand.vmem [shape: f32[2,32,64], index: 11, kind: input, shape index: {}]   ;;  %s6814_s12 = inlined_call_operand.vmem [shape: f32[2,1,64], index: 12, kind: input, shape index: {}]   ;;  %s6815_s13 = inlined_call_operand.vmem [shape: f32[2,64,32], index: 13, kind: input, shape index: {}]   ;;  %s6816_s14 = inlined_call_operand.vmem [shape: f32[2,1,32], index: 14, kind: input, shape index: {}]   ;;  %s6817_s15 = inlined_call_operand.vmem [shape: f32[2,1,32], index: 15, kind: input, shape index: {}]   ;;  %s6818_s16 = inlined_call_operand.vmem [shape: f32[2,1,32], index: 16, kind: input, shape index: {}]   ;;  %s6819_s17 = inlined_call_operand.vmem [shape: f32[32,32], index: 17, kind: input, shape index: {}]   ;;  %s6820_s18 = inlined_call_operand.vmem [shape: f32[1,32], index: 18, kind: input, shape index: {}]   ;;  %s6821_s19 = inlined_call_operand.vmem [shape: f32[32,16], index: 19, kind: input, shape index: {}]   ;;  %s6822_s20 = inlined_call_operand.vmem [shape: f32[1,16], index: 20, kind: input, shape index: {}]   ;;  %s6823_s21 = inlined_call_operand.vmem [shape: f32[16,3], index: 21, kind: input, shape index: {}]   ;;  %s6824_s22 = inlined_call_operand.vmem [shape: f32[1,3], index: 22, kind: input, shape index: {}]   ;;  %s6825_s23 = inlined_call_operand.hbm [shape: f32[16,32], index: 23, kind: output, shape index: {0}]   ;;  %s6826_s24 = inlined_call_operand.hbm [shape: f32[2,3], index: 24, kind: output, shape index: {1}]  }
   0x1   :  { %6854 = sst [smem:[#allocation8_spill]] %s6802_s0 }
   0x2   :  { %6855 = sst [smem:[#allocation9_spill]] %s6803_s1 }
   0x3   :  { %6856 = sst [smem:[#allocation10_spill]] %s6804_s2 }
   0x4   :  { %6857 = sst [smem:[#allocation11_spill]] %s6805_s3 }
   0x5   :  { %6858 = sst [smem:[#allocation12_spill]] %s6806_s4 }
   0x6   :  { %6859 = sst [smem:[#allocation13_spill]] %s6807_s5 }
   0x7   :  { %6860 = sst [smem:[#allocation14_spill]] %s6808_s6 }
   0x8   :  { %6861 = sst [smem:[#allocation15_spill]] %s6809_s7 }
   0x9   :  { %6862 = sst [smem:[#allocation16_spill]] %s6810_s8 }
   0xa   :  { %30 = vsyncpa [#allocation3], 0  ;;  %s6863_s27 = sld [smem:[#allocation8_spill]]  ;;  %vm82_vm0 = vcmask 261120  }
  0x10   :  { %v78_v0 = vld [vmem:[%s6863_s27] sm:$0xff]  ;;  %v79_v1 = vld [vmem:[%s6863_s27 + $0x8] sm:$0xff] }
  0x11   :  { %31 = vsyncpa [#allocation5], 0  ;;  %v83_v2 = vsel %vm82_vm0, %v78_v0, 0.0  ;;  %v86_v3 = vsel %vm82_vm0, %v79_v1, 0.0  ;;  %v5940_v4 = vmov 0   ;;  %s6864_s0 = sld [smem:[#allocation9_spill]] }
  0x12   :  { %84 = vadd.xlane.f32.xlu0 %v83_v2  ;;  %5793 = vset.pattern.permute.xlu1 %v5940_v4  ;;  %s6865_s8 = sld [smem:[#allocation13_spill]]  ;;  %v5941_v41 = vmov 0.0   ;;  %vm5942_vm1 = vmmov 0   ;;  %s6838_s1 = smov 96   ;;  %vm240_vm2 = vcmask 64512   ;;  %vm2354_vm3 = vcmask 523264  }
  0x13   :  { %5792 = vset.pattern.permute.xlu0 %v5940_v4  ;;  %s6866_s29 = sld [smem:[#allocation11_spill]]  ;;  %5434 = vmatprep.subr.mxu1 %v5941_v41  ;;  %s6836_s5 = smov 88   ;;  %vm4838_vm4 = vcmask 1040384   ;;  %vm5019_vm5 = vcmask 130048   ;;  %vm5093_vm6 = vcmask 17408  }
  0x14   :  { %s6867_s30 = sld [smem:[#allocation12_spill]]  ;;  %5436 = vmatprep.mubr.msk.f32.mxu1 %vm5942_vm1, %v5941_v41  ;;  %s6840_s26 = smov 120  }
  0x15   :  { %s6868_s4 = sld [smem:[#allocation14_spill]]  ;;  %s5946_s2 = smov 56  }
  0x16   :  { %87 = vadd.xlane.f32.xlu0 %v86_v3  ;;  %s6869_s6 = sld [smem:[#allocation10_spill]]  ;;  %s6848_s7 = smov 112  }
  0x17   :  { %v126_v5 = vld [vmem:[%s6864_s0] sm:$0xff]  ;;  %v127_v16 = vld [vmem:[%s6864_s0 + $0x8] sm:$0xff]  ;;  %s6850_s0 = smov 80   ;;  %s6870_s25 = sld [smem:[#allocation15_spill]] }
  0x18   :  { %v143_v17 = vld [vmem:[%s6865_s8 + $0x18] sm:$0xff]  ;;  %v142_v18 = vld [vmem:[%s6865_s8 + $0x10] sm:$0xff]  ;;  %v141_v19 = vld [vmem:[%s6865_s8 + $0x8] sm:$0xff]  ;;  %s6844_s3 = smov 104   ;;  %s6846_s27 = smov 72  }
  0x19   :  { %5423 = vmatprep.subr.mxu0 %v143_v17  ;;  %v140_v20 = vld [vmem:[%s6865_s8] sm:$0xff]  ;;  %s6872_s28 = sld [smem:[#allocation16_spill]] }
  0x1a   :  { %5424 = vmatpush3.msra.mxu0 %v143_v17  ;;  %v5136_v28 = vld [vmem:[%s6866_s29] ss:$0 sm:$0xff]  ;;  %s6852_s29 = smov 64  }
  0x1b   :  { %5425 = vmatprep.subr.mxu0 %v142_v18  ;;  %v5137_v30 = vld [vmem:[%s6867_s30] ss:$0 sm:$0xff]  ;;  %s6834_s30 = smov 48  }
  0x1c   :  { %5426 = vmatpush3.msra.mxu0 %v142_v18  ;;  %v5138_v42 = vld [vmem:[%s6868_s4] ss:$0 sm:$0xff] }
  0x1d   :  { %5427 = vmatprep.subr.mxu0 %v141_v19  ;;  %v6158_v51 = vld [vmem:[%s6869_s6] ss:$0 sm:$0xff] }
  0x1e   :  { %5428 = vmatpush3.msra.mxu0 %v141_v19 }
  0x1f   :  { %5429 = vmatprep.subr.mxu0 %v140_v20 }
  0x20   :  { %5430 = vmatpush3.msra.mxu0 %v140_v20 }
  0x21   :  { %5444 = vmatprep.subr.mxu0 %v5941_v41 }
  0x2c   :  { %130 = vperm.xlu0 %5792, %v126_v5  }
  0x9b   :  { %v85_v6 = vpop.xlane.xlu0 %84 }
  0x9c   :  { %v90_v7 = vmul.f32 0.03125, %v85_v6 }
  0x9e   :  { %v92_v8 = vsub.f32 %v78_v0, %v90_v7 }
  0x9f   :  { %v88_v9 = vpop.xlane.xlu0 %87 }
  0xa0   :  { %v91_v10 = vmul.f32 0.03125, %v88_v9  ;;  %v94_v11 = vmul.f32 %v92_v8, %v92_v8 }
  0xa2   :  { %v93_v12 = vsub.f32 %v79_v1, %v91_v10  ;;  %v96_v13 = vsel %vm82_vm0, %v94_v11, 0.0 }
  0xa3   :  { %97 = vadd.xlane.f32.xlu1 %v96_v13 }
  0xa4   :  { %v95_v14 = vmul.f32 %v93_v12, %v93_v12 }
  0xa6   :  { %v99_v15 = vsel %vm82_vm0, %v95_v14, 0.0 }
  0xa7   :  { %100 = vadd.xlane.f32.xlu1 %v99_v15  ;;  %v131_v33 = vpop.permute.xlu0 %130  ;;  %v6185_v15 = vld [vmem:[%s6870_s25] sm:$0xff] }
  0xb8   :  { %135 = vperm.xlu1 %5793, %v127_v16   ;;  %v6191_v16 = vld [vmem:[%s6870_s25 + $0x8] sm:$0xff] }
 0x12c   :  { %v98_v21 = vpop.xlane.xlu1 %97 }
 0x12d   :  { %v102_v22 = vmul.f32 0.03125, %v98_v21 }
 0x12f   :  { %v104_v23 = vadd.f32 1e-12, %v102_v22 }
 0x130   :  { %v101_v24 = vpop.xlane.xlu1 %100 }
 0x131   :  { %5794 = vrsqrt.f32 %v104_v23  ;;  %v103_v25 = vmul.f32 0.03125, %v101_v24 }
 0x133   :  { %v105_v26 = vadd.f32 1e-12, %v103_v25 }
 0x134   :  { %v136_v38 = vpop.permute.xlu1 %135 }
 0x135   :  { %5796 = vrsqrt.f32 %v105_v26 }
 0x13e   :  { %v5795_v27 = vpop.eup %5794 }
 0x13f   :  { %v108_v29 = vmul.f32 %v5795_v27, %v92_v8 }
 0x141   :  { %v116_v31 = vmul.f32 %v5136_v28, %v108_v29 }
 0x142   :  { %v5797_v32 = vpop.eup %5796 }
 0x143   :  { %v124_v34 = vadd.f32 %v5137_v30, %v116_v31  ;;  %v109_v35 = vmul.f32 %v5797_v32, %v93_v12 }
 0x145   :  { %v6117_v36 = vmul.f32 %v131_v33, %v124_v34  ;;  %v117_v37 = vmul.f32 %v5136_v28, %v109_v35 }
 0x147   :  { %5431 = vmatprep.mubr.msk.f32.mxu0 %vm82_vm0, %v6117_v36  ;;  %v125_v39 = vadd.f32 %v5137_v30, %v117_v37 }
 0x149   :  { %v6121_v40 = vmul.f32 %v136_v38, %v125_v39 }
 0x14b   :  { %5432 = vmatmul.mubr.msk.f32.vlgmr.msra.gmra.mxu0 %vm82_vm0, %v6121_v40 }
 0x14c   :  { %5446 = vmatprep.mubr.msk.f32.mxu0 %vm5942_vm1, %v5941_v41 }
 0x20b   :  { %v5433_v43 = vpop.f32.mrf.mxu0 }
 0x20c   :  { %v6134_v44 = vadd.f32 %v5433_v43, %v5138_v42 }
 0x20d   :  { %v223_v45 = vpop.f32.mrf.mxu0 }
 0x20e   :  { %v6136_v46 = vadd.f32 %v5138_v42, %v223_v45 }
 0x210   :  { %238 = vrot.lane.b32.xlu1 %v6136_v46, %s6838_s1 }
 0x214   :  { %412 = vrot.lane.b32.xlu1 %v6136_v46, %s6836_s5 }
 0x218   :  { %410 = vrot.lane.b32.xlu1 %v6136_v46, %s6840_s26 }
 0x282   :  { %v239_v47 = vpop.permute.xlu1 %238 }
 0x283   :  { %5435 = vmatpush3.xpose.msk.msra.mxu1 %vm240_vm2, %v239_v47 }
 0x284   :  { %5439 = vmatprep.subr.mxu1 %v5941_v41 }
 0x286   :  { %5437 = vmatmul.mubr.msk.f32.vlgmr.msra.gmra.mxu1 %vm240_vm2, %v6136_v46  ;;  %v413_v48 = vpop.permute.xlu1 %412 }
 0x287   :  { %5445 = vmatpush3.xpose.msk.msra.mxu0 %vm240_vm2, %v413_v48  ;;  %5441 = vmatprep.mubr.msk.f32.mxu1 %vm5942_vm1, %v5941_v41 }
 0x288   :  { %5454 = vmatprep.subr.mxu0 %v5941_v41 }
 0x28a   :  { %v411_v49 = vpop.permute.xlu1 %410 }
 0x28b   :  { %5447 = vmatmul.mubr.msk.f32.vlgmr.msra.gmra.mxu0 %vm240_vm2, %v411_v49  ;;  %v6228_v49 = vld [vmem:[%s6870_s25 + $0x10] sm:$0xff] }
 0x28c   :  { %5456 = vmatprep.mubr.msk.f32.mxu0 %vm5942_vm1, %v5941_v41  ;;  %5455 = vmatpush3.msra.mxu0 %v6191_v16 }
 0x28d   :  { %5464 = vmatprep.subr.mxu0 %v5941_v41 }
 0x346   :  { %v311_v50 = vpop.f32.mrf.mxu1 }
 0x347   :  { %v315_v52 = vmul.f32 0.35355338, %v311_v50 }
 0x348   :  { %v5438_v53 = vpop.f32.mrf.mxu1 }
 0x349   :  { %v322_v54 = vadd.f32 %v6158_v51, %v315_v52 }
 0x34b   :  { %v484_v55 = vpop.f32.mrf.mxu0  ;;  %v323_v56 = vsel %vm240_vm2, %v322_v54, -inf }
 0x34c   :  { %v488_v57 = vmul.f32 0.35355338, %v484_v55  ;;  %324 = vmax.xlane.f32.xlu1 %v323_v56 }
 0x34d   :  { %v5448_v58 = vpop.f32.mrf.mxu0 }
 0x34e   :  { %v489_v59 = vadd.f32 %v6158_v51, %v488_v57 }
 0x350   :  { %v490_v60 = vsel %vm240_vm2, %v489_v59, -inf }
 0x351   :  { %491 = vmax.xlane.f32.xlu0 %v490_v60 }
 0x367   :  { %501 = vrot.lane.b32.xlu0 %v6136_v46, %s5946_s2 }
 0x3d5   :  { %v325_v61 = vpop.xlane.xlu1 %324 }
 0x3d6   :  { %v326_v62 = vsub.f32 %v322_v54, %v325_v61 }
 0x3d8   :  { %v327_v63 = vmul.f32 1.442695, %v326_v62 }
 0x3da   :  { %5798 = vpow2.f32 %v327_v63  ;;  %v492_v0 = vpop.xlane.xlu0 %491 }
 0x3db   :  { %v493_v1 = vsub.f32 %v489_v59, %v492_v0 }
 0x3dd   :  { %v494_v2 = vmul.f32 1.442695, %v493_v1 }
 0x3de   :  { %v502_v12 = vpop.permute.xlu0 %501 }
 0x3df   :  { %5800 = vpow2.f32 %v494_v2 }
 0x3e7   :  { %v5799_v3 = vpop.eup %5798 }
 0x3e8   :  { %v329_v4 = vsel %vm240_vm2, %v5799_v3, 0.0 }
 0x3e9   :  { %330 = vadd.xlane.f32.xlu1 %v329_v4 }
 0x3ec   :  { %v5801_v5 = vpop.eup %5800 }
 0x3ed   :  { %v496_v6 = vsel %vm240_vm2, %v5801_v5, 0.0 }
 0x3ee   :  { %497 = vadd.xlane.f32.xlu1 %v496_v6 }
 0x3ff   :  { %334 = vrot.lane.b32.xlu1 %v6136_v46, %s6852_s29 }
 0x403   :  { %725 = vrot.lane.b32.xlu1 %v6136_v46, %s6850_s0 }
 0x407   :  { %723 = vrot.lane.b32.xlu1 %v6136_v46, %s6848_s7 }
 0x472   :  { %v331_v7 = vpop.xlane.xlu1 %330 }
 0x473   :  { %5802 = vrcp.f32 %v331_v7 }
 0x477   :  { %v498_v8 = vpop.xlane.xlu1 %497 }
 0x478   :  { %5804 = vrcp.f32 %v498_v8  ;;  %v6268_v8 = vld [vmem:[%s6870_s25 + $0x18] sm:$0xff] }
 0x47b   :  { %v335_v9 = vpop.permute.xlu1 %334 }
 0x47c   :  { %5440 = vmatpush3.msra.mxu1 %v335_v9 }
 0x47d   :  { %5449 = vmatprep.subr.mxu1 %v5941_v41 }
 0x47f   :  { %v726_v19 = vpop.permute.xlu1 %725 }
 0x480   :  { %v5803_v10 = vpop.eup %5802 }
 0x481   :  { %v333_v11 = vmul.f32 %v5803_v10, %v5799_v3 }
 0x483   :  { %5442 = vmatmul.mubr.msk.f32.vlgmr.msra.gmra.mxu1 %vm240_vm2, %v333_v11  ;;  %v724_v22 = vpop.permute.xlu1 %723 }
 0x484   :  { %5450 = vmatpush3.msra.mxu1 %v502_v12  ;;  %5451 = vmatprep.mubr.msk.f32.mxu1 %vm5942_vm1, %v5941_v41  ;;  %v6278_v12 = vld [vmem:[%s6869_s6 + $0x1] ss:$0 sm:$0xff] }
 0x485   :  { %v5805_v13 = vpop.eup %5804  ;;  %5459 = vmatprep.subr.mxu1 %v5941_v41 }
 0x486   :  { %v500_v14 = vmul.f32 %v5805_v13, %v5801_v5 }
 0x488   :  { %5452 = vmatmul.mubr.msk.f32.vlgmr.msra.gmra.mxu1 %vm240_vm2, %v500_v14 }
 0x489   :  { %5461 = vmatprep.mubr.msk.f32.mxu1 %vm5942_vm1, %v5941_v41  ;;  %5460 = vmatpush3.msra.mxu1 %v6185_v15 }
 0x48a   :  { %5469 = vmatprep.subr.mxu1 %v5941_v41 }
 0x543   :  { %v406_v17 = vpop.f32.mrf.mxu1 }
 0x544   :  { %5462 = vmatmul.mubr.msk.f32.vlgmr.msra.gmra.mxu1 %vm240_vm2, %v406_v17 }
 0x545   :  { %v5443_v18 = vpop.f32.mrf.mxu1  ;;  %5471 = vmatprep.mubr.msk.f32.mxu1 %vm5942_vm1, %v5941_v41 }
 0x548   :  { %v573_v20 = vpop.f32.mrf.mxu1 }
 0x549   :  { %5457 = vmatmul.mubr.msk.f32.vlgmr.msra.gmra.mxu0 %vm240_vm2, %v573_v20 }
 0x54a   :  { %5465 = vmatpush3.xpose.msk.msra.mxu0 %vm240_vm2, %v726_v19  ;;  %v5453_v21 = vpop.f32.mrf.mxu1  ;;  %5466 = vmatprep.mubr.msk.f32.mxu0 %vm5942_vm1, %v5941_v41 }
 0x54b   :  { %5474 = vmatprep.subr.mxu0 %v5941_v41 }
 0x54d   :  { %5467 = vmatmul.mubr.msk.f32.vlgmr.msra.gmra.mxu0 %vm240_vm2, %v724_v22 }
 0x54e   :  { %5476 = vmatprep.mubr.msk.f32.mxu0 %vm5942_vm1, %v5941_v41  ;;  %5475 = vmatpush3.msra.mxu0 %v6228_v49 }
 0x54f   :  { %5484 = vmatprep.subr.mxu0 %v5941_v41 }
 0x604   :  { %v719_v23 = vpop.f32.mrf.mxu1 }
 0x606   :  { %v5463_v24 = vpop.f32.mrf.mxu1 }
 0x609   :  { %v646_v25 = vpop.f32.mrf.mxu0 }
 0x60a   :  { %v720_v26 = vadd.f32 %v719_v23, %v646_v25 }
 0x60b   :  { %v5458_v27 = vpop.f32.mrf.mxu0 }
 0x60d   :  { %v797_v28 = vpop.f32.mrf.mxu0 }
 0x60e   :  { %v801_v29 = vmul.f32 0.35355338, %v797_v28 }
 0x60f   :  { %v5468_v30 = vpop.f32.mrf.mxu0 }
 0x610   :  { %v802_v31 = vadd.f32 %v6158_v51, %v801_v29 }
 0x612   :  { %v803_v32 = vsel %vm240_vm2, %v802_v31, -inf }
 0x613   :  { %804 = vmax.xlane.f32.xlu0 %v803_v32 }
 0x629   :  { %814 = vrot.lane.b32.xlu0 %v6136_v46, %s6834_s30  ;;  %s6842_s30 = smov 40  }
 0x62d   :  { %964 = vrot.lane.b32.xlu0 %v6136_v46, %s6844_s3 }
 0x69c   :  { %v805_v33 = vpop.xlane.xlu0 %804 }
 0x69d   :  { %v806_v34 = vsub.f32 %v802_v31, %v805_v33 }
 0x69f   :  { %v807_v35 = vmul.f32 1.442695, %v806_v34 }
 0x6a0   :  { %v815_v37 = vpop.permute.xlu0 %814 }
 0x6a1   :  { %5806 = vpow2.f32 %v807_v35  ;;  %5470 = vmatpush3.msra.mxu1 %v815_v37 }
 0x6a2   :  { %5479 = vmatprep.subr.mxu1 %v5941_v41 }
 0x6a4   :  { %v965_v48 = vpop.permute.xlu0 %964 }
 0x6ae   :  { %v5807_v38 = vpop.eup %5806 }
 0x6af   :  { %v809_v39 = vsel %vm240_vm2, %v5807_v38, 0.0 }
 0x6b0   :  { %810 = vadd.xlane.f32.xlu1 %v809_v39 }
 0x6c1   :  { %966 = vrot.lane.b32.xlu1 %v6136_v46, %s6846_s27 }
 0x739   :  { %v811_v42 = vpop.xlane.xlu1 %810 }
 0x73a   :  { %5808 = vrcp.f32 %v811_v42 }
 0x73d   :  { %v967_v47 = vpop.permute.xlu1 %966 }
 0x747   :  { %v5809_v43 = vpop.eup %5808 }
 0x748   :  { %v813_v45 = vmul.f32 %v5809_v43, %v5807_v38 }
 0x74a   :  { %5472 = vmatmul.mubr.msk.f32.vlgmr.msra.gmra.mxu1 %vm240_vm2, %v813_v45 }
 0x74b   :  { %5480 = vmatpush3.xpose.msk.msra.mxu1 %vm240_vm2, %v967_v47  ;;  %5481 = vmatprep.mubr.msk.f32.mxu1 %vm5942_vm1, %v5941_v41 }
 0x74c   :  { %5489 = vmatprep.subr.mxu1 %v5941_v41 }
 0x74e   :  { %5482 = vmatmul.mubr.msk.f32.vlgmr.msra.gmra.mxu1 %vm240_vm2, %v965_v48 }
 0x74f   :  { %5491 = vmatprep.mubr.msk.f32.mxu1 %vm5942_vm1, %v5941_v41  ;;  %5490 = vmatpush3.msra.mxu1 %v6268_v8 }
 0x750   :  { %5499 = vmatprep.subr.mxu1 %v5941_v41 }
 0x80a   :  { %v886_v50 = vpop.f32.mrf.mxu1 }
 0x80b   :  { %5477 = vmatmul.mubr.msk.f32.vlgmr.msra.gmra.mxu0 %vm240_vm2, %v886_v50 }
 0x80c   :  { %v5473_v52 = vpop.f32.mrf.mxu1  ;;  %5486 = vmatprep.mubr.msk.f32.mxu0 %vm5942_vm1, %v5941_v41 }
 0x80e   :  { %v1038_v53 = vpop.f32.mrf.mxu1 }
 0x80f   :  { %v1042_v54 = vmul.f32 0.35355338, %v1038_v53 }
 0x810   :  { %v5483_v55 = vpop.f32.mrf.mxu1 }
 0x811   :  { %v1043_v56 = vadd.f32 %v6158_v51, %v1042_v54 }
 0x813   :  { %v1044_v57 = vsel %vm240_vm2, %v1043_v56, -inf }
 0x814   :  { %1045 = vmax.xlane.f32.xlu1 %v1044_v57 }
 0x825   :  { %1208 = vrot.lane.b32.xlu1 %v6134_v44, %s6838_s1  ;;  %s6871_s1 = smov 48  }
 0x829   :  { %1381 = vrot.lane.b32.xlu1 %v6134_v44, %s6836_s5  ;;  %s6877_s5 = smov 80  }
 0x89d   :  { %v1046_v58 = vpop.xlane.xlu1 %1045 }
 0x89e   :  { %v1047_v59 = vsub.f32 %v1043_v56, %v1046_v58 }
 0x8a0   :  { %v1048_v60 = vmul.f32 1.442695, %v1047_v59 }
 0x8a1   :  { %v1209_v5 = vpop.permute.xlu1 %1208 }
 0x8a2   :  { %5810 = vpow2.f32 %v1048_v60 }
 0x8af   :  { %v5811_v61 = vpop.eup %5810 }
 0x8b0   :  { %v1050_v62 = vsel %vm240_vm2, %v5811_v61, 0.0 }
 0x8b1   :  { %1051 = vadd.xlane.f32.xlu0 %v1050_v62 }
 0x8c7   :  { %1055 = vrot.lane.b32.xlu0 %v6136_v46, %s6842_s30  ;;  %v1382_v46 = vpop.permute.xlu1 %1381 }
 0x8cb   :  { %1379 = vrot.lane.b32.xlu0 %v6134_v44, %s6840_s26  ;;  %v959_v63 = vpop.f32.mrf.mxu0  ;;  %s6878_s26 = smov 112  }
 0x8cc   :  { %v6246_v0 = vadd.f32 %v959_v63, %v720_v26 }
 0x8cd   :  { %v5478_v1 = vpop.f32.mrf.mxu0 }
 0x93a   :  { %v1052_v2 = vpop.xlane.xlu0 %1051 }
 0x93b   :  { %5812 = vrcp.f32 %v1052_v2 }
 0x93e   :  { %v1056_v3 = vpop.permute.xlu0 %1055 }
 0x93f   :  { %5485 = vmatpush3.msra.mxu0 %v1056_v3 }
 0x940   :  { %5494 = vmatprep.subr.mxu0 %v5941_v41 }
 0x942   :  { %v1380_v7 = vpop.permute.xlu0 %1379 }
 0x948   :  { %v5813_v4 = vpop.eup %5812 }
 0x949   :  { %v1054_v6 = vmul.f32 %v5813_v4, %v5811_v61 }
 0x94b   :  { %5487 = vmatmul.mubr.msk.f32.vlgmr.msra.gmra.mxu0 %vm240_vm2, %v1054_v6 }
 0x94c   :  { %5495 = vmatpush3.xpose.msk.msra.mxu0 %vm240_vm2, %v1209_v5  ;;  %5496 = vmatprep.mubr.msk.f32.mxu0 %vm5942_vm1, %v5941_v41 }
 0x94d   :  { %5504 = vmatprep.subr.mxu0 %v5941_v41 }
 0x94f   :  { %5497 = vmatmul.mubr.msk.f32.vlgmr.msra.gmra.mxu0 %vm240_vm2, %v6134_v44 }
 0x950   :  { %5505 = vmatpush3.xpose.msk.msra.mxu0 %vm240_vm2, %v1382_v46  ;;  %5506 = vmatprep.mubr.msk.f32.mxu0 %vm5942_vm1, %v5941_v41 }
 0x951   :  { %5514 = vmatprep.subr.mxu0 %v5941_v41 }
 0x953   :  { %5507 = vmatmul.mubr.msk.f32.vlgmr.msra.gmra.mxu0 %vm240_vm2, %v1380_v7 }
 0x954   :  { %5515 = vmatpush3.msra.mxu0 %v6191_v16  ;;  %5516 = vmatprep.mubr.msk.f32.mxu0 %vm5942_vm1, %v5941_v41 }
 0x955   :  { %5524 = vmatprep.subr.mxu0 %v5941_v41 }
 0xa0b   :  { %v1127_v9 = vpop.f32.mrf.mxu0 }
 0xa0c   :  { %5492 = vmatmul.mubr.msk.f32.vlgmr.msra.gmra.mxu1 %vm240_vm2, %v1127_v9 }
 0xa0d   :  { %v5488_v10 = vpop.f32.mrf.mxu0  ;;  %5501 = vmatprep.mubr.msk.f32.mxu1 %vm5942_vm1, %v5941_v41 }
 0xa0f   :  { %v1280_v11 = vpop.f32.mrf.mxu0 }
 0xa10   :  { %v1284_v13 = vmul.f32 0.35355338, %v1280_v11 }
 0xa11   :  { %v5498_v14 = vpop.f32.mrf.mxu0 }
 0xa12   :  { %v1291_v16 = vadd.f32 %v6278_v12, %v1284_v13 }
 0xa13   :  { %v1453_v17 = vpop.f32.mrf.mxu0 }
 0xa14   :  { %v1457_v18 = vmul.f32 0.35355338, %v1453_v17  ;;  %v1292_v19 = vsel %vm240_vm2, %v1291_v16, -inf }
 0xa15   :  { %1293 = vmax.xlane.f32.xlu1 %v1292_v19  ;;  %v5508_v20 = vpop.f32.mrf.mxu0 }
 0xa16   :  { %v1458_v21 = vadd.f32 %v6278_v12, %v1457_v18 }
 0xa18   :  { %v1459_v22 = vsel %vm240_vm2, %v1458_v21, -inf }
 0xa19   :  { %1460 = vmax.xlane.f32.xlu0 %v1459_v22 }
 0xa9e   :  { %v1294_v23 = vpop.xlane.xlu1 %1293 }
 0xa9f   :  { %v1295_v24 = vsub.f32 %v1291_v16, %v1294_v23 }
 0xaa1   :  { %v1296_v25 = vmul.f32 1.442695, %v1295_v24  ;;  %v5176_v24 = vld [vmem:[%s6872_s28] ss:$0 sm:$0xff] }
 0xaa2   :  { %v1461_v26 = vpop.xlane.xlu0 %1460 }
 0xaa3   :  { %5814 = vpow2.f32 %v1296_v25  ;;  %v1462_v27 = vsub.f32 %v1458_v21, %v1461_v26 }
 0xaa5   :  { %v1463_v28 = vmul.f32 1.442695, %v1462_v27 }
 0xaa7   :  { %5816 = vpow2.f32 %v1463_v28 }
 0xab0   :  { %v5815_v29 = vpop.eup %5814 }
 0xab1   :  { %v1298_v30 = vsel %vm240_vm2, %v5815_v29, 0.0 }
 0xab2   :  { %1299 = vadd.xlane.f32.xlu0 %v1298_v30 }
 0xab4   :  { %v5817_v31 = vpop.eup %5816 }
 0xab5   :  { %v1465_v32 = vsel %vm240_vm2, %v5817_v31, 0.0 }
 0xab6   :  { %1466 = vadd.xlane.f32.xlu1 %v1465_v32 }
 0xac7   :  { %1470 = vrot.lane.b32.xlu1 %v6134_v44, %s5946_s2 }
 0xac8   :  { %1303 = vrot.lane.b32.xlu0 %v6134_v44, %s6852_s29  ;;  %s6880_s29 = smov 104  }
 0xacb   :  { %1694 = vrot.lane.b32.xlu1 %v6134_v44, %s6850_s0  ;;  %s6873_s0 = smov 120  }
 0xacc   :  { %v1200_v33 = vpop.f32.mrf.mxu1  ;;  %1692 = vrot.lane.b32.xlu0 %v6134_v44, %s6848_s7  ;;  %s6874_s7 = smov 96  }
 0xacd   :  { %v6295_v34 = vadd.f32 %v1200_v33, %v6246_v0 }
 0xace   :  { %v5493_v35 = vpop.f32.mrf.mxu1 }
 0xacf   :  { %v2181_v25 = vadd.f32 %v5176_v24, %v6295_v34 }
 0xad1   :  { %v2183_v28 = vadd.f32 %v2181_v25, %v6117_v36 }
 0xb3b   :  { %v1300_v37 = vpop.xlane.xlu0 %1299 }
 0xb3c   :  { %5818 = vrcp.f32 %v1300_v37 }
 0xb3f   :  { %v1467_v38 = vpop.xlane.xlu1 %1466  ;;  %v1304_v39 = vpop.permute.xlu0 %1303 }
 0xb40   :  { %5820 = vrcp.f32 %v1467_v38  ;;  %5500 = vmatpush3.msra.mxu1 %v1304_v39 }
 0xb41   :  { %5509 = vmatprep.subr.mxu1 %v5941_v41 }
 0xb43   :  { %v1471_v45 = vpop.permute.xlu1 %1470 }
 0xb47   :  { %v1695_v54 = vpop.permute.xlu1 %1694 }
 0xb49   :  { %v5819_v42 = vpop.eup %5818 }
 0xb4a   :  { %v1302_v43 = vmul.f32 %v5819_v42, %v5815_v29 }
 0xb4c   :  { %5502 = vmatmul.mubr.msk.f32.vlgmr.msra.gmra.mxu1 %vm240_vm2, %v1302_v43 }
 0xb4d   :  { %v5821_v47 = vpop.eup %5820  ;;  %5510 = vmatpush3.msra.mxu1 %v1471_v45  ;;  %5511 = vmatprep.mubr.msk.f32.mxu1 %vm5942_vm1, %v5941_v41 }
 0xb4e   :  { %v1469_v48 = vmul.f32 %v5821_v47, %v5817_v31  ;;  %5519 = vmatprep.subr.mxu1 %v5941_v41 }
 0xb50   :  { %5512 = vmatmul.mubr.msk.f32.vlgmr.msra.gmra.mxu1 %vm240_vm2, %v1469_v48 }
 0xb51   :  { %5520 = vmatpush3.msra.mxu1 %v6185_v15  ;;  %5521 = vmatprep.mubr.msk.f32.mxu1 %vm5942_vm1, %v5941_v41  ;;  %v1693_v15 = vpop.permute.xlu0 %1692 }
 0xb52   :  { %5529 = vmatprep.subr.mxu1 %v5941_v41 }
 0xc0c   :  { %v1375_v50 = vpop.f32.mrf.mxu1 }
 0xc0d   :  { %5522 = vmatmul.mubr.msk.f32.vlgmr.msra.gmra.mxu1 %vm240_vm2, %v1375_v50 }
 0xc0e   :  { %v5503_v52 = vpop.f32.mrf.mxu1  ;;  %5531 = vmatprep.mubr.msk.f32.mxu1 %vm5942_vm1, %v5941_v41 }
 0xc10   :  { %v1542_v53 = vpop.f32.mrf.mxu1 }
 0xc11   :  { %5517 = vmatmul.mubr.msk.f32.vlgmr.msra.gmra.mxu0 %vm240_vm2, %v1542_v53 }
 0xc12   :  { %5525 = vmatpush3.xpose.msk.msra.mxu0 %vm240_vm2, %v1695_v54  ;;  %v5513_v55 = vpop.f32.mrf.mxu1  ;;  %5526 = vmatprep.mubr.msk.f32.mxu0 %vm5942_vm1, %v5941_v41 }
 0xc13   :  { %5534 = vmatprep.subr.mxu0 %v5941_v41 }
 0xc15   :  { %5527 = vmatmul.mubr.msk.f32.vlgmr.msra.gmra.mxu0 %vm240_vm2, %v1693_v15 }
 0xc16   :  { %5535 = vmatpush3.msra.mxu0 %v6228_v49  ;;  %5536 = vmatprep.mubr.msk.f32.mxu0 %vm5942_vm1, %v5941_v41 }
 0xc17   :  { %5544 = vmatprep.subr.mxu0 %v5941_v41 }
 0xccd   :  { %v1688_v56 = vpop.f32.mrf.mxu1 }
 0xccf   :  { %v5523_v57 = vpop.f32.mrf.mxu1 }
 0xcd1   :  { %v1615_v58 = vpop.f32.mrf.mxu0 }
 0xcd2   :  { %v1689_v59 = vadd.f32 %v1688_v56, %v1615_v58 }
 0xcd3   :  { %v5518_v60 = vpop.f32.mrf.mxu0 }
 0xcd5   :  { %v1766_v61 = vpop.f32.mrf.mxu0 }
 0xcd6   :  { %v1770_v62 = vmul.f32 0.35355338, %v1766_v61 }
 0xcd7   :  { %v5528_v63 = vpop.f32.mrf.mxu0 }
 0xcd8   :  { %v1771_v0 = vadd.f32 %v6278_v12, %v1770_v62  ;;  %v5178_v63 = vld [vmem:[%s6812_s10] ss:$0 sm:$0xff] }
 0xcda   :  { %v1772_v1 = vsel %vm240_vm2, %v1771_v0, -inf }
 0xcdb   :  { %1773 = vmax.xlane.f32.xlu1 %v1772_v1 }
 0xcec   :  { %1935 = vrot.lane.b32.xlu1 %v6134_v44, %s6846_s27  ;;  %s6875_s27 = smov 88  }
 0xcf0   :  { %1933 = vrot.lane.b32.xlu1 %v6134_v44, %s6844_s3 }
 0xd64   :  { %v1774_v49 = vpop.xlane.xlu1 %1773 }
 0xd65   :  { %v1775_v2 = vsub.f32 %v1771_v0, %v1774_v49  ;;  %v2232_v49 = vld [vmem:[%s6813_s11 + $0x18] sm:$0xff] }
 0xd67   :  { %v1776_v3 = vmul.f32 1.442695, %v1775_v2  ;;  %v2231_v2 = vld [vmem:[%s6813_s11 + $0x10] sm:$0xff] }
 0xd68   :  { %v1936_v9 = vpop.permute.xlu1 %1935 }
 0xd69   :  { %5822 = vpow2.f32 %v1776_v3  ;;  %v2230_v3 = vld [vmem:[%s6813_s11 + $0x8] sm:$0xff] }
 0xd6c   :  { %v1934_v11 = vpop.permute.xlu1 %1933 }
 0xd76   :  { %v5823_v4 = vpop.eup %5822 }
 0xd77   :  { %v1778_v5 = vsel %vm240_vm2, %v5823_v4, 0.0 }
 0xd78   :  { %1779 = vadd.xlane.f32.xlu0 %v1778_v5 }
 0xd8e   :  { %1783 = vrot.lane.b32.xlu0 %v6134_v44, %s6871_s1 }
 0xe01   :  { %v1780_v6 = vpop.xlane.xlu0 %1779 }
 0xe02   :  { %5824 = vrcp.f32 %v1780_v6 }
 0xe05   :  { %v1784_v46 = vpop.permute.xlu0 %1783 }
 0xe06   :  { %5530 = vmatpush3.msra.mxu1 %v1784_v46 }
 0xe07   :  { %5539 = vmatprep.subr.mxu1 %v5941_v41 }
 0xe0f   :  { %v5825_v7 = vpop.eup %5824 }
 0xe10   :  { %v1782_v10 = vmul.f32 %v5825_v7, %v5823_v4  ;;  %v2229_v4 = vld [vmem:[%s6813_s11] sm:$0xff] }
 0xe12   :  { %5532 = vmatmul.mubr.msk.f32.vlgmr.msra.gmra.mxu1 %vm240_vm2, %v1782_v10 }
 0xe13   :  { %5540 = vmatpush3.xpose.msk.msra.mxu1 %vm240_vm2, %v1936_v9  ;;  %5541 = vmatprep.mubr.msk.f32.mxu1 %vm5942_vm1, %v5941_v41 }
 0xe14   :  { %5549 = vmatprep.subr.mxu1 %v5941_v41 }
 0xe16   :  { %5542 = vmatmul.mubr.msk.f32.vlgmr.msra.gmra.mxu1 %vm240_vm2, %v1934_v11 }
 0xe17   :  { %5550 = vmatpush3.msra.mxu1 %v6268_v8  ;;  %5551 = vmatprep.mubr.msk.f32.mxu1 %vm5942_vm1, %v5941_v41 }
 0xed2   :  { %v1855_v13 = vpop.f32.mrf.mxu1 }
 0xed3   :  { %5537 = vmatmul.mubr.msk.f32.vlgmr.msra.gmra.mxu0 %vm240_vm2, %v1855_v13  ;;  %v2346_v13 = vld [vmem:[%s6815_s13 + $0x38] sm:$0xff] }
 0xed4   :  { %v5533_v14 = vpop.f32.mrf.mxu1  ;;  %5546 = vmatprep.mubr.msk.f32.mxu0 %vm5942_vm1, %v5941_v41  ;;  %5565 = vmatprep.subr.mxu1 %v2346_v13 }
 0xed5   :  { %v2345_v14 = vld [vmem:[%s6815_s13 + $0x30] sm:$0xff] }
 0xed6   :  { %v2007_v16 = vpop.f32.mrf.mxu1 }
 0xed7   :  { %v2011_v17 = vmul.f32 0.35355338, %v2007_v16  ;;  %v2344_v16 = vld [vmem:[%s6815_s13 + $0x28] sm:$0xff] }
 0xed8   :  { %v5543_v18 = vpop.f32.mrf.mxu1 }
 0xed9   :  { %v2012_v19 = vadd.f32 %v6278_v12, %v2011_v17  ;;  %v2343_v17 = vld [vmem:[%s6815_s13 + $0x20] sm:$0xff]  ;;  %v2342_v18 = vld [vmem:[%s6815_s13 + $0x18] sm:$0xff] }
 0xedb   :  { %v2013_v20 = vsel %vm240_vm2, %v2012_v19, -inf }
 0xedc   :  { %2014 = vmax.xlane.f32.xlu0 %v2013_v20  ;;  %v2340_v20 = vld [vmem:[%s6815_s13 + $0x8] sm:$0xff] }
 0xef2   :  { %2024 = vrot.lane.b32.xlu0 %v6134_v44, %s6842_s30  ;;  %v2187_v44 = vsel %vm82_vm0, %v2183_v28, 0.0  ;;  %s6879_s30 = smov 72  }
 0xf65   :  { %v2015_v8 = vpop.xlane.xlu0 %2014 }
 0xf66   :  { %v2016_v21 = vsub.f32 %v2012_v19, %v2015_v8  ;;  %v2341_v19 = vld [vmem:[%s6815_s13 + $0x10] sm:$0xff]  ;;  %v2339_v8 = vld [vmem:[%s6815_s13] sm:$0xff] }
 0xf68   :  { %v2017_v22 = vmul.f32 1.442695, %v2016_v21  ;;  %v5179_v21 = vld [vmem:[%s6814_s12] ss:$0 sm:$0xff] }
 0xf69   :  { %v2025_v23 = vpop.permute.xlu0 %2024 }
 0xf6a   :  { %5826 = vpow2.f32 %v2017_v22  ;;  %5545 = vmatpush3.msra.mxu0 %v2025_v23 }
 0xf6b   :  { %5554 = vmatprep.subr.mxu0 %v2232_v49 }
 0xf77   :  { %v5827_v26 = vpop.eup %5826 }
 0xf78   :  { %v2019_v27 = vsel %vm240_vm2, %v5827_v26, 0.0 }
 0xf79   :  { %2020 = vadd.xlane.f32.xlu1 %v2019_v27 }
 0xf7d   :  { %2188 = vadd.xlane.f32.xlu1 %v2187_v44 }
 0xf93   :  { %v1928_v29 = vpop.f32.mrf.mxu0 }
 0xf94   :  { %v1932_v30 = vadd.f32 %v1928_v29, %v1689_v59 }
 0xf95   :  { %v5538_v31 = vpop.f32.mrf.mxu0 }
0x1002   :  { %v2021_v32 = vpop.xlane.xlu1 %2020 }
0x1003   :  { %5828 = vrcp.f32 %v2021_v32 }
0x1006   :  { %v2189_v38 = vpop.xlane.xlu1 %2188 }
0x1007   :  { %v2193_v39 = vmul.f32 0.03125, %v2189_v38 }
0x1009   :  { %v2195_v45 = vsub.f32 %v2183_v28, %v2193_v39 }
0x100b   :  { %v2197_v52 = vmul.f32 %v2195_v45, %v2195_v45 }
0x100d   :  { %v2199_v53 = vsel %vm82_vm0, %v2197_v52, 0.0 }
0x1010   :  { %v5829_v33 = vpop.eup %5828 }
0x1011   :  { %v2023_v35 = vmul.f32 %v5829_v33, %v5827_v26 }
0x1013   :  { %5547 = vmatmul.mubr.msk.f32.vlgmr.msra.gmra.mxu0 %vm240_vm2, %v2023_v35 }
0x1014   :  { %5555 = vmatpush3.msra.mxu0 %v2232_v49 }
0x1015   :  { %5556 = vmatprep.subr.mxu0 %v2231_v2 }
0x1016   :  { %5557 = vmatpush3.msra.mxu0 %v2231_v2  ;;  %v5189_v2 = vld [vmem:[%s6865_s8 + $0x30] sm:$0xff] }
0x1017   :  { %5558 = vmatprep.subr.mxu0 %v2230_v3 }
0x1018   :  { %5559 = vmatpush3.msra.mxu0 %v2230_v3  ;;  %v5188_v3 = vld [vmem:[%s6865_s8 + $0x28] sm:$0xff] }
0x1019   :  { %5560 = vmatprep.subr.mxu0 %v2229_v4 }
0x101a   :  { %5561 = vmatpush3.msra.mxu0 %v2229_v4  ;;  %v5187_v4 = vld [vmem:[%s6865_s8 + $0x20] sm:$0xff] }
0x10d3   :  { %v2096_v37 = vpop.f32.mrf.mxu0 }
0x10d4   :  { %5552 = vmatmul.mubr.msk.f32.vlgmr.msra.gmra.mxu1 %vm240_vm2, %v2096_v37 }
0x10d5   :  { %v5548_v34 = vpop.f32.mrf.mxu0  ;;  %5566 = vmatpush3.msra.mxu1 %v2346_v13  ;;  %v5185_v13 = vld [vmem:[%s6817_s15] ss:$0 sm:$0xff] }
0x10d6   :  { %5567 = vmatprep.subr.mxu1 %v2345_v14 }
0x10d7   :  { %5568 = vmatpush3.msra.mxu1 %v2345_v14 }
0x10d8   :  { %5569 = vmatprep.subr.mxu1 %v2344_v16 }
0x10d9   :  { %5570 = vmatpush3.msra.mxu1 %v2344_v16  ;;  %v5186_v16 = vld [vmem:[%s6818_s16] ss:$0 sm:$0xff] }
0x10da   :  { %5571 = vmatprep.subr.mxu1 %v2343_v17 }
0x10db   :  { %5572 = vmatpush3.msra.mxu1 %v2343_v17 }
0x10dc   :  { %5573 = vmatprep.subr.mxu1 %v2342_v18 }
0x10dd   :  { %5574 = vmatpush3.msra.mxu1 %v2342_v18 }
0x10de   :  { %5575 = vmatprep.subr.mxu1 %v2341_v19 }
0x10df   :  { %5576 = vmatpush3.msra.mxu1 %v2341_v19 }
0x10e0   :  { %5577 = vmatprep.subr.mxu1 %v2340_v20 }
0x10e1   :  { %5578 = vmatpush3.msra.mxu1 %v2340_v20 }
0x10e2   :  { %5579 = vmatprep.subr.mxu1 %v2339_v8 }
0x10e3   :  { %5580 = vmatpush3.msra.mxu1 %v2339_v8 }
0x10e4   :  { %5600 = vmatprep.subr.mxu1 %v5941_v41 }
0x1194   :  { %v2169_v36 = vpop.f32.mrf.mxu1 }
0x1195   :  { %v2173_v42 = vadd.f32 %v2169_v36, %v1932_v30 }
0x1196   :  { %v5553_v43 = vpop.f32.mrf.mxu1 }
0x1197   :  { %v2182_v47 = vadd.f32 %v5176_v24, %v2173_v42 }
0x1199   :  { %v2184_v48 = vadd.f32 %v2182_v47, %v6121_v40  ;;  %v5177_v40 = vld [vmem:[%s6811_s9] ss:$0 sm:$0xff] }
0x119a   :  { %v5182_v47 = vld [vmem:[%s6816_s14] ss:$0 sm:$0xff] }
0x119b   :  { %v2190_v50 = vsel %vm82_vm0, %v2184_v48, 0.0 }
0x119c   :  { %2191 = vadd.xlane.f32.xlu1 %v2190_v50 }
0x11a0   :  { %2200 = vadd.xlane.f32.xlu1 %v2199_v53 }
0x1225   :  { %v2192_v54 = vpop.xlane.xlu1 %2191 }
0x1226   :  { %v2194_v55 = vmul.f32 0.03125, %v2192_v54 }
0x1228   :  { %v2196_v15 = vsub.f32 %v2184_v48, %v2194_v55 }
0x1229   :  { %v2201_v56 = vpop.xlane.xlu1 %2200 }
0x122a   :  { %v2205_v57 = vmul.f32 0.03125, %v2201_v56  ;;  %v2198_v58 = vmul.f32 %v2196_v15, %v2196_v15 }
0x122c   :  { %v2207_v59 = vadd.f32 1e-12, %v2205_v57  ;;  %v2202_v60 = vsel %vm82_vm0, %v2198_v58, 0.0 }
0x122d   :  { %2203 = vadd.xlane.f32.xlu1 %v2202_v60 }
0x122e   :  { %5830 = vrsqrt.f32 %v2207_v59 }
0x123b   :  { %v5831_v61 = vpop.eup %5830 }
0x123c   :  { %v2211_v62 = vmul.f32 %v5831_v61, %v2195_v45 }
0x123e   :  { %v2219_v0 = vmul.f32 %v5177_v40, %v2211_v62 }
0x1240   :  { %v6365_v1 = vadd.f32 %v5178_v63, %v2219_v0 }
0x1242   :  { %5562 = vmatprep.mubr.msk.f32.mxu0 %vm82_vm0, %v6365_v1 }
0x12b6   :  { %v2204_v5 = vpop.xlane.xlu1 %2203 }
0x12b7   :  { %v2206_v6 = vmul.f32 0.03125, %v2204_v5 }
0x12b9   :  { %v2208_v46 = vadd.f32 1e-12, %v2206_v6 }
0x12bb   :  { %5832 = vrsqrt.f32 %v2208_v46 }
0x12c8   :  { %v5833_v7 = vpop.eup %5832 }
0x12c9   :  { %v2212_v9 = vmul.f32 %v5833_v7, %v2196_v15 }
0x12cb   :  { %v2220_v10 = vmul.f32 %v5177_v40, %v2212_v9 }
0x12cd   :  { %v2228_v11 = vadd.f32 %v5178_v63, %v2220_v10 }
0x12cf   :  { %5563 = vmatmul.mubr.msk.f32.vlgmr.msra.gmra.mxu0 %vm82_vm0, %v2228_v11 }
0x138f   :  { %v5564_v22 = vpop.f32.mrf.mxu0 }
0x1390   :  { %v2318_v23 = vadd.f32 %v5564_v22, %v5179_v21  ;;  %v5192_v22 = vld [vmem:[%s6868_s4 + $0x1] ss:$0 sm:$0xff]  ;;  %s6876_s4 = smov 64  }
0x1391   :  { %v2312_v24 = vpop.f32.mrf.mxu0 }
0x1392   :  { %v2324_v25 = vmul.f32 0.044715, %v2318_v23  ;;  %v2313_v26 = vadd.f32 %v5179_v21, %v2312_v24  ;;  %v2322_v42 = vmul.f32 0.5, %v2318_v23 }
0x1394   :  { %v2326_v27 = vmul.f32 %v2324_v25, %v2318_v23  ;;  %v2323_v28 = vmul.f32 0.044715, %v2313_v26  ;;  %v2321_v39 = vmul.f32 0.5, %v2313_v26 }
0x1396   :  { %v2328_v44 = vmul.f32 %v2326_v27, %v2318_v23  ;;  %v2325_v29 = vmul.f32 %v2323_v28, %v2313_v26 }
0x1398   :  { %v2330_v30 = vadd.f32 %v2328_v44, %v2318_v23  ;;  %v2327_v31 = vmul.f32 %v2325_v29, %v2313_v26 }
0x139a   :  { %v2332_v32 = vmul.f32 0.7978846, %v2330_v30  ;;  %v2329_v33 = vadd.f32 %v2327_v31, %v2313_v26 }
0x139c   :  { %5834 = vtanh.f32 %v2332_v32  ;;  %v2331_v35 = vmul.f32 0.7978846, %v2329_v33 }
0x139e   :  { %5836 = vtanh.f32 %v2331_v35 }
0x13a9   :  { %v5835_v37 = vpop.eup %5834 }
0x13aa   :  { %v2336_v38 = vadd.f32 1.0, %v5835_v37 }
0x13ab   :  { %v5837_v34 = vpop.eup %5836 }
0x13ac   :  { %v2335_v36 = vadd.f32 1.0, %v5837_v34  ;;  %v2338_v45 = vmul.f32 %v2336_v38, %v2322_v42 }
0x13ae   :  { %v2337_v43 = vmul.f32 %v2335_v36, %v2321_v39 }
0x13b0   :  { %5581 = vmatprep.mubr.msk.f32.mxu1 %vm2354_vm3, %v2337_v43 }
0x13b1   :  { %5582 = vmatmul.mubr.msk.f32.vlgmr.msra.gmra.mxu1 %vm2354_vm3, %v2338_v45 }
0x13b2   :  { %5602 = vmatprep.mubr.msk.f32.mxu1 %vm5942_vm1, %v5941_v41 }
0x1471   :  { %v5583_v48 = vpop.f32.mrf.mxu1 }
0x1472   :  { %v2433_v50 = vadd.f32 %v5583_v48, %v5182_v47 }
0x1473   :  { %v2427_v52 = vpop.f32.mrf.mxu1 }
0x1474   :  { %v2428_v53 = vadd.f32 %v5182_v47, %v2427_v52  ;;  %v2437_v54 = vadd.f32 %v2433_v50, %v2228_v11 }
0x1476   :  { %v2443_v55 = vsel %vm82_vm0, %v2437_v54, 0.0  ;;  %v2436_v15 = vadd.f32 %v2428_v53, %v6365_v1  ;;  %v5190_v1 = vld [vmem:[%s6865_s8 + $0x38] sm:$0xff]  ;;  %s6881_s8 = smov 40  }
0x1477   :  { %2444 = vadd.xlane.f32.xlu1 %v2443_v55  ;;  %5584 = vmatprep.subr.mxu0 %v5190_v1 }
0x1478   :  { %v2440_v56 = vsel %vm82_vm0, %v2436_v15, 0.0  ;;  %5585 = vmatpush3.msra.mxu0 %v5190_v1 }
0x1479   :  { %2441 = vadd.xlane.f32.xlu0 %v2440_v56  ;;  %5586 = vmatprep.subr.mxu0 %v5189_v2 }
0x147a   :  { %5587 = vmatpush3.msra.mxu0 %v5189_v2 }
0x147b   :  { %5588 = vmatprep.subr.mxu0 %v5188_v3 }
0x147c   :  { %5589 = vmatpush3.msra.mxu0 %v5188_v3 }
0x147d   :  { %5590 = vmatprep.subr.mxu0 %v5187_v4 }
0x147e   :  { %5591 = vmatpush3.msra.mxu0 %v5187_v4 }
0x147f   :  { %5595 = vmatprep.subr.mxu0 %v5941_v41 }
0x1500   :  { %v2445_v57 = vpop.xlane.xlu1 %2444 }
0x1501   :  { %v2447_v58 = vmul.f32 0.03125, %v2445_v57 }
0x1502   :  { %v2442_v59 = vpop.xlane.xlu0 %2441 }
0x1503   :  { %v2446_v60 = vmul.f32 0.03125, %v2442_v59  ;;  %v2449_v61 = vsub.f32 %v2437_v54, %v2447_v58 }
0x1505   :  { %v2448_v40 = vsub.f32 %v2436_v15, %v2446_v60  ;;  %v2451_v0 = vmul.f32 %v2449_v61, %v2449_v61 }
0x1507   :  { %v2450_v62 = vmul.f32 %v2448_v40, %v2448_v40  ;;  %v2455_v49 = vsel %vm82_vm0, %v2451_v0, 0.0 }
0x1509   :  { %v2452_v63 = vsel %vm82_vm0, %v2450_v62, 0.0 }
0x150a   :  { %2453 = vadd.xlane.f32.xlu1 %v2452_v63 }
0x150e   :  { %2456 = vadd.xlane.f32.xlu1 %v2455_v49 }
0x1593   :  { %v2454_v5 = vpop.xlane.xlu1 %2453 }
0x1594   :  { %v2458_v6 = vmul.f32 0.03125, %v2454_v5 }
0x1596   :  { %v2460_v46 = vadd.f32 1e-12, %v2458_v6 }
0x1597   :  { %v2457_v7 = vpop.xlane.xlu1 %2456 }
0x1598   :  { %5838 = vrsqrt.f32 %v2460_v46  ;;  %v2459_v9 = vmul.f32 0.03125, %v2457_v7 }
0x159a   :  { %v2461_v10 = vadd.f32 1e-12, %v2459_v9 }
0x159c   :  { %5840 = vrsqrt.f32 %v2461_v10 }
0x15a5   :  { %v5839_v11 = vpop.eup %5838 }
0x15a6   :  { %v2464_v14 = vmul.f32 %v5839_v11, %v2448_v40  ;;  %v6506_v40 = vld [vmem:[%s6870_s25 + $0x28] sm:$0xff]  ;;  %v5894_v11 = vld [vmem:[%s6869_s6] ss:$0 sm:$0xff] }
0x15a8   :  { %v2472_v17 = vmul.f32 %v5185_v13, %v2464_v14 }
0x15a9   :  { %v5841_v18 = vpop.eup %5840 }
0x15aa   :  { %v2465_v19 = vmul.f32 %v5841_v18, %v2449_v61  ;;  %v6441_v20 = vadd.f32 %v5186_v16, %v2472_v17  ;;  %v6500_v61 = vld [vmem:[%s6870_s25 + $0x20] sm:$0xff] }
0x15ac   :  { %v2473_v8 = vmul.f32 %v5185_v13, %v2465_v19  ;;  %5592 = vmatprep.mubr.msk.f32.mxu0 %vm82_vm0, %v6441_v20 }
0x15ae   :  { %v6445_v21 = vadd.f32 %v5186_v16, %v2473_v8 }
0x15b0   :  { %5593 = vmatmul.mubr.msk.f32.vlgmr.msra.gmra.mxu0 %vm82_vm0, %v6445_v21 }
0x15b1   :  { %5597 = vmatprep.mubr.msk.f32.mxu0 %vm5942_vm1, %v5941_v41 }
0x1670   :  { %v5594_v23 = vpop.f32.mrf.mxu0 }
0x1671   :  { %v6454_v24 = vadd.f32 %v5594_v23, %v5192_v22 }
0x1672   :  { %v2567_v25 = vpop.f32.mrf.mxu0 }
0x1673   :  { %v6456_v26 = vadd.f32 %v5192_v22, %v2567_v25 }
0x1675   :  { %2754 = vrot.lane.b32.xlu0 %v6456_v26, %s6873_s0  ;;  %2583 = vrot.lane.b32.xlu1 %v6456_v26, %s6874_s7 }
0x1679   :  { %2756 = vrot.lane.b32.xlu1 %v6456_v26, %s6875_s27 }
0x16e7   :  { %v2584_v27 = vpop.permute.xlu1 %2583  ;;  %v2755_v44 = vpop.permute.xlu0 %2754 }
0x16e8   :  { %5596 = vmatpush3.xpose.msk.msra.mxu0 %vm240_vm2, %v2584_v27 }
0x16e9   :  { %5605 = vmatprep.subr.mxu0 %v5941_v41 }
0x16eb   :  { %5598 = vmatmul.mubr.msk.f32.vlgmr.msra.gmra.mxu0 %vm240_vm2, %v6456_v26  ;;  %v2757_v28 = vpop.permute.xlu1 %2756 }
0x16ec   :  { %5606 = vmatpush3.xpose.msk.msra.mxu0 %vm240_vm2, %v2757_v28  ;;  %5607 = vmatprep.mubr.msk.f32.mxu0 %vm5942_vm1, %v5941_v41 }
0x16ed   :  { %5615 = vmatprep.subr.mxu0 %v5941_v41 }
0x16ef   :  { %5608 = vmatmul.mubr.msk.f32.vlgmr.msra.gmra.mxu0 %vm240_vm2, %v2755_v44 }
0x16f0   :  { %5617 = vmatprep.mubr.msk.f32.mxu0 %vm5942_vm1, %v5941_v41  ;;  %5616 = vmatpush3.msra.mxu0 %v6506_v40 }
0x16f1   :  { %5625 = vmatprep.subr.mxu0 %v5941_v41 }
0x17ab   :  { %v2655_v29 = vpop.f32.mrf.mxu0 }
0x17ac   :  { %v2659_v30 = vmul.f32 0.35355338, %v2655_v29  ;;  %v6547_v29 = vld [vmem:[%s6870_s25 + $0x30] sm:$0xff] }
0x17ad   :  { %v5599_v31 = vpop.f32.mrf.mxu0 }
0x17ae   :  { %v2666_v32 = vadd.f32 %v6158_v51, %v2659_v30 }
0x17af   :  { %v2828_v33 = vpop.f32.mrf.mxu0 }
0x17b0   :  { %v2832_v35 = vmul.f32 0.35355338, %v2828_v33  ;;  %v2667_v37 = vsel %vm240_vm2, %v2666_v32, -inf }
0x17b1   :  { %2668 = vmax.xlane.f32.xlu1 %v2667_v37  ;;  %v5609_v34 = vpop.f32.mrf.mxu0 }
0x17b2   :  { %v2833_v38 = vadd.f32 %v6158_v51, %v2832_v35 }
0x17b4   :  { %v2834_v39 = vsel %vm240_vm2, %v2833_v38, -inf }
0x17b5   :  { %2835 = vmax.xlane.f32.xlu0 %v2834_v39 }
0x17cb   :  { %2845 = vrot.lane.b32.xlu0 %v6456_v26, %s5946_s2 }
0x183a   :  { %v2669_v36 = vpop.xlane.xlu1 %2668 }
0x183b   :  { %v2670_v42 = vsub.f32 %v2666_v32, %v2669_v36 }
0x183d   :  { %v2671_v43 = vmul.f32 1.442695, %v2670_v42 }
0x183e   :  { %v2836_v45 = vpop.xlane.xlu0 %2835 }
0x183f   :  { %5842 = vpow2.f32 %v2671_v43  ;;  %v2837_v47 = vsub.f32 %v2833_v38, %v2836_v45 }
0x1841   :  { %v2838_v48 = vmul.f32 1.442695, %v2837_v47 }
0x1842   :  { %v2846_v58 = vpop.permute.xlu0 %2845 }
0x1843   :  { %5844 = vpow2.f32 %v2838_v48 }
0x184c   :  { %v5843_v50 = vpop.eup %5842 }
0x184d   :  { %v2673_v52 = vsel %vm240_vm2, %v5843_v50, 0.0 }
0x184e   :  { %2674 = vadd.xlane.f32.xlu1 %v2673_v52 }
0x1850   :  { %v5845_v53 = vpop.eup %5844 }
0x1851   :  { %v2840_v51 = vsel %vm240_vm2, %v5845_v53, 0.0 }
0x1852   :  { %2841 = vadd.xlane.f32.xlu1 %v2840_v51 }
0x1863   :  { %2678 = vrot.lane.b32.xlu1 %v6456_v26, %s6876_s4 }
0x1867   :  { %3069 = vrot.lane.b32.xlu1 %v6456_v26, %s6877_s5 }
0x186b   :  { %3067 = vrot.lane.b32.xlu1 %v6456_v26, %s6878_s26 }
0x18d7   :  { %v2675_v54 = vpop.xlane.xlu1 %2674 }
0x18d8   :  { %5846 = vrcp.f32 %v2675_v54 }
0x18db   :  { %v2842_v55 = vpop.xlane.xlu1 %2841 }
0x18dc   :  { %5848 = vrcp.f32 %v2842_v55 }
0x18df   :  { %v2679_v15 = vpop.permute.xlu1 %2678 }
0x18e0   :  { %5601 = vmatpush3.msra.mxu1 %v2679_v15  ;;  %v6582_v15 = vld [vmem:[%s6870_s25 + $0x38] sm:$0xff] }
0x18e1   :  { %5610 = vmatprep.subr.mxu1 %v5941_v41 }
0x18e3   :  { %v3070_v63 = vpop.permute.xlu1 %3069 }
0x18e5   :  { %v5847_v56 = vpop.eup %5846 }
0x18e6   :  { %v2677_v57 = vmul.f32 %v5847_v56, %v5843_v50 }
0x18e7   :  { %v3068_v2 = vpop.permute.xlu1 %3067 }
0x18e8   :  { %5603 = vmatmul.mubr.msk.f32.vlgmr.msra.gmra.mxu1 %vm240_vm2, %v2677_v57 }
0x18e9   :  { %v5849_v59 = vpop.eup %5848  ;;  %5611 = vmatpush3.msra.mxu1 %v2846_v58  ;;  %5612 = vmatprep.mubr.msk.f32.mxu1 %vm5942_vm1, %v5941_v41 }
0x18ea   :  { %v2844_v60 = vmul.f32 %v5849_v59, %v5845_v53  ;;  %5620 = vmatprep.subr.mxu1 %v5941_v41 }
0x18ec   :  { %5613 = vmatmul.mubr.msk.f32.vlgmr.msra.gmra.mxu1 %vm240_vm2, %v2844_v60 }
0x18ed   :  { %5622 = vmatprep.mubr.msk.f32.mxu1 %vm5942_vm1, %v5941_v41  ;;  %5621 = vmatpush3.msra.mxu1 %v6500_v61 }
0x18ee   :  { %5630 = vmatprep.subr.mxu1 %v5941_v41 }
0x19a8   :  { %v2750_v62 = vpop.f32.mrf.mxu1 }
0x19a9   :  { %5623 = vmatmul.mubr.msk.f32.vlgmr.msra.gmra.mxu1 %vm240_vm2, %v2750_v62 }
0x19aa   :  { %v5604_v0 = vpop.f32.mrf.mxu1  ;;  %5632 = vmatprep.mubr.msk.f32.mxu1 %vm5942_vm1, %v5941_v41 }
0x19ac   :  { %v2917_v49 = vpop.f32.mrf.mxu1 }
0x19ad   :  { %5618 = vmatmul.mubr.msk.f32.vlgmr.msra.gmra.mxu0 %vm240_vm2, %v2917_v49 }
0x19ae   :  { %5626 = vmatpush3.xpose.msk.msra.mxu0 %vm240_vm2, %v3070_v63  ;;  %v5614_v1 = vpop.f32.mrf.mxu1  ;;  %5627 = vmatprep.mubr.msk.f32.mxu0 %vm5942_vm1, %v5941_v41 }
0x19af   :  { %5635 = vmatprep.subr.mxu0 %v5941_v41 }
0x19b1   :  { %5628 = vmatmul.mubr.msk.f32.vlgmr.msra.gmra.mxu0 %vm240_vm2, %v3068_v2 }
0x19b2   :  { %5637 = vmatprep.mubr.msk.f32.mxu0 %vm5942_vm1, %v5941_v41  ;;  %5636 = vmatpush3.msra.mxu0 %v6547_v29 }
0x19b3   :  { %5645 = vmatprep.subr.mxu0 %v5941_v41 }
0x1a69   :  { %v3063_v3 = vpop.f32.mrf.mxu1 }
0x1a6b   :  { %v5624_v4 = vpop.f32.mrf.mxu1 }
0x1a6d   :  { %v2990_v5 = vpop.f32.mrf.mxu0 }
0x1a6e   :  { %v3064_v6 = vadd.f32 %v3063_v3, %v2990_v5 }
0x1a6f   :  { %v5619_v46 = vpop.f32.mrf.mxu0 }
0x1a71   :  { %v3141_v7 = vpop.f32.mrf.mxu0 }
0x1a72   :  { %v3145_v9 = vmul.f32 0.35355338, %v3141_v7 }
0x1a73   :  { %v5629_v10 = vpop.f32.mrf.mxu0 }
0x1a74   :  { %v3146_v13 = vadd.f32 %v5894_v11, %v3145_v9 }
0x1a76   :  { %v3147_v14 = vsel %vm240_vm2, %v3146_v13, -inf }
0x1a77   :  { %3148 = vmax.xlane.f32.xlu1 %v3147_v14 }
0x1a88   :  { %3310 = vrot.lane.b32.xlu1 %v6456_v26, %s6879_s30 }
0x1a8c   :  { %3308 = vrot.lane.b32.xlu1 %v6456_v26, %s6880_s29 }
0x1a90   :  { %3551 = vrot.lane.b32.xlu1 %v6454_v24, %s6874_s7 }
0x1b00   :  { %v3149_v16 = vpop.xlane.xlu1 %3148 }
0x1b01   :  { %v3150_v17 = vsub.f32 %v3146_v13, %v3149_v16 }
0x1b03   :  { %v3151_v18 = vmul.f32 1.442695, %v3150_v17 }
0x1b04   :  { %v3311_v27 = vpop.permute.xlu1 %3310 }
0x1b05   :  { %5850 = vpow2.f32 %v3151_v18 }
0x1b08   :  { %v3309_v44 = vpop.permute.xlu1 %3308 }
0x1b0c   :  { %v3552_v50 = vpop.permute.xlu1 %3551 }
0x1b12   :  { %v5851_v19 = vpop.eup %5850 }
0x1b13   :  { %v3153_v8 = vsel %vm240_vm2, %v5851_v19, 0.0 }
0x1b14   :  { %3154 = vadd.xlane.f32.xlu0 %v3153_v8 }
0x1b2a   :  { %3158 = vrot.lane.b32.xlu0 %v6456_v26, %s6871_s1 }
0x1b9d   :  { %v3155_v22 = vpop.xlane.xlu0 %3154 }
0x1b9e   :  { %5852 = vrcp.f32 %v3155_v22 }
0x1ba1   :  { %v3159_v23 = vpop.permute.xlu0 %3158 }
0x1ba2   :  { %5631 = vmatpush3.msra.mxu1 %v3159_v23 }
0x1ba3   :  { %5640 = vmatprep.subr.mxu1 %v5941_v41 }
0x1bab   :  { %v5853_v25 = vpop.eup %5852 }
0x1bac   :  { %v3157_v28 = vmul.f32 %v5853_v25, %v5851_v19 }
0x1bae   :  { %5633 = vmatmul.mubr.msk.f32.vlgmr.msra.gmra.mxu1 %vm240_vm2, %v3157_v28 }
0x1baf   :  { %5641 = vmatpush3.xpose.msk.msra.mxu1 %vm240_vm2, %v3311_v27  ;;  %5642 = vmatprep.mubr.msk.f32.mxu1 %vm5942_vm1, %v5941_v41 }
0x1bb0   :  { %5650 = vmatprep.subr.mxu1 %v5941_v41 }
0x1bb2   :  { %5643 = vmatmul.mubr.msk.f32.vlgmr.msra.gmra.mxu1 %vm240_vm2, %v3309_v44 }
0x1bb3   :  { %5652 = vmatprep.mubr.msk.f32.mxu1 %vm5942_vm1, %v5941_v41  ;;  %5651 = vmatpush3.msra.mxu1 %v6582_v15 }
0x1bb4   :  { %5660 = vmatprep.subr.mxu1 %v5941_v41 }
0x1c6e   :  { %v3230_v30 = vpop.f32.mrf.mxu1 }
0x1c6f   :  { %5638 = vmatmul.mubr.msk.f32.vlgmr.msra.gmra.mxu0 %vm240_vm2, %v3230_v30 }
0x1c70   :  { %v5634_v31 = vpop.f32.mrf.mxu1  ;;  %5647 = vmatprep.mubr.msk.f32.mxu0 %vm5942_vm1, %v5941_v41 }
0x1c72   :  { %v3382_v32 = vpop.f32.mrf.mxu1 }
0x1c73   :  { %v3386_v33 = vmul.f32 0.35355338, %v3382_v32 }
0x1c74   :  { %v5644_v35 = vpop.f32.mrf.mxu1 }
0x1c75   :  { %v3387_v37 = vadd.f32 %v5894_v11, %v3386_v33 }
0x1c77   :  { %v3388_v34 = vsel %vm240_vm2, %v3387_v37, -inf }
0x1c78   :  { %3389 = vmax.xlane.f32.xlu0 %v3388_v34 }
0x1c8e   :  { %3399 = vrot.lane.b32.xlu0 %v6456_v26, %s6881_s8 }
0x1c92   :  { %3724 = vrot.lane.b32.xlu0 %v6454_v24, %s6875_s27 }
0x1d01   :  { %v3390_v38 = vpop.xlane.xlu0 %3389 }
0x1d02   :  { %v3391_v39 = vsub.f32 %v3387_v37, %v3390_v38 }
0x1d04   :  { %v3392_v36 = vmul.f32 1.442695, %v3391_v39 }
0x1d05   :  { %v3400_v42 = vpop.permute.xlu0 %3399 }
0x1d06   :  { %5854 = vpow2.f32 %v3392_v36  ;;  %5646 = vmatpush3.msra.mxu0 %v3400_v42 }
0x1d07   :  { %5655 = vmatprep.subr.mxu0 %v5941_v41 }
0x1d09   :  { %v3725_v54 = vpop.permute.xlu0 %3724 }
0x1d13   :  { %v5855_v43 = vpop.eup %5854 }
0x1d14   :  { %v3394_v45 = vsel %vm240_vm2, %v5855_v43, 0.0 }
0x1d15   :  { %3395 = vadd.xlane.f32.xlu1 %v3394_v45 }
0x1d26   :  { %3722 = vrot.lane.b32.xlu1 %v6454_v24, %s6873_s0 }
0x1d2f   :  { %v3303_v47 = vpop.f32.mrf.mxu0 }
0x1d30   :  { %v3307_v26 = vadd.f32 %v3303_v47, %v3064_v6 }
0x1d31   :  { %v5639_v48 = vpop.f32.mrf.mxu0 }
0x1d9e   :  { %v3396_v52 = vpop.xlane.xlu1 %3395 }
0x1d9f   :  { %5856 = vrcp.f32 %v3396_v52 }
0x1da2   :  { %v3723_v55 = vpop.permute.xlu1 %3722 }
0x1dac   :  { %v5857_v53 = vpop.eup %5856 }
0x1dad   :  { %v3398_v51 = vmul.f32 %v5857_v53, %v5855_v43  ;;  %v5895_v43 = vld [vmem:[%s6869_s6 + $0x1] ss:$0 sm:$0xff] }
0x1daf   :  { %5648 = vmatmul.mubr.msk.f32.vlgmr.msra.gmra.mxu0 %vm240_vm2, %v3398_v51 }
0x1db0   :  { %5656 = vmatpush3.xpose.msk.msra.mxu0 %vm240_vm2, %v3552_v50  ;;  %5657 = vmatprep.mubr.msk.f32.mxu0 %vm5942_vm1, %v5941_v41 }
0x1db1   :  { %5665 = vmatprep.subr.mxu0 %v5941_v41 }
0x1db3   :  { %5658 = vmatmul.mubr.msk.f32.vlgmr.msra.gmra.mxu0 %vm240_vm2, %v6454_v24 }
0x1db4   :  { %5666 = vmatpush3.xpose.msk.msra.mxu0 %vm240_vm2, %v3725_v54  ;;  %5667 = vmatprep.mubr.msk.f32.mxu0 %vm5942_vm1, %v5941_v41 }
0x1db5   :  { %5675 = vmatprep.subr.mxu0 %v5941_v41 }
0x1db7   :  { %5668 = vmatmul.mubr.msk.f32.vlgmr.msra.gmra.mxu0 %vm240_vm2, %v3723_v55 }
0x1db8   :  { %5676 = vmatpush3.msra.mxu0 %v6506_v40  ;;  %5677 = vmatprep.mubr.msk.f32.mxu0 %vm5942_vm1, %v5941_v41 }
0x1db9   :  { %5685 = vmatprep.subr.mxu0 %v5941_v41 }
0x1e6f   :  { %v3471_v56 = vpop.f32.mrf.mxu0 }
0x1e70   :  { %5653 = vmatmul.mubr.msk.f32.vlgmr.msra.gmra.mxu1 %vm240_vm2, %v3471_v56 }
0x1e71   :  { %v5649_v57 = vpop.f32.mrf.mxu0  ;;  %5662 = vmatprep.mubr.msk.f32.mxu1 %vm5942_vm1, %v5941_v41 }
0x1e73   :  { %v3623_v58 = vpop.f32.mrf.mxu0 }
0x1e74   :  { %v3627_v59 = vmul.f32 0.35355338, %v3623_v58 }
0x1e75   :  { %v5659_v60 = vpop.f32.mrf.mxu0 }
0x1e76   :  { %v3634_v40 = vadd.f32 %v6278_v12, %v3627_v59  ;;  %v5235_v59 = vld [vmem:[%s6872_s28 + $0x1] ss:$0 sm:$0xff] }
0x1e77   :  { %v3796_v62 = vpop.f32.mrf.mxu0 }
0x1e78   :  { %v3800_v63 = vmul.f32 0.35355338, %v3796_v62  ;;  %v3635_v0 = vsel %vm240_vm2, %v3634_v40, -inf }
0x1e79   :  { %3636 = vmax.xlane.f32.xlu0 %v3635_v0  ;;  %v5669_v49 = vpop.f32.mrf.mxu0 }
0x1e7a   :  { %v3801_v1 = vadd.f32 %v6278_v12, %v3800_v63 }
0x1e7c   :  { %v3802_v2 = vsel %vm240_vm2, %v3801_v1, -inf }
0x1e7d   :  { %3803 = vmax.xlane.f32.xlu1 %v3802_v2 }
0x1e8e   :  { %3646 = vrot.lane.b32.xlu1 %v6454_v24, %s6876_s4 }
0x1e92   :  { %4037 = vrot.lane.b32.xlu1 %v6454_v24, %s6877_s5 }
0x1e96   :  { %4035 = vrot.lane.b32.xlu1 %v6454_v24, %s6878_s26 }
0x1f02   :  { %v3637_v3 = vpop.xlane.xlu0 %3636 }
0x1f03   :  { %v3638_v4 = vsub.f32 %v3634_v40, %v3637_v3 }
0x1f05   :  { %v3639_v5 = vmul.f32 1.442695, %v3638_v4 }
0x1f06   :  { %v3804_v6 = vpop.xlane.xlu1 %3803 }
0x1f07   :  { %5858 = vpow2.f32 %v3639_v5  ;;  %v3805_v46 = vsub.f32 %v3801_v1, %v3804_v6 }
0x1f09   :  { %v3806_v7 = vmul.f32 1.442695, %v3805_v46 }
0x1f0a   :  { %v3647_v12 = vpop.permute.xlu1 %3646 }
0x1f0b   :  { %5860 = vpow2.f32 %v3806_v7  ;;  %5661 = vmatpush3.msra.mxu1 %v3647_v12 }
0x1f0c   :  { %5670 = vmatprep.subr.mxu1 %v5941_v41 }
0x1f0e   :  { %v4038_v44 = vpop.permute.xlu1 %4037 }
0x1f14   :  { %v5859_v9 = vpop.eup %5858 }
0x1f15   :  { %v3641_v10 = vsel %vm240_vm2, %v5859_v9, 0.0 }
0x1f16   :  { %3642 = vadd.xlane.f32.xlu0 %v3641_v10 }
0x1f18   :  { %v5861_v11 = vpop.eup %5860 }
0x1f19   :  { %v3808_v13 = vsel %vm240_vm2, %v5861_v11, 0.0 }
0x1f1a   :  { %3809 = vadd.xlane.f32.xlu0 %v3808_v13 }
0x1f30   :  { %v3544_v14 = vpop.f32.mrf.mxu1  ;;  %3813 = vrot.lane.b32.xlu0 %v6454_v24, %s5946_s2 }
0x1f31   :  { %v6604_v16 = vadd.f32 %v3544_v14, %v3307_v26 }
0x1f32   :  { %v5654_v17 = vpop.f32.mrf.mxu1 }
0x1f33   :  { %v4525_v62 = vadd.f32 %v5235_v59, %v6604_v16 }
0x1f35   :  { %v4527_v1 = vadd.f32 %v4525_v62, %v6441_v20  ;;  %v5249_v62 = vld [vmem:[%s6815_s13 + $0x48] sm:$0xff] }
0x1f37   :  { %v4533_v2 = vsel %vm82_vm0, %v4527_v1, 0.0 }
0x1f9f   :  { %v3643_v18 = vpop.xlane.xlu0 %3642 }
0x1fa0   :  { %5862 = vrcp.f32 %v3643_v18 }
0x1fa3   :  { %v3810_v19 = vpop.xlane.xlu0 %3809 }
0x1fa4   :  { %5864 = vrcp.f32 %v3810_v19 }
0x1fa7   :  { %v3814_v23 = vpop.permute.xlu0 %3813 }
0x1fad   :  { %v5863_v8 = vpop.eup %5862 }
0x1fae   :  { %v3645_v22 = vmul.f32 %v5863_v8, %v5859_v9 }
0x1fb0   :  { %5663 = vmatmul.mubr.msk.f32.vlgmr.msra.gmra.mxu1 %vm240_vm2, %v3645_v22 }
0x1fb1   :  { %v5865_v25 = vpop.eup %5864  ;;  %5671 = vmatpush3.msra.mxu1 %v3814_v23  ;;  %5672 = vmatprep.mubr.msk.f32.mxu1 %vm5942_vm1, %v5941_v41 }
0x1fb2   :  { %v3812_v27 = vmul.f32 %v5865_v25, %v5861_v11  ;;  %5680 = vmatprep.subr.mxu1 %v5941_v41 }
0x1fb4   :  { %5673 = vmatmul.mubr.msk.f32.vlgmr.msra.gmra.mxu1 %vm240_vm2, %v3812_v27 }
0x1fb5   :  { %5681 = vmatpush3.msra.mxu1 %v6500_v61  ;;  %5682 = vmatprep.mubr.msk.f32.mxu1 %vm5942_vm1, %v5941_v41  ;;  %v4036_v61 = vpop.permute.xlu1 %4035 }
0x1fb6   :  { %5690 = vmatprep.subr.mxu1 %v5941_v41 }
0x2070   :  { %v3718_v28 = vpop.f32.mrf.mxu1 }
0x2071   :  { %5683 = vmatmul.mubr.msk.f32.vlgmr.msra.gmra.mxu1 %vm240_vm2, %v3718_v28 }
0x2072   :  { %v5664_v30 = vpop.f32.mrf.mxu1  ;;  %5692 = vmatprep.mubr.msk.f32.mxu1 %vm5942_vm1, %v5941_v41 }
0x2074   :  { %v3885_v31 = vpop.f32.mrf.mxu1 }
0x2075   :  { %5678 = vmatmul.mubr.msk.f32.vlgmr.msra.gmra.mxu0 %vm240_vm2, %v3885_v31 }
0x2076   :  { %5686 = vmatpush3.xpose.msk.msra.mxu0 %vm240_vm2, %v4038_v44  ;;  %v5674_v32 = vpop.f32.mrf.mxu1  ;;  %5687 = vmatprep.mubr.msk.f32.mxu0 %vm5942_vm1, %v5941_v41 }
0x2077   :  { %5695 = vmatprep.subr.mxu0 %v5941_v41 }
0x2079   :  { %5688 = vmatmul.mubr.msk.f32.vlgmr.msra.gmra.mxu0 %vm240_vm2, %v4036_v61 }
0x207a   :  { %5696 = vmatpush3.msra.mxu0 %v6547_v29  ;;  %5697 = vmatprep.mubr.msk.f32.mxu0 %vm5942_vm1, %v5941_v41 }
0x207b   :  { %5705 = vmatprep.subr.mxu0 %v5941_v41 }
0x2131   :  { %v4031_v33 = vpop.f32.mrf.mxu1 }
0x2133   :  { %v5684_v35 = vpop.f32.mrf.mxu1 }
0x2135   :  { %v3958_v37 = vpop.f32.mrf.mxu0 }
0x2136   :  { %v4032_v34 = vadd.f32 %v4031_v33, %v3958_v37 }
0x2137   :  { %v5679_v38 = vpop.f32.mrf.mxu0 }
0x2139   :  { %v4109_v39 = vpop.f32.mrf.mxu0 }
0x213a   :  { %v4113_v36 = vmul.f32 0.35355338, %v4109_v39 }
0x213b   :  { %v5689_v42 = vpop.f32.mrf.mxu0 }
0x213c   :  { %v4114_v45 = vadd.f32 %v5895_v43, %v4113_v36  ;;  %v5239_v36 = vld [vmem:[%s6812_s10 + $0x1] ss:$0 sm:$0xff] }
0x213e   :  { %v4115_v29 = vsel %vm240_vm2, %v4114_v45, -inf }
0x213f   :  { %4116 = vmax.xlane.f32.xlu0 %v4115_v29  ;;  %v5242_v29 = vld [vmem:[%s6813_s11 + $0x30] sm:$0xff] }
0x2155   :  { %4126 = vrot.lane.b32.xlu0 %v6454_v24, %s6871_s1 }
0x2159   :  { %4276 = vrot.lane.b32.xlu0 %v6454_v24, %s6880_s29 }
0x21c8   :  { %v4117_v47 = vpop.xlane.xlu0 %4116 }
0x21c9   :  { %v4118_v26 = vsub.f32 %v4114_v45, %v4117_v47  ;;  %v5243_v45 = vld [vmem:[%s6813_s11 + $0x38] sm:$0xff]  ;;  %v5241_v47 = vld [vmem:[%s6813_s11 + $0x28] sm:$0xff] }
0x21cb   :  { %v4119_v48 = vmul.f32 1.442695, %v4118_v26  ;;  %v5240_v26 = vld [vmem:[%s6813_s11 + $0x20] sm:$0xff] }
0x21cc   :  { %v4127_v50 = vpop.permute.xlu0 %4126 }
0x21cd   :  { %5866 = vpow2.f32 %v4119_v48  ;;  %5691 = vmatpush3.msra.mxu1 %v4127_v50 }
0x21ce   :  { %5700 = vmatprep.subr.mxu1 %v5941_v41 }
0x21d0   :  { %v4277_v57 = vpop.permute.xlu0 %4276 }
0x21da   :  { %v5867_v52 = vpop.eup %5866 }
0x21db   :  { %v4121_v53 = vsel %vm240_vm2, %v5867_v52, 0.0 }
0x21dc   :  { %4122 = vadd.xlane.f32.xlu1 %v4121_v53 }
0x21ed   :  { %4278 = vrot.lane.b32.xlu1 %v6454_v24, %s6879_s30 }
0x2265   :  { %v4123_v51 = vpop.xlane.xlu1 %4122 }
0x2266   :  { %5868 = vrcp.f32 %v4123_v51 }
0x2269   :  { %v4279_v56 = vpop.permute.xlu1 %4278 }
0x2273   :  { %v5869_v54 = vpop.eup %5868 }
0x2274   :  { %v4125_v55 = vmul.f32 %v5869_v54, %v5867_v52 }
0x2276   :  { %5693 = vmatmul.mubr.msk.f32.vlgmr.msra.gmra.mxu1 %vm240_vm2, %v4125_v55 }
0x2277   :  { %5701 = vmatpush3.xpose.msk.msra.mxu1 %vm240_vm2, %v4279_v56  ;;  %5702 = vmatprep.mubr.msk.f32.mxu1 %vm5942_vm1, %v5941_v41  ;;  %v5255_v56 = vld [vmem:[%s6815_s13 + $0x78] sm:$0xff] }
0x2278   :  { %5710 = vmatprep.subr.mxu1 %v5941_v41 }
0x227a   :  { %5703 = vmatmul.mubr.msk.f32.vlgmr.msra.gmra.mxu1 %vm240_vm2, %v4277_v57  ;;  %v5254_v57 = vld [vmem:[%s6815_s13 + $0x70] sm:$0xff] }
0x227b   :  { %5711 = vmatpush3.msra.mxu1 %v6582_v15  ;;  %5712 = vmatprep.mubr.msk.f32.mxu1 %vm5942_vm1, %v5941_v41 }
0x227c   :  { %5726 = vmatprep.subr.mxu1 %v5255_v56 }
0x2336   :  { %v4198_v58 = vpop.f32.mrf.mxu1 }
0x2337   :  { %5698 = vmatmul.mubr.msk.f32.vlgmr.msra.gmra.mxu0 %vm240_vm2, %v4198_v58  ;;  %v5253_v58 = vld [vmem:[%s6815_s13 + $0x68] sm:$0xff] }
0x2338   :  { %v5694_v60 = vpop.f32.mrf.mxu1  ;;  %5707 = vmatprep.mubr.msk.f32.mxu0 %vm5942_vm1, %v5941_v41 }
0x2339   :  { %v5251_v60 = vld [vmem:[%s6815_s13 + $0x58] sm:$0xff] }
0x233a   :  { %v4350_v40 = vpop.f32.mrf.mxu1 }
0x233b   :  { %v4354_v63 = vmul.f32 0.35355338, %v4350_v40  ;;  %v5250_v40 = vld [vmem:[%s6815_s13 + $0x50] sm:$0xff] }
0x233c   :  { %v5704_v0 = vpop.f32.mrf.mxu1 }
0x233d   :  { %v4355_v15 = vadd.f32 %v5895_v43, %v4354_v63  ;;  %v5248_v63 = vld [vmem:[%s6815_s13 + $0x40] sm:$0xff] }
0x233e   :  { %v5245_v0 = vld [vmem:[%s6814_s12 + $0x1] ss:$0 sm:$0xff] }
0x233f   :  { %v4356_v49 = vsel %vm240_vm2, %v4355_v15, -inf }
0x2340   :  { %4357 = vmax.xlane.f32.xlu1 %v4356_v49 }
0x2344   :  { %4534 = vadd.xlane.f32.xlu1 %v4533_v2 }
0x23c9   :  { %v4358_v3 = vpop.xlane.xlu1 %4357 }
0x23ca   :  { %v4359_v4 = vsub.f32 %v4355_v15, %v4358_v3 }
0x23cc   :  { %v4360_v5 = vmul.f32 1.442695, %v4359_v4 }
0x23cd   :  { %v4535_v17 = vpop.xlane.xlu1 %4534 }
0x23ce   :  { %5870 = vpow2.f32 %v4360_v5  ;;  %v4539_v18 = vmul.f32 0.03125, %v4535_v17 }
0x23d0   :  { %v4541_v22 = vsub.f32 %v4527_v1, %v4539_v18 }
0x23d2   :  { %v4543_v28 = vmul.f32 %v4541_v22, %v4541_v22 }
0x23d4   :  { %v4545_v44 = vsel %vm82_vm0, %v4543_v28, 0.0 }
0x23db   :  { %v5871_v6 = vpop.eup %5870 }
0x23dc   :  { %v4362_v46 = vsel %vm240_vm2, %v5871_v6, 0.0 }
0x23dd   :  { %4363 = vadd.xlane.f32.xlu0 %v4362_v46 }
0x23f3   :  { %4367 = vrot.lane.b32.xlu0 %v6454_v24, %s6881_s8 }
0x23f7   :  { %v4271_v7 = vpop.f32.mrf.mxu0 }
0x23f8   :  { %v4275_v12 = vadd.f32 %v4271_v7, %v4032_v34 }
0x23f9   :  { %v5699_v9 = vpop.f32.mrf.mxu0 }
0x2466   :  { %v4364_v10 = vpop.xlane.xlu0 %4363 }
0x2467   :  { %5872 = vrcp.f32 %v4364_v10 }
0x246a   :  { %v4368_v20 = vpop.permute.xlu0 %4367 }
0x246b   :  { %5706 = vmatpush3.msra.mxu0 %v4368_v20 }
0x246c   :  { %5715 = vmatprep.subr.mxu0 %v5243_v45 }
0x2474   :  { %v5873_v11 = vpop.eup %5872 }
0x2475   :  { %v4366_v13 = vmul.f32 %v5873_v11, %v5871_v6 }
0x2477   :  { %5708 = vmatmul.mubr.msk.f32.vlgmr.msra.gmra.mxu0 %vm240_vm2, %v4366_v13 }
0x2478   :  { %5716 = vmatpush3.msra.mxu0 %v5243_v45  ;;  %v4841_v45 = vld [vmem:[%s6819_s17 + $0x8] sm:$0xff] }
0x2479   :  { %5717 = vmatprep.subr.mxu0 %v5242_v29 }
0x247a   :  { %5718 = vmatpush3.msra.mxu0 %v5242_v29  ;;  %v4840_v29 = vld [vmem:[%s6819_s17] sm:$0xff] }
0x247b   :  { %5719 = vmatprep.subr.mxu0 %v5241_v47 }
0x247c   :  { %5720 = vmatpush3.msra.mxu0 %v5241_v47 }
0x247d   :  { %5721 = vmatprep.subr.mxu0 %v5240_v26 }
0x247e   :  { %5722 = vmatpush3.msra.mxu0 %v5240_v26 }
0x247f   :  { %5745 = vmatprep.subr.mxu0 %v5941_v41 }
0x2537   :  { %v4439_v14 = vpop.f32.mrf.mxu0 }
0x2538   :  { %5713 = vmatmul.mubr.msk.f32.vlgmr.msra.gmra.mxu1 %vm240_vm2, %v4439_v14 }
0x2539   :  { %v5709_v16 = vpop.f32.mrf.mxu0  ;;  %5727 = vmatpush3.msra.mxu1 %v5255_v56  ;;  %v5263_v56 = vld [vmem:[%s6818_s16 + $0x1] ss:$0 sm:$0xff] }
0x253a   :  { %5728 = vmatprep.subr.mxu1 %v5254_v57 }
0x253b   :  { %5729 = vmatpush3.msra.mxu1 %v5254_v57 }
0x253c   :  { %5730 = vmatprep.subr.mxu1 %v5253_v58 }
0x253d   :  { %5731 = vmatpush3.msra.mxu1 %v5253_v58 }
0x25f8   :  { %v4512_v19 = vpop.f32.mrf.mxu1 }
0x25f9   :  { %v4516_v8 = vadd.f32 %v4512_v19, %v4275_v12 }
0x25fa   :  { %v5714_v24 = vpop.f32.mrf.mxu1 }
0x25fb   :  { %v4526_v23 = vadd.f32 %v5235_v59, %v4516_v8  ;;  %v5252_v59 = vld [vmem:[%s6815_s13 + $0x60] sm:$0xff] }
0x25fc   :  { %5732 = vmatprep.subr.mxu1 %v5252_v59  ;;  %v5257_v24 = vld [vmem:[%s6816_s14 + $0x1] ss:$0 sm:$0xff] }
0x25fd   :  { %v4528_v25 = vadd.f32 %v4526_v23, %v6445_v21  ;;  %v5238_v21 = vld [vmem:[%s6811_s9 + $0x1] ss:$0 sm:$0xff]  ;;  %5733 = vmatpush3.msra.mxu1 %v5252_v59 }
0x25fe   :  { %5734 = vmatprep.subr.mxu1 %v5251_v60 }
0x25ff   :  { %v4536_v27 = vsel %vm82_vm0, %v4528_v25, 0.0  ;;  %5735 = vmatpush3.msra.mxu1 %v5251_v60 }
0x2600   :  { %4537 = vadd.xlane.f32.xlu1 %v4536_v27  ;;  %5736 = vmatprep.subr.mxu1 %v5250_v40 }
0x2601   :  { %5737 = vmatpush3.msra.mxu1 %v5250_v40 }
0x2602   :  { %5738 = vmatprep.subr.mxu1 %v5249_v62 }
0x2603   :  { %5739 = vmatpush3.msra.mxu1 %v5249_v62 }
0x2604   :  { %4546 = vadd.xlane.f32.xlu1 %v4545_v44  ;;  %5740 = vmatprep.subr.mxu1 %v5248_v63 }
0x2605   :  { %5741 = vmatpush3.msra.mxu1 %v5248_v63 }
0x2606   :  { %5767 = vmatprep.subr.mxu1 %v5941_v41 }
0x2689   :  { %v4538_v30 = vpop.xlane.xlu1 %4537 }
0x268a   :  { %v4540_v31 = vmul.f32 0.03125, %v4538_v30 }
0x268c   :  { %v4542_v32 = vsub.f32 %v4528_v25, %v4540_v31 }
0x268d   :  { %v4547_v61 = vpop.xlane.xlu1 %4546 }
0x268e   :  { %v4551_v33 = vmul.f32 0.03125, %v4547_v61  ;;  %v4544_v35 = vmul.f32 %v4542_v32, %v4542_v32 }
0x2690   :  { %v4553_v37 = vadd.f32 1e-12, %v4551_v33  ;;  %v4548_v34 = vsel %vm82_vm0, %v4544_v35, 0.0 }
0x2691   :  { %4549 = vadd.xlane.f32.xlu1 %v4548_v34 }
0x2692   :  { %5874 = vrsqrt.f32 %v4553_v37 }
0x269f   :  { %v5875_v38 = vpop.eup %5874 }
0x26a0   :  { %v4557_v39 = vmul.f32 %v5875_v38, %v4541_v22 }
0x26a2   :  { %v4565_v42 = vmul.f32 %v5238_v21, %v4557_v39 }
0x26a4   :  { %v6674_v43 = vadd.f32 %v5239_v36, %v4565_v42  ;;  %v4843_v42 = vld [vmem:[%s6819_s17 + $0x18] sm:$0xff] }
0x26a6   :  { %5723 = vmatprep.mubr.msk.f32.mxu0 %vm82_vm0, %v6674_v43 }
0x271a   :  { %v4550_v48 = vpop.xlane.xlu1 %4549 }
0x271b   :  { %v4552_v50 = vmul.f32 0.03125, %v4550_v48 }
0x271d   :  { %v4554_v52 = vadd.f32 1e-12, %v4552_v50 }
0x271f   :  { %5876 = vrsqrt.f32 %v4554_v52 }
0x272c   :  { %v5877_v53 = vpop.eup %5876 }
0x272d   :  { %v4558_v51 = vmul.f32 %v5877_v53, %v4542_v32 }
0x272f   :  { %v4566_v54 = vmul.f32 %v5238_v21, %v4558_v51 }
0x2731   :  { %v4574_v55 = vadd.f32 %v5239_v36, %v4566_v54  ;;  %v5262_v54 = vld [vmem:[%s6817_s15 + $0x1] ss:$0 sm:$0xff] }
0x2733   :  { %5724 = vmatmul.mubr.msk.f32.vlgmr.msra.gmra.mxu0 %vm82_vm0, %v4574_v55 }
0x2734   :  { %5753 = vmatprep.mubr.msk.f32.mxu0 %vm5942_vm1, %v5941_v41  ;;  %5746 = vmatpush3.msra.mxu0 %v4843_v42 }
0x2735   :  { %5747 = vmatprep.subr.mxu0 %v5941_v41 }
0x27f3   :  { %v5725_v15 = vpop.f32.mrf.mxu0 }
0x27f4   :  { %v4666_v49 = vadd.f32 %v5725_v15, %v5245_v0  ;;  %v4928_v15 = vld [vmem:[%s6821_s19 + $0x18] sm:$0xff] }
0x27f5   :  { %v4660_v1 = vpop.f32.mrf.mxu0 }
0x27f6   :  { %v4672_v2 = vmul.f32 0.044715, %v4666_v49  ;;  %v4661_v3 = vadd.f32 %v5245_v0, %v4660_v1  ;;  %v4670_v18 = vmul.f32 0.5, %v4666_v49  ;;  %v4926_v1 = vld [vmem:[%s6821_s19 + $0x8] sm:$0xff] }
0x27f8   :  { %v4674_v4 = vmul.f32 %v4672_v2, %v4666_v49  ;;  %v4671_v5 = vmul.f32 0.044715, %v4661_v3  ;;  %v4669_v16 = vmul.f32 0.5, %v4661_v3  ;;  %v4925_v2 = vld [vmem:[%s6821_s19] sm:$0xff] }
0x27fa   :  { %v4676_v6 = vmul.f32 %v4674_v4, %v4666_v49  ;;  %v4673_v46 = vmul.f32 %v4671_v5, %v4661_v3 }
0x27fc   :  { %v4678_v7 = vadd.f32 %v4676_v6, %v4666_v49  ;;  %v4675_v12 = vmul.f32 %v4673_v46, %v4661_v3  ;;  %v4927_v49 = vld [vmem:[%s6821_s19 + $0x10] sm:$0xff] }
0x27fe   :  { %v4680_v9 = vmul.f32 0.7978846, %v4678_v7  ;;  %v4677_v10 = vadd.f32 %v4675_v12, %v4661_v3  ;;  %v5264_v3 = vld [vmem:[%s6820_s18] ss:$0 sm:$0xff]  ;;  %v5011_v7 = vld [vmem:[%s6823_s21 + $0x8] sm:$0xff] }
0x27ff   :  { %v5010_v12 = vld [vmem:[%s6823_s21] sm:$0xff] }
0x2800   :  { %5878 = vtanh.f32 %v4680_v9  ;;  %v4679_v20 = vmul.f32 0.7978846, %v4677_v10  ;;  %v5266_v9 = vld [vmem:[%s6822_s20] ss:$0 sm:$0xff]  ;;  %s5954_s20 = smov [#allocation2]  }
0x2801   :  { %s5111_s21 = sshll.u32 %s5954_s20, 4  ;;  %s5112_s21 = int_to_ptr.vmem [resolvable:$true] %s5111_s21 }
0x2802   :  { %5880 = vtanh.f32 %v4679_v20  ;;  %s5896_s25 = scalar_lea.vmem %s5112_s21, 256  ;;  %p5901_p1 = scmp.lt.s32.totalorder %s5112_s21, %s5112_s21 }
0x2803   :  { %p5897_p0 = scmp.ne.s32.totalorder %s5112_s21, %s5896_s25  ;;  %p5902_p2 = scmp.lt.s32.totalorder %s5896_s25, %s5896_s25 }
0x2805   :  { %p5903_p3 = por %p5902_p2, %p5901_p1 }
0x2807   :  { %p5904_p4 = pnand %p5903_p3, %p5897_p0 }
0x280d   :  { %v5879_v11 = vpop.eup %5878 }
0x280e   :  { %v4684_v14 = vadd.f32 1.0, %v5879_v11 }
0x280f   :  { %v5881_v13 = vpop.eup %5880 }
0x2810   :  { %v4683_v17 = vadd.f32 1.0, %v5881_v13  ;;  %v4686_v8 = vmul.f32 %v4684_v14, %v4670_v18  ;;  %v5268_v14 = vld [vmem:[%s6824_s22] ss:$0 sm:$0xff] }
0x2812   :  { %v4685_v19 = vmul.f32 %v4683_v17, %v4669_v16 }
0x2814   :  { %5742 = vmatprep.mubr.msk.f32.mxu1 %vm2354_vm3, %v4685_v19 }
0x2815   :  { %5743 = vmatmul.mubr.msk.f32.vlgmr.msra.gmra.mxu1 %vm2354_vm3, %v4686_v8 }
0x2816   :  { %5771 = vmatprep.mubr.msk.f32.mxu1 %vm5942_vm1, %v5941_v41  ;;  %5768 = vmatpush3.msra.mxu1 %v5011_v7 }
0x2817   :  { %5769 = vmatprep.subr.mxu1 %v5941_v41 }
0x2818   :  { %5770 = vmatpush3.msra.mxu1 %v5010_v12 }
0x28d5   :  { %v5744_v22 = vpop.f32.mrf.mxu1 }
0x28d6   :  { %v4782_v23 = vadd.f32 %v5744_v22, %v5257_v24 }
0x28d7   :  { %v4776_v25 = vpop.f32.mrf.mxu1 }
0x28d8   :  { %v4786_v27 = vadd.f32 %v4782_v23, %v4574_v55  ;;  %v4777_v28 = vadd.f32 %v5257_v24, %v4776_v25 }
0x28da   :  { %v4785_v44 = vadd.f32 %v4777_v28, %v6674_v43  ;;  %v4794_v30 = vsel %vm82_vm0, %v4786_v27, 0.0  ;;  %v4842_v43 = vld [vmem:[%s6819_s17 + $0x10] sm:$0xff] }
0x28db   :  { %4795 = vadd.xlane.f32.xlu1 %v4794_v30  ;;  %5748 = vmatpush3.msra.mxu0 %v4842_v43 }
0x28dc   :  { %v4791_v31 = vsel %vm82_vm0, %v4785_v44, 0.0  ;;  %5749 = vmatprep.subr.mxu0 %v5941_v41 }
0x28dd   :  { %5750 = vmatpush3.msra.mxu0 %v4841_v45 }
0x28de   :  { %5751 = vmatprep.subr.mxu0 %v5941_v41 }
0x28df   :  { %4792 = vadd.xlane.f32.xlu1 %v4791_v31  ;;  %5752 = vmatpush3.msra.mxu0 %v4840_v29 }
0x28e0   :  { %5756 = vmatprep.subr.mxu0 %v5941_v41 }
0x2964   :  { %v4796_v32 = vpop.xlane.xlu1 %4795 }
0x2965   :  { %v4798_v61 = vmul.f32 0.03125, %v4796_v32 }
0x2967   :  { %v4800_v33 = vsub.f32 %v4786_v27, %v4798_v61 }
0x2968   :  { %v4793_v35 = vpop.xlane.xlu1 %4792 }
0x2969   :  { %v4797_v37 = vmul.f32 0.03125, %v4793_v35  ;;  %v4802_v34 = vmul.f32 %v4800_v33, %v4800_v33 }
0x296b   :  { %v4799_v38 = vsub.f32 %v4785_v44, %v4797_v37  ;;  %v4806_v21 = vsel %vm82_vm0, %v4802_v34, 0.0 }
0x296c   :  { %4807 = vadd.xlane.f32.xlu0 %v4806_v21 }
0x296d   :  { %v4801_v39 = vmul.f32 %v4799_v38, %v4799_v38 }
0x296f   :  { %v4803_v36 = vsel %vm82_vm0, %v4801_v39, 0.0 }
0x2970   :  { %4804 = vadd.xlane.f32.xlu1 %v4803_v36 }
0x29f5   :  { %v4808_v47 = vpop.xlane.xlu0 %4807 }
0x29f6   :  { %v4810_v26 = vmul.f32 0.03125, %v4808_v47 }
0x29f8   :  { %v4812_v48 = vadd.f32 1e-12, %v4810_v26 }
0x29f9   :  { %v4805_v50 = vpop.xlane.xlu1 %4804 }
0x29fa   :  { %5882 = vrsqrt.f32 %v4812_v48  ;;  %v4809_v52 = vmul.f32 0.03125, %v4805_v50 }
0x29fc   :  { %v4811_v53 = vadd.f32 1e-12, %v4809_v52 }
0x29fe   :  { %5884 = vrsqrt.f32 %v4811_v53 }
0x2a07   :  { %v5883_v51 = vpop.eup %5882 }
0x2a08   :  { %v4816_v55 = vmul.f32 %v5883_v51, %v4800_v33 }
0x2a0a   :  { %v4824_v57 = vmul.f32 %v5262_v54, %v4816_v55 }
0x2a0b   :  { %v5885_v58 = vpop.eup %5884 }
0x2a0c   :  { %v4815_v59 = vmul.f32 %v5885_v58, %v4799_v38  ;;  %v4832_v60 = vadd.f32 %v5263_v56, %v4824_v57 }
0x2a0e   :  { %v4823_v40 = vmul.f32 %v5262_v54, %v4815_v59  ;;  %4834 = vst.msk [vmem:[#allocation2 + $0x8] sm:$0xff] %vm82_vm0, %v4832_v60  ;;  %v4836_v63 = vrot.slane %v4832_v60, 7 }
0x2a10   :  { %v4831_v62 = vadd.f32 %v5263_v56, %v4823_v40 }
0x2a12   :  { %v4839_v0 = vsel %vm4838_vm4, %v4831_v62, %v4836_v63  ;;  %4833 = vst.msk [vmem:[#allocation2] sm:$0xff] %vm82_vm0, %v4831_v62 }
0x2a13   :  { %5754 = vmatmul.mubr.msk.f32.vlgmr.msra.gmra.mxu0 %vm82_vm0, %v4839_v0 }
0x2a14   :  { %5764 = vmatprep.mubr.msk.f32.mxu0 %vm5942_vm1, %v5941_v41  ;;  %5757 = vmatpush3.msra.mxu0 %v4928_v15 }
0x2a15   :  { %5758 = vmatprep.subr.mxu0 %v5941_v41 }
0x2a16   :  { %5759 = vmatpush3.msra.mxu0 %v4927_v49 }
0x2a17   :  { %5760 = vmatprep.subr.mxu0 %v5941_v41 }
0x2a18   :  { %5761 = vmatpush3.msra.mxu0 %v4926_v1 }
0x2a19   :  { %5762 = vmatprep.subr.mxu0 %v5941_v41 }
0x2a1a   :  { %5763 = vmatpush3.msra.mxu0 %v4925_v2 }
0x2ad3   :  { %v4920_v4 = vpop.f32.mrf.mxu0 }
0x2ad4   :  { %v4921_v5 = vadd.f32 %v5264_v3, %v4920_v4 }
0x2ad5   :  { %v5755_v6 = vpop.f32.mrf.mxu0 }
0x2ad6   :  { %5886 = vtanh.f32 %v4921_v5 }
0x2ae3   :  { %v5887_v46 = vpop.eup %5886 }
0x2ae4   :  { %5765 = vmatmul.mubr.msk.f32.vlgmr.msra.gmra.mxu0 %vm82_vm0, %v5887_v46 }
0x2ba4   :  { %v5005_v10 = vpop.f32.mrf.mxu0 }
0x2ba5   :  { %v5006_v20 = vadd.f32 %v5266_v9, %v5005_v10 }
0x2ba6   :  { %v5766_v11 = vpop.f32.mrf.mxu0 }
0x2ba7   :  { %5888 = vtanh.f32 %v5006_v20 }
0x2bb4   :  { %v5889_v13 = vpop.eup %5888 }
0x2bb5   :  { %5772 = vmatmul.mubr.msk.f32.vlgmr.msra.gmra.mxu1 %vm5019_vm5, %v5889_v13 }
0x2c75   :  { %v5089_v16 = vpop.f32.mrf.mxu1 }
0x2c76   :  { %v5090_v17 = vadd.f32 %v5268_v14, %v5089_v16 }
0x2c77   :  { %v5773_v41 = vpop.f32.mrf.mxu1 }
0x2c78   :  { %v5094_v18 = vsel %vm5093_vm6, %v5090_v17, -inf }
0x2c79   :  { %5095 = vmax.xlane.f32.xlu1 %v5094_v18 }
0x2d02   :  { %v5096_v19 = vpop.xlane.xlu1 %5095 }
0x2d03   :  { %v5097_v8 = vsub.f32 %v5090_v17, %v5096_v19 }
0x2d05   :  { %v5098_v24 = vmul.f32 1.442695, %v5097_v8 }
0x2d07   :  { %5890 = vpow2.f32 %v5098_v24 }
0x2d14   :  { %v5891_v22 = vpop.eup %5890 }
0x2d15   :  { %v5100_v23 = vsel %vm5093_vm6, %v5891_v22, 0.0 }
0x2d16   :  { %5101 = vadd.xlane.f32.xlu1 %v5100_v23 }
0x2d17   :  { %5907 = shalt.err (!%p5904_p4)
}
0x2d18   :  { %s5955_s22 = smov 128   ;;  %s5956_s6 = smov 8  }
0x2d19   :  { %5117 = dma.vmem_to_hbm [thread:$0]  %s5112_s21, 256, %s6825_s23, [#allocation3], %s5955_s22, %s5955_s22, %s5956_s6  }
0x2d1a   :  { %s5957_s4 = smov [#allocation4]  }
0x2d1b   :  { %s5124_s5 = sshll.u32 %s5957_s4, 4  ;;  %s5125_s5 = int_to_ptr.vmem [resolvable:$true] %s5124_s5 }
0x2d1c   :  { %s5916_s17 = scalar_lea.vmem %s5125_s5, 32  ;;  %p5921_p6 = scmp.lt.s32.totalorder %s5125_s5, %s5125_s5 }
0x2d1d   :  { %p5917_p5 = scmp.ne.s32.totalorder %s5125_s5, %s5916_s17  ;;  %p5922_p7 = scmp.lt.s32.totalorder %s5916_s17, %s5916_s17 }
0x2d1f   :  { %p5923_p8 = por %p5922_p7, %p5921_p6 }
0x2d21   :  { %p5924_p9 = pnand %p5923_p8, %p5917_p5 }
0x2d9f   :  { %v5102_v25 = vpop.xlane.xlu1 %5101 }
0x2da0   :  { %5892 = vrcp.f32 %v5102_v25 }
0x2dad   :  { %v5893_v27 = vpop.eup %5892 }
0x2dae   :  { %v5104_v28 = vmul.f32 %v5893_v27, %v5891_v22 }
0x2db0   :  { %5105 = vst.msk [vmem:[#allocation4] sm:$0x3] %vm5093_vm6, %v5104_v28 }
0x2db1   :  { %5927 = shalt.err (!%p5924_p9)
}
0x2db2   :  { %5127 = dma.vmem_to_hbm [thread:$0]  %s5125_s5, 32, %s6826_s24, [#allocation5]  }
0x2db3   :  { %5936 = dma.done.wait [#allocation3], 256  }
0x2db4   :  { %5937 = vsyncadd [#allocation3], 4294967040 }
0x2db5   :  { %5938 = dma.done.wait [#allocation5], 32  }
0x2db6   :  { %5939 = vsyncadd [#allocation5], 4294967264 }
0x2db7   :  { %5134 = vsyncpa [#allocation3], 1 }
0x2db8   :  { %5135 = vsyncpa [#allocation5], 1 }

</bundles_post_ra>
